<compile_context>
chip_gen: v6e
topology: v6e:2x2x1
jax: 0.10.0
libtpu: 0.0.40
codegen_flags: <defaults>
</compile_context>

<pallas_src>
import functools

import jax
import jax.numpy as jnp
from jax import lax
from jax.experimental import pallas as pl
from jax.experimental.pallas import tpu as pltpu

_LANES = 128          # lane-dense channel padding
_MAX_ROW_TILE = 256   # edge-row tile for larger graphs (bounded for v7x VMEM)
_VMEM_LIMIT = 32 * 1024 * 1024


# ----------------------------------------------------------------------------
# In-kernel helpers
# ----------------------------------------------------------------------------
def _leaky(y):
    return jnp.where(y >= 0.0, y, 0.01 * y)


def _run_mlp(parts, w_ref, b_ref, n_layers):
    """n_layers MLP with LeakyReLU(0.01) between layers (no final act).

    The first layer consumes len(parts) concatenated inputs; its weight is split
    so the kernel never concatenates along lanes:
      w_ref[0..len(parts)-1] -> split first-layer weights (each padded 128x128)
      w_ref[len(parts)..]    -> remaining layers
    All activations stay in VMEM/vregs.
    """
    h = b_ref[0]
    for i, p in enumerate(parts):
        h = h + jnp.dot(p, w_ref[i], preferred_element_type=jnp.float32)
    if n_layers > 1:
        h = _leaky(h)
    off = len(parts)
    for l in range(1, n_layers):
        h = jnp.dot(h, w_ref[off + l - 1], preferred_element_type=jnp.float32) + b_ref[l]
        if l < n_layers - 1:
            h = _leaky(h)
    return h


# ----------------------------------------------------------------------------
# Pallas kernels
# ----------------------------------------------------------------------------
def _node_conv_kernel(src_ref, dst_ref, dstr_ref, x_ref, w_ref, b_ref, o_ref, *, n_layers):
    """Fused NodeConv: gather + MLP + scatter-mean, one kernel, one grid step.

    Padded edges carry index -1 so their one-hot rows/columns are all-zero:
    they neither gather real data nor contribute to any node sum / degree.
    """
    e_rows = src_ref.shape[0]
    n_rows = x_ref.shape[0]
    x = x_ref[...]

    iota_en = lax.broadcasted_iota(jnp.int32, (e_rows, n_rows), 1)
    g_dst = (iota_en == dst_ref[...]).astype(jnp.float32)           # [E, N]
    g_src = (iota_en == src_ref[...]).astype(jnp.float32)           # [E, N]
    xi = jnp.dot(g_dst, x, preferred_element_type=jnp.float32)      # x[dst]
    xj = jnp.dot(g_src, x, preferred_element_type=jnp.float32)      # x[src]

    m = _run_mlp([xi, xj], w_ref, b_ref, n_layers)                  # [E, 128]

    iota_ne = lax.broadcasted_iota(jnp.int32, (n_rows, e_rows), 0)
    scat = (iota_ne == dstr_ref[...]).astype(jnp.float32)           # [N, E]
    node_sum = jnp.dot(scat, m, preferred_element_type=jnp.float32)  # [N, 128]
    deg = jnp.sum(scat, axis=1, keepdims=True)                      # [N, 1]
    o_ref[...] = node_sum / jnp.maximum(deg, 1.0)                   # scatter-mean


def _edge_conv_kernel(src_ref, dst_ref, x_ref, g0_ref,
                      wm_ref, bm_ref, wc_ref, bc_ref,
                      e_ref, ss_ref, *, n_layers):
    """Fused EdgeConv: gather + batched fwd/bwd msg-MLP + sym + side-loss + comb-MLP."""
    e_rows = src_ref.shape[0]
    n_rows = x_ref.shape[0]
    x = x_ref[...]

    iota_en = lax.broadcasted_iota(jnp.int32, (e_rows, n_rows), 1)
    g_src = (iota_en == src_ref[...]).astype(jnp.float32)
    g_dst = (iota_en == dst_ref[...]).astype(jnp.float32)
    xs = jnp.dot(g_src, x, preferred_element_type=jnp.float32)
    xd = jnp.dot(g_dst, x, preferred_element_type=jnp.float32)

    # fwd = MLP([xs, xd]) on rows [0, E); bwd = MLP([xd, xs]) on rows [E, 2E)
    # -> one batched 2E-row MXU pass per layer.
    a = jnp.concatenate([xs, xd], axis=0)
    b = jnp.concatenate([xd, xs], axis=0)
    f = _run_mlp([a, b], wm_ref, bm_ref, n_layers)                  # [2E, 128]
    f_fwd = f[:e_rows]
    f_bwd = f[e_rows:]

    e_sym = 0.5 * (f_fwd + f_bwd)
    d = f_fwd - f_bwd                      # padded rows/lanes are identical -> 0

    @pl.when(pl.program_id(0) == 0)
    def _():
        ss_ref[...] = jnp.zeros_like(ss_ref)
    ss_ref[...] += jnp.sum(d * d, keepdims=True)

    e_ref[...] = _run_mlp([e_sym, g0_ref[...]], wc_ref, bc_ref, n_layers)


# ----------------------------------------------------------------------------
# pallas_call wrappers
# ----------------------------------------------------------------------------
def _compiler_params(semantics):
    return pltpu.CompilerParams(dimension_semantics=semantics,
                                vmem_limit_bytes=_VMEM_LIMIT)


def node_conv_pallas(pack, x_pad, src_col, dst_col, dst_row, n_layers):
    ws, bs = pack["W"], pack["B"]
    e_pad = src_col.shape[0]
    n_pad = x_pad.shape[0]
    # TODO(synk): for very large graphs, tile edges and accumulate node sums/degree
    #             across tiles; single-block version is sized for small graphs.
    return pl.pallas_call(
        functools.partial(_node_conv_kernel, n_layers=n_layers),
        out_shape=jax.ShapeDtypeStruct((n_pad, _LANES), jnp.float32),
        grid=(1,),
        in_specs=[
            pl.BlockSpec((e_pad, 1), lambda i: (0, 0)),
            pl.BlockSpec((e_pad, 1), lambda i: (0, 0)),
            pl.BlockSpec((1, e_pad), lambda i: (0, 0)),
            pl.BlockSpec((n_pad, _LANES), lambda i: (0, 0)),
            pl.BlockSpec(ws.shape, lambda i: (0, 0, 0)),
            pl.BlockSpec(bs.shape, lambda i: (0, 0, 0)),
        ],
        out_specs=pl.BlockSpec((n_pad, _LANES), lambda i: (0, 0)),
        compiler_params=_compiler_params(("parallel",)),
    )(src_col, dst_col, dst_row, x_pad, ws, bs)


def edge_conv_pallas(msg_pack, comb_pack, x_pad, src_col, dst_col, g0, row_tile, n_layers):
    wm, bm = msg_pack["W"], msg_pack["B"]
    wc, bc = comb_pack["W"], comb_pack["B"]
    e_pad = src_col.shape[0]
    n_pad = x_pad.shape[0]
    e_out, ss = pl.pallas_call(
        functools.partial(_edge_conv_kernel, n_layers=n_layers),
        out_shape=(
            jax.ShapeDtypeStruct((e_pad, _LANES), jnp.float32),
            jax.ShapeDtypeStruct((1, 1), jnp.float32),
        ),
        grid=(e_pad // row_tile,),
        in_specs=[
            pl.BlockSpec((row_tile, 1), lambda i: (i, 0)),       # src ids
            pl.BlockSpec((row_tile, 1), lambda i: (i, 0)),       # dst ids
            pl.BlockSpec((n_pad, _LANES), lambda i: (0, 0)),     # node features (full)
            pl.BlockSpec((row_tile, _LANES), lambda i: (i, 0)),  # init edge features
            pl.BlockSpec(wm.shape, lambda i: (0, 0, 0)),
            pl.BlockSpec(bm.shape, lambda i: (0, 0, 0)),
            pl.BlockSpec(wc.shape, lambda i: (0, 0, 0)),
            pl.BlockSpec(bc.shape, lambda i: (0, 0, 0)),
        ],
        out_specs=(
            pl.BlockSpec((row_tile, _LANES), lambda i: (i, 0)),
            pl.BlockSpec((1, 1), lambda i: (0, 0)),              # revisited ss accumulator
        ),
        compiler_params=_compiler_params(("arbitrary",)),
    )(src_col, dst_col, x_pad, g0, wm, bm, wc, bc)
    return e_out, ss[0, 0]


# ----------------------------------------------------------------------------
# Parameter construction & packing (lane-dense, split first layer)
# ----------------------------------------------------------------------------
def _round_up(n, m):
    return ((n + m - 1) // m) * m


def _pad2(a, rows, cols):
    a = a.astype(jnp.float32)
    return jnp.pad(a, ((0, rows - a.shape[0]), (0, cols - a.shape[1])))


def init_mlp(key, d_in, d_out, n_hidden_layer, hl_factor):
    hidden = d_in * hl_factor
    dims = [d_in, hidden] + [hidden] * n_hidden_layer + [d_out]
    params = []
    for i in range(len(dims) - 1):
        key, k1 = jax.random.split(key)
        w = jax.random.normal(k1, (dims[i], dims[i + 1]), jnp.float32) / jnp.sqrt(
            jnp.float32(dims[i]))
        params.append((w, jnp.zeros((dims[i + 1],), jnp.float32)))
    return params


def init_qgcnn(key, c_in, c_out, n_hidden_layer, hl_factor):
    ks = jax.random.split(key, 6)
    return {
        "node_conv1": init_mlp(ks[0], 2 * c_in, c_in, n_hidden_layer, hl_factor),
        "edge_conv1_msg": init_mlp(ks[1], 2 * c_in, 2 * c_in, n_hidden_layer, hl_factor),
        "edge_conv1_comb": init_mlp(ks[2], 2 * c_in + 2, 2 * c_in, n_hidden_layer, hl_factor),
        "node_conv2": init_mlp(ks[3], 2 * c_in, c_in, n_hidden_layer, hl_factor),
        "edge_conv2_msg": init_mlp(ks[4], 2 * c_in, c_out, n_hidden_layer, hl_factor),
        "edge_conv2_comb": init_mlp(ks[5], c_out + 2 * c_in, c_out, n_hidden_layer, hl_factor),
    }


def pack_mlp(layers, split):
    """Pad every weight/bias to 128 lanes; split layer-1 at the concat boundary."""
    for w, _ in layers:
        assert w.shape[0] <= _LANES and w.shape[1] <= _LANES, "channels must fit 128 lanes"
    w1, _ = layers[0]
    ws = [_pad2(w1[:split], _LANES, _LANES), _pad2(w1[split:], _LANES, _LANES)]
    ws += [_pad2(w, _LANES, _LANES) for w, _ in layers[1:]]
    bs = [_pad2(b.reshape(1, -1), 1, _LANES) for _, b in layers]
    return {"W": jnp.stack(ws, 0), "B": jnp.stack(bs, 0)}


def pack_qgcnn(raw, c_in, c_out):
    return {
        "node_conv1": pack_mlp(raw["node_conv1"], c_in),
        "edge_conv1_msg": pack_mlp(raw["edge_conv1_msg"], c_in),
        "edge_conv1_comb": pack_mlp(raw["edge_conv1_comb"], 2 * c_in),
        "node_conv2": pack_mlp(raw["node_conv2"], c_in),
        "edge_conv2_msg": pack_mlp(raw["edge_conv2_msg"], c_in),
        "edge_conv2_comb": pack_mlp(raw["edge_conv2_comb"], c_out),
    }


# ----------------------------------------------------------------------------
# Forward pass (4 fused pallas_calls total)
# ----------------------------------------------------------------------------
@functools.partial(jax.jit, static_argnames=("n_layers", "c_in", "c_out"))
def qgcnn_forward(params, node_features, edge_index, angles, gt_edges, actions,
                  *, n_layers, c_in, c_out):
    del gt_edges  # only used by the (omitted) tensorboard logging branch
    src = edge_index[0].astype(jnp.int32)
    dst = edge_index[1].astype(jnp.int32)
    n_nodes = node_features.shape[0]
    n_edges = src.shape[0]

    n_pad = _round_up(n_nodes, 8)
    if n_edges <= _MAX_ROW_TILE:
        e_pad = _round_up(n_edges, 8)
        row_tile = e_pad
    else:
        e_pad = _round_up(n_edges, _MAX_ROW_TILE)
        row_tile = _MAX_ROW_TILE

    # Pad ONCE: every Pallas buffer below is lane-dense (last dim = 128) and
    # sublane-aligned; padded edges carry index -1 (inert in gather/scatter).
    x = _pad2(node_features, n_pad, _LANES)
    src_p = jnp.pad(src, (0, e_pad - n_edges), constant_values=-1)
    dst_p = jnp.pad(dst, (0, e_pad - n_edges), constant_values=-1)
    src_col, dst_col, dst_row = src_p[:, None], dst_p[:, None], dst_p[None, :]
    g1 = _pad2(jnp.concatenate([actions, angles], axis=-1), e_pad, _LANES)

    x = node_conv_pallas(params["node_conv1"], x, src_col, dst_col, dst_row, n_layers)
    e, ss1 = edge_conv_pallas(params["edge_conv1_msg"], params["edge_conv1_comb"],
                              x, src_col, dst_col, g1, row_tile, n_layers)
    sl1 = ss1 / jnp.float32(n_edges * 2 * c_in)

    x = node_conv_pallas(params["node_conv2"], x, src_col, dst_col, dst_row, n_layers)
    e, ss2 = edge_conv_pallas(params["edge_conv2_msg"], params["edge_conv2_comb"],
                              x, src_col, dst_col, e, row_tile, n_layers)
    sl2 = ss2 / jnp.float32(n_edges * c_out)

    side_loss = (sl1 + sl2) / 2.0
    # TODO(synk): writer/PCA/matplotlib bar-plot logging branch is host-side
    # visualization with no Pallas equivalent; intentionally omitted.
    return e[:n_edges, :c_out], side_loss


# ----------------------------------------------------------------------------
if __name__ == "__main__":
    key = jax.random.PRNGKey(0)
    C_IN, C_OUT, N_HIDDEN, HL_FACTOR = 8, 16, 1, 2
    N_NODES, N_EDGES = 16, 32

    ks = jax.random.split(key, 7)
    node_features = jax.random.normal(ks[0], (N_NODES, C_IN), jnp.float32)
    src = jax.random.randint(ks[1], (N_EDGES,), 0, N_NODES)
    dst = jax.random.randint(ks[2], (N_EDGES,), 0, N_NODES)
    edge_index = jnp.stack([src, dst], axis=0)  # [2, E]
    angles = jax.random.normal(ks[3], (N_EDGES, 1), jnp.float32)
    actions = jax.random.uniform(ks[4], (N_EDGES, 1), jnp.float32)
    gt_edges = jax.random.uniform(ks[5], (N_EDGES,), jnp.float32)

    raw_params = init_qgcnn(ks[6], C_IN, C_OUT, N_HIDDEN, HL_FACTOR)
    params = pack_qgcnn(raw_params, C_IN, C_OUT)

    edge_feats, side_loss = qgcnn_forward(
        params, node_features, edge_index, angles, gt_edges, actions,
        n_layers=2 + N_HIDDEN, c_in=C_IN, c_out=C_OUT)
    jax.block_until_ready((edge_feats, side_loss))
    assert edge_feats.shape == (N_EDGES, C_OUT)
    assert side_loss.shape == ()
    print("KERNEL_OK")
</pallas_src>

<mosaic_0001>
module attributes {stable_mosaic.version = 11 : i64} {
  func.func @_node_conv_kernel(%arg0: i32, %arg1: memref<32x1xi32, #tpu.memory_space<vmem>>, %arg2: memref<32x1xi32, #tpu.memory_space<vmem>>, %arg3: memref<1x32xi32, #tpu.memory_space<vmem>>, %arg4: memref<16x128xf32, #tpu.memory_space<vmem>>, %arg5: memref<4x128x128xf32, #tpu.memory_space<vmem>>, %arg6: memref<3x1x128xf32, #tpu.memory_space<vmem>>, %arg7: memref<16x128xf32, #tpu.memory_space<vmem>>) attributes {dimension_semantics = [#tpu.dimension_semantics<parallel>], iteration_bounds = array<i64: 1>, scalar_prefetch = 0 : i64, scratch_operands = 0 : i64, tpu.core_type = #tpu.core_type<tc>, window_params = [{pipeline_mode = #tpu.pipeline_mode<synchronous>, transform_indices = @transform_0, window_bounds = array<i64: 32, 1>}, {pipeline_mode = #tpu.pipeline_mode<synchronous>, transform_indices = @transform_1, window_bounds = array<i64: 32, 1>}, {pipeline_mode = #tpu.pipeline_mode<synchronous>, transform_indices = @transform_2, window_bounds = array<i64: 1, 32>}, {pipeline_mode = #tpu.pipeline_mode<synchronous>, transform_indices = @transform_3, window_bounds = array<i64: 16, 128>}, {pipeline_mode = #tpu.pipeline_mode<synchronous>, transform_indices = @transform_4, window_bounds = array<i64: 4, 128, 128>}, {pipeline_mode = #tpu.pipeline_mode<synchronous>, transform_indices = @transform_5, window_bounds = array<i64: 3, 1, 128>}, {pipeline_mode = #tpu.pipeline_mode<synchronous>, transform_indices = @transform_6, window_bounds = array<i64: 16, 128>}]} {
    %c0 = arith.constant 0 : index
    %c0_0 = arith.constant 0 : index
    %0 = vector.load %arg4[%c0, %c0_0] : memref<16x128xf32, #tpu.memory_space<vmem>>, vector<16x128xf32>
    %1 = tpu.iota {dimensions = array<i32: 1>} : vector<32x16xi32>
    %c0_1 = arith.constant 0 : index
    %c0_2 = arith.constant 0 : index
    %2 = vector.load %arg2[%c0_1, %c0_2] : memref<32x1xi32, #tpu.memory_space<vmem>>, vector<32x1xi32>
    %3 = vector.broadcast %2 : vector<32x1xi32> to vector<32x16xi32>
    %4 = arith.cmpi eq, %1, %3 : vector<32x16xi32>
    %5 = arith.extui %4 : vector<32x16xi1> to vector<32x16xi32>
    %6 = arith.sitofp %5 : vector<32x16xi32> to vector<32x16xf32>
    %c0_3 = arith.constant 0 : index
    %c0_4 = arith.constant 0 : index
    %7 = vector.load %arg1[%c0_3, %c0_4] : memref<32x1xi32, #tpu.memory_space<vmem>>, vector<32x1xi32>
    %8 = vector.broadcast %7 : vector<32x1xi32> to vector<32x16xi32>
    %9 = arith.cmpi eq, %1, %8 : vector<32x16xi32>
    %10 = arith.extui %9 : vector<32x16xi1> to vector<32x16xi32>
    %11 = arith.sitofp %10 : vector<32x16xi32> to vector<32x16xf32>
    %cst = arith.constant dense<0.000000e+00> : vector<32x128xf32>
    %12 = tpu.matmul %6, %0, %cst {dimension_numbers = #tpu.dot_dimension_numbers<[1], [0], [0], [1], [0, 0, 1, 1], [], []>} : vector<32x16xf32>, vector<16x128xf32>, vector<32x128xf32> -> vector<32x128xf32>
    %cst_5 = arith.constant dense<0.000000e+00> : vector<32x128xf32>
    %13 = tpu.matmul %11, %0, %cst_5 {dimension_numbers = #tpu.dot_dimension_numbers<[1], [0], [0], [1], [0, 0, 1, 1], [], []>} : vector<32x16xf32>, vector<16x128xf32>, vector<32x128xf32> -> vector<32x128xf32>
    %c0_6 = arith.constant 0 : index
    %c0_7 = arith.constant 0 : index
    %c0_8 = arith.constant 0 : index
    %14 = vector.load %arg6[%c0_6, %c0_7, %c0_8] : memref<3x1x128xf32, #tpu.memory_space<vmem>>, vector<1x1x128xf32>
    %15 = vector.shape_cast %14 : vector<1x1x128xf32> to vector<1x128xf32>
    %c0_9 = arith.constant 0 : index
    %c0_10 = arith.constant 0 : index
    %c0_11 = arith.constant 0 : index
    %16 = vector.load %arg5[%c0_9, %c0_10, %c0_11] : memref<4x128x128xf32, #tpu.memory_space<vmem>>, vector<1x128x128xf32>
    %17 = vector.shape_cast %16 : vector<1x128x128xf32> to vector<128x128xf32>
    %cst_12 = arith.constant dense<0.000000e+00> : vector<32x128xf32>
    %18 = tpu.matmul %12, %17, %cst_12 {dimension_numbers = #tpu.dot_dimension_numbers<[1], [0], [0], [1], [0, 0, 1, 1], [], []>} : vector<32x128xf32>, vector<128x128xf32>, vector<32x128xf32> -> vector<32x128xf32>
    %19 = vector.broadcast %15 : vector<1x128xf32> to vector<32x128xf32>
    %20 = arith.addf %19, %18 : vector<32x128xf32>
    %c1 = arith.constant 1 : index
    %c0_13 = arith.constant 0 : index
    %c0_14 = arith.constant 0 : index
    %21 = vector.load %arg5[%c1, %c0_13, %c0_14] : memref<4x128x128xf32, #tpu.memory_space<vmem>>, vector<1x128x128xf32>
    %22 = vector.shape_cast %21 : vector<1x128x128xf32> to vector<128x128xf32>
    %cst_15 = arith.constant dense<0.000000e+00> : vector<32x128xf32>
    %23 = tpu.matmul %13, %22, %cst_15 {dimension_numbers = #tpu.dot_dimension_numbers<[1], [0], [0], [1], [0, 0, 1, 1], [], []>} : vector<32x128xf32>, vector<128x128xf32>, vector<32x128xf32> -> vector<32x128xf32>
    %24 = arith.addf %20, %23 : vector<32x128xf32>
    %cst_16 = arith.constant 0.000000e+00 : f32
    %25 = vector.broadcast %cst_16 : f32 to vector<32x128xf32>
    %26 = arith.cmpf oge, %24, %25 : vector<32x128xf32>
    %cst_17 = arith.constant 0.00999999977 : f32
    %27 = vector.broadcast %cst_17 : f32 to vector<32x128xf32>
    %28 = arith.mulf %27, %24 : vector<32x128xf32>
    %29 = arith.select %26, %24, %28 : vector<32x128xi1>, vector<32x128xf32>
    %c2 = arith.constant 2 : index
    %c0_18 = arith.constant 0 : index
    %c0_19 = arith.constant 0 : index
    %30 = vector.load %arg5[%c2, %c0_18, %c0_19] : memref<4x128x128xf32, #tpu.memory_space<vmem>>, vector<1x128x128xf32>
    %31 = vector.shape_cast %30 : vector<1x128x128xf32> to vector<128x128xf32>
    %cst_20 = arith.constant dense<0.000000e+00> : vector<32x128xf32>
    %32 = tpu.matmul %29, %31, %cst_20 {dimension_numbers = #tpu.dot_dimension_numbers<[1], [0], [0], [1], [0, 0, 1, 1], [], []>} : vector<32x128xf32>, vector<128x128xf32>, vector<32x128xf32> -> vector<32x128xf32>
    %c1_21 = arith.constant 1 : index
    %c0_22 = arith.constant 0 : index
    %c0_23 = arith.constant 0 : index
    %33 = vector.load %arg6[%c1_21, %c0_22, %c0_23] : memref<3x1x128xf32, #tpu.memory_space<vmem>>, vector<1x1x128xf32>
    %34 = vector.shape_cast %33 : vector<1x1x128xf32> to vector<1x128xf32>
    %35 = vector.broadcast %34 : vector<1x128xf32> to vector<32x128xf32>
    %36 = arith.addf %32, %35 : vector<32x128xf32>
    %cst_24 = arith.constant 0.000000e+00 : f32
    %37 = vector.broadcast %cst_24 : f32 to vector<32x128xf32>
    %38 = arith.cmpf oge, %36, %37 : vector<32x128xf32>
    %cst_25 = arith.constant 0.00999999977 : f32
    %39 = vector.broadcast %cst_25 : f32 to vector<32x128xf32>
    %40 = arith.mulf %39, %36 : vector<32x128xf32>
    %41 = arith.select %38, %36, %40 : vector<32x128xi1>, vector<32x128xf32>
    %c3 = arith.constant 3 : index
    %c0_26 = arith.constant 0 : index
    %c0_27 = arith.constant 0 : index
    %42 = vector.load %arg5[%c3, %c0_26, %c0_27] : memref<4x128x128xf32, #tpu.memory_space<vmem>>, vector<1x128x128xf32>
    %43 = vector.shape_cast %42 : vector<1x128x128xf32> to vector<128x128xf32>
    %cst_28 = arith.constant dense<0.000000e+00> : vector<32x128xf32>
    %44 = tpu.matmul %41, %43, %cst_28 {dimension_numbers = #tpu.dot_dimension_numbers<[1], [0], [0], [1], [0, 0, 1, 1], [], []>} : vector<32x128xf32>, vector<128x128xf32>, vector<32x128xf32> -> vector<32x128xf32>
    %c2_29 = arith.constant 2 : index
    %c0_30 = arith.constant 0 : index
    %c0_31 = arith.constant 0 : index
    %45 = vector.load %arg6[%c2_29, %c0_30, %c0_31] : memref<3x1x128xf32, #tpu.memory_space<vmem>>, vector<1x1x128xf32>
    %46 = vector.shape_cast %45 : vector<1x1x128xf32> to vector<1x128xf32>
    %47 = vector.broadcast %46 : vector<1x128xf32> to vector<32x128xf32>
    %48 = arith.addf %44, %47 : vector<32x128xf32>
    %49 = tpu.iota {dimensions = array<i32: 0>} : vector<16x32xi32>
    %c0_32 = arith.constant 0 : index
    %c0_33 = arith.constant 0 : index
    %50 = vector.load %arg3[%c0_32, %c0_33] : memref<1x32xi32, #tpu.memory_space<vmem>>, vector<1x32xi32>
    %51 = vector.broadcast %50 : vector<1x32xi32> to vector<16x32xi32>
    %52 = arith.cmpi eq, %49, %51 : vector<16x32xi32>
    %53 = arith.extui %52 : vector<16x32xi1> to vector<16x32xi32>
    %54 = arith.sitofp %53 : vector<16x32xi32> to vector<16x32xf32>
    %cst_34 = arith.constant dense<0.000000e+00> : vector<16x128xf32>
    %55 = tpu.matmul %54, %48, %cst_34 {dimension_numbers = #tpu.dot_dimension_numbers<[1], [0], [0], [1], [0, 0, 1, 1], [], []>} : vector<16x32xf32>, vector<32x128xf32>, vector<16x128xf32> -> vector<16x128xf32>
    %cst_35 = arith.constant dense<0.000000e+00> : vector<16xf32>
    %56 = vector.multi_reduction <add>, %54, %cst_35 [1] : vector<16x32xf32> to vector<16xf32>
    %57 = vector.shape_cast %56 : vector<16xf32> to vector<16x1xf32>
    %cst_36 = arith.constant 1.000000e+00 : f32
    %58 = vector.broadcast %cst_36 : f32 to vector<16x1xf32>
    %59 = arith.maximumf %57, %58 : vector<16x1xf32>
    %60 = vector.broadcast %59 : vector<16x1xf32> to vector<16x128xf32>
    %61 = arith.divf %55, %60 : vector<16x128xf32>
    %c0_37 = arith.constant 0 : index
    %c0_38 = arith.constant 0 : index
    %62 = vector.load %arg7[%c0_37, %c0_38] : memref<16x128xf32, #tpu.memory_space<vmem>>, vector<16x128xf32>
    tpu.vector_store %arg7[%c0_37, %c0_38], %61 {strides = array<i32>} : memref<16x128xf32, #tpu.memory_space<vmem>>, vector<16x128xf32>,
    return
  }
  func.func @transform_0(%arg0: i32) -> (i32, i32) {
    %c0_i32 = arith.constant 0 : i32
    %c0_i32_0 = arith.constant 0 : i32
    %c0_i32_1 = arith.constant 0 : i32
    return %c0_i32, %c0_i32_0 : i32, i32
  }
  func.func @transform_1(%arg0: i32) -> (i32, i32) {
    %c0_i32 = arith.constant 0 : i32
    %c0_i32_0 = arith.constant 0 : i32
    %c0_i32_1 = arith.constant 0 : i32
    return %c0_i32, %c0_i32_0 : i32, i32
  }
  func.func @transform_2(%arg0: i32) -> (i32, i32) {
    %c0_i32 = arith.constant 0 : i32
    %c0_i32_0 = arith.constant 0 : i32
    %c0_i32_1 = arith.constant 0 : i32
    return %c0_i32, %c0_i32_0 : i32, i32
  }
  func.func @transform_3(%arg0: i32) -> (i32, i32) {
    %c0_i32 = arith.constant 0 : i32
    %c0_i32_0 = arith.constant 0 : i32
    %c0_i32_1 = arith.constant 0 : i32
    return %c0_i32, %c0_i32_0 : i32, i32
  }
  func.func @transform_4(%arg0: i32) -> (i32, i32, i32) {
    %c0_i32 = arith.constant 0 : i32
    %c0_i32_0 = arith.constant 0 : i32
    %c0_i32_1 = arith.constant 0 : i32
    %c0_i32_2 = arith.constant 0 : i32
    return %c0_i32, %c0_i32_0, %c0_i32_1 : i32, i32, i32
  }
  func.func @transform_5(%arg0: i32) -> (i32, i32, i32) {
    %c0_i32 = arith.constant 0 : i32
    %c0_i32_0 = arith.constant 0 : i32
    %c0_i32_1 = arith.constant 0 : i32
    %c0_i32_2 = arith.constant 0 : i32
    return %c0_i32, %c0_i32_0, %c0_i32_1 : i32, i32, i32
  }
  func.func @transform_6(%arg0: i32) -> (i32, i32) {
    %c0_i32 = arith.constant 0 : i32
    %c0_i32_0 = arith.constant 0 : i32
    %c0_i32_1 = arith.constant 0 : i32
    return %c0_i32, %c0_i32_0 : i32, i32
  }
}

module attributes {stable_mosaic.version = 11 : i64} {
  func.func @_edge_conv_kernel(%arg0: i32, %arg1: memref<32x1xi32, #tpu.memory_space<vmem>>, %arg2: memref<32x1xi32, #tpu.memory_space<vmem>>, %arg3: memref<16x128xf32, #tpu.memory_space<vmem>>, %arg4: memref<32x128xf32, #tpu.memory_space<vmem>>, %arg5: memref<4x128x128xf32, #tpu.memory_space<vmem>>, %arg6: memref<3x1x128xf32, #tpu.memory_space<vmem>>, %arg7: memref<4x128x128xf32, #tpu.memory_space<vmem>>, %arg8: memref<3x1x128xf32, #tpu.memory_space<vmem>>, %arg9: memref<32x128xf32, #tpu.memory_space<vmem>>, %arg10: memref<1x1xf32, #tpu.memory_space<vmem>>) attributes {dimension_semantics = [#tpu.dimension_semantics<arbitrary>], iteration_bounds = array<i64: 1>, scalar_prefetch = 0 : i64, scratch_operands = 0 : i64, tpu.core_type = #tpu.core_type<tc>, window_params = [{transform_indices = @transform_0, window_bounds = array<i64: 32, 1>}, {transform_indices = @transform_1, window_bounds = array<i64: 32, 1>}, {pipeline_mode = #tpu.pipeline_mode<synchronous>, transform_indices = @transform_2, window_bounds = array<i64: 16, 128>}, {transform_indices = @transform_3, window_bounds = array<i64: 32, 128>}, {pipeline_mode = #tpu.pipeline_mode<synchronous>, transform_indices = @transform_4, window_bounds = array<i64: 4, 128, 128>}, {pipeline_mode = #tpu.pipeline_mode<synchronous>, transform_indices = @transform_5, window_bounds = array<i64: 3, 1, 128>}, {pipeline_mode = #tpu.pipeline_mode<synchronous>, transform_indices = @transform_6, window_bounds = array<i64: 4, 128, 128>}, {pipeline_mode = #tpu.pipeline_mode<synchronous>, transform_indices = @transform_7, window_bounds = array<i64: 3, 1, 128>}, {transform_indices = @transform_8, window_bounds = array<i64: 32, 128>}, {pipeline_mode = #tpu.pipeline_mode<synchronous>, transform_indices = @transform_9, window_bounds = array<i64: 1, 1>}]} {
    %c0 = arith.constant 0 : index
    %c0_0 = arith.constant 0 : index
    %0 = vector.load %arg3[%c0, %c0_0] : memref<16x128xf32, #tpu.memory_space<vmem>>, vector<16x128xf32>
    %1 = tpu.iota {dimensions = array<i32: 1>} : vector<32x16xi32>
    %c0_1 = arith.constant 0 : index
    %c0_2 = arith.constant 0 : index
    %2 = vector.load %arg1[%c0_1, %c0_2] : memref<32x1xi32, #tpu.memory_space<vmem>>, vector<32x1xi32>
    %3 = vector.broadcast %2 : vector<32x1xi32> to vector<32x16xi32>
    %4 = arith.cmpi eq, %1, %3 : vector<32x16xi32>
    %5 = arith.extui %4 : vector<32x16xi1> to vector<32x16xi32>
    %6 = arith.sitofp %5 : vector<32x16xi32> to vector<32x16xf32>
    %c0_3 = arith.constant 0 : index
    %c0_4 = arith.constant 0 : index
    %7 = vector.load %arg2[%c0_3, %c0_4] : memref<32x1xi32, #tpu.memory_space<vmem>>, vector<32x1xi32>
    %8 = vector.broadcast %7 : vector<32x1xi32> to vector<32x16xi32>
    %9 = arith.cmpi eq, %1, %8 : vector<32x16xi32>
    %10 = arith.extui %9 : vector<32x16xi1> to vector<32x16xi32>
    %11 = arith.sitofp %10 : vector<32x16xi32> to vector<32x16xf32>
    %cst = arith.constant dense<0.000000e+00> : vector<32x128xf32>
    %12 = tpu.matmul %6, %0, %cst {dimension_numbers = #tpu.dot_dimension_numbers<[1], [0], [0], [1], [0, 0, 1, 1], [], []>} : vector<32x16xf32>, vector<16x128xf32>, vector<32x128xf32> -> vector<32x128xf32>
    %cst_5 = arith.constant dense<0.000000e+00> : vector<32x128xf32>
    %13 = tpu.matmul %11, %0, %cst_5 {dimension_numbers = #tpu.dot_dimension_numbers<[1], [0], [0], [1], [0, 0, 1, 1], [], []>} : vector<32x16xf32>, vector<16x128xf32>, vector<32x128xf32> -> vector<32x128xf32>
    %14 = tpu.concatenate %12, %13 in 0 : vector<32x128xf32>, vector<32x128xf32> -> vector<64x128xf32>
    %15 = tpu.concatenate %13, %12 in 0 : vector<32x128xf32>, vector<32x128xf32> -> vector<64x128xf32>
    %c0_6 = arith.constant 0 : index
    %c0_7 = arith.constant 0 : index
    %c0_8 = arith.constant 0 : index
    %16 = vector.load %arg6[%c0_6, %c0_7, %c0_8] : memref<3x1x128xf32, #tpu.memory_space<vmem>>, vector<1x1x128xf32>
    %17 = vector.shape_cast %16 : vector<1x1x128xf32> to vector<1x128xf32>
    %c0_9 = arith.constant 0 : index
    %c0_10 = arith.constant 0 : index
    %c0_11 = arith.constant 0 : index
    %18 = vector.load %arg5[%c0_9, %c0_10, %c0_11] : memref<4x128x128xf32, #tpu.memory_space<vmem>>, vector<1x128x128xf32>
    %19 = vector.shape_cast %18 : vector<1x128x128xf32> to vector<128x128xf32>
    %cst_12 = arith.constant dense<0.000000e+00> : vector<64x128xf32>
    %20 = tpu.matmul %14, %19, %cst_12 {dimension_numbers = #tpu.dot_dimension_numbers<[1], [0], [0], [1], [0, 0, 1, 1], [], []>} : vector<64x128xf32>, vector<128x128xf32>, vector<64x128xf32> -> vector<64x128xf32>
    %21 = vector.broadcast %17 : vector<1x128xf32> to vector<64x128xf32>
    %22 = arith.addf %21, %20 : vector<64x128xf32>
    %c1 = arith.constant 1 : index
    %c0_13 = arith.constant 0 : index
    %c0_14 = arith.constant 0 : index
    %23 = vector.load %arg5[%c1, %c0_13, %c0_14] : memref<4x128x128xf32, #tpu.memory_space<vmem>>, vector<1x128x128xf32>
    %24 = vector.shape_cast %23 : vector<1x128x128xf32> to vector<128x128xf32>
    %cst_15 = arith.constant dense<0.000000e+00> : vector<64x128xf32>
    %25 = tpu.matmul %15, %24, %cst_15 {dimension_numbers = #tpu.dot_dimension_numbers<[1], [0], [0], [1], [0, 0, 1, 1], [], []>} : vector<64x128xf32>, vector<128x128xf32>, vector<64x128xf32> -> vector<64x128xf32>
    %26 = arith.addf %22, %25 : vector<64x128xf32>
    %cst_16 = arith.constant 0.000000e+00 : f32
    %27 = vector.broadcast %cst_16 : f32 to vector<64x128xf32>
    %28 = arith.cmpf oge, %26, %27 : vector<64x128xf32>
    %cst_17 = arith.constant 0.00999999977 : f32
    %29 = vector.broadcast %cst_17 : f32 to vector<64x128xf32>
    %30 = arith.mulf %29, %26 : vector<64x128xf32>
    %31 = arith.select %28, %26, %30 : vector<64x128xi1>, vector<64x128xf32>
    %c2 = arith.constant 2 : index
    %c0_18 = arith.constant 0 : index
    %c0_19 = arith.constant 0 : index
    %32 = vector.load %arg5[%c2, %c0_18, %c0_19] : memref<4x128x128xf32, #tpu.memory_space<vmem>>, vector<1x128x128xf32>
    %33 = vector.shape_cast %32 : vector<1x128x128xf32> to vector<128x128xf32>
    %cst_20 = arith.constant dense<0.000000e+00> : vector<64x128xf32>
    %34 = tpu.matmul %31, %33, %cst_20 {dimension_numbers = #tpu.dot_dimension_numbers<[1], [0], [0], [1], [0, 0, 1, 1], [], []>} : vector<64x128xf32>, vector<128x128xf32>, vector<64x128xf32> -> vector<64x128xf32>
    %c1_21 = arith.constant 1 : index
    %c0_22 = arith.constant 0 : index
    %c0_23 = arith.constant 0 : index
    %35 = vector.load %arg6[%c1_21, %c0_22, %c0_23] : memref<3x1x128xf32, #tpu.memory_space<vmem>>, vector<1x1x128xf32>
    %36 = vector.shape_cast %35 : vector<1x1x128xf32> to vector<1x128xf32>
    %37 = vector.broadcast %36 : vector<1x128xf32> to vector<64x128xf32>
    %38 = arith.addf %34, %37 : vector<64x128xf32>
    %cst_24 = arith.constant 0.000000e+00 : f32
    %39 = vector.broadcast %cst_24 : f32 to vector<64x128xf32>
    %40 = arith.cmpf oge, %38, %39 : vector<64x128xf32>
    %cst_25 = arith.constant 0.00999999977 : f32
    %41 = vector.broadcast %cst_25 : f32 to vector<64x128xf32>
    %42 = arith.mulf %41, %38 : vector<64x128xf32>
    %43 = arith.select %40, %38, %42 : vector<64x128xi1>, vector<64x128xf32>
    %c3 = arith.constant 3 : index
    %c0_26 = arith.constant 0 : index
    %c0_27 = arith.constant 0 : index
    %44 = vector.load %arg5[%c3, %c0_26, %c0_27] : memref<4x128x128xf32, #tpu.memory_space<vmem>>, vector<1x128x128xf32>
    %45 = vector.shape_cast %44 : vector<1x128x128xf32> to vector<128x128xf32>
    %cst_28 = arith.constant dense<0.000000e+00> : vector<64x128xf32>
    %46 = tpu.matmul %43, %45, %cst_28 {dimension_numbers = #tpu.dot_dimension_numbers<[1], [0], [0], [1], [0, 0, 1, 1], [], []>} : vector<64x128xf32>, vector<128x128xf32>, vector<64x128xf32> -> vector<64x128xf32>
    %c2_29 = arith.constant 2 : index
    %c0_30 = arith.constant 0 : index
    %c0_31 = arith.constant 0 : index
    %47 = vector.load %arg6[%c2_29, %c0_30, %c0_31] : memref<3x1x128xf32, #tpu.memory_space<vmem>>, vector<1x1x128xf32>
    %48 = vector.shape_cast %47 : vector<1x1x128xf32> to vector<1x128xf32>
    %49 = vector.broadcast %48 : vector<1x128xf32> to vector<64x128xf32>
    %50 = arith.addf %46, %49 : vector<64x128xf32>
    %51 = vector.extract_strided_slice %50 {offsets = [0, 0], sizes = [32, 128], strides = [1, 1]} : vector<64x128xf32> to vector<32x128xf32>
    %52 = vector.extract_strided_slice %50 {offsets = [32, 0], sizes = [32, 128], strides = [1, 1]} : vector<64x128xf32> to vector<32x128xf32>
    %53 = arith.addf %51, %52 : vector<32x128xf32>
    %cst_32 = arith.constant 5.000000e-01 : f32
    %54 = vector.broadcast %cst_32 : f32 to vector<32x128xf32>
    %55 = arith.mulf %54, %53 : vector<32x128xf32>
    %56 = arith.subf %51, %52 : vector<32x128xf32>
    %c0_i32 = arith.constant 0 : i32
    %57 = arith.cmpi eq, %arg0, %c0_i32 : i32
    %58 = arith.extui %57 : i1 to i32
    %c0_i32_33 = arith.constant 0 : i32
    %59 = arith.cmpi ne, %58, %c0_i32_33 : i32
    scf.if %59 {
      %cst_72 = arith.constant 0.000000e+00 : f32
      %106 = vector.broadcast %cst_72 : f32 to vector<1x1xf32>
      %c0_73 = arith.constant 0 : index
      %c0_74 = arith.constant 0 : index
      %107 = vector.load %arg10[%c0_73, %c0_74] : memref<1x1xf32, #tpu.memory_space<vmem>>, vector<1x1xf32>
      tpu.vector_store %arg10[%c0_73, %c0_74], %106 {strides = array<i32>} : memref<1x1xf32, #tpu.memory_space<vmem>>, vector<1x1xf32>,
    } else {
    }
    %c0_34 = arith.constant 0 : index
    %c0_35 = arith.constant 0 : index
    %60 = vector.load %arg10[%c0_34, %c0_35] : memref<1x1xf32, #tpu.memory_space<vmem>>, vector<1x1xf32>
    %61 = arith.mulf %56, %56 : vector<32x128xf32>
    %62 = vector.shape_cast %61 : vector<32x128xf32> to vector<1x32x128xf32>
    %cst_36 = arith.constant dense<0.000000e+00> : vector<1xf32>
    %63 = vector.multi_reduction <add>, %62, %cst_36 [1, 2] : vector<1x32x128xf32> to vector<1xf32>
    %64 = vector.shape_cast %63 : vector<1xf32> to vector<1x1x1xf32>
    %65 = vector.extract %64[0, 0, 0] : f32 from vector<1x1x1xf32>
    %66 = vector.broadcast %65 : f32 to vector<1x1xf32>
    %67 = arith.addf %60, %66 : vector<1x1xf32>
    %c0_37 = arith.constant 0 : index
    %c0_38 = arith.constant 0 : index
    %68 = vector.load %arg10[%c0_37, %c0_38] : memref<1x1xf32, #tpu.memory_space<vmem>>, vector<1x1xf32>
    tpu.vector_store %arg10[%c0_37, %c0_38], %67 {strides = array<i32>} : memref<1x1xf32, #tpu.memory_space<vmem>>, vector<1x1xf32>,
    %c0_39 = arith.constant 0 : index
    %c0_40 = arith.constant 0 : index
    %69 = vector.load %arg4[%c0_39, %c0_40] : memref<32x128xf32, #tpu.memory_space<vmem>>, vector<32x128xf32>
    %c0_41 = arith.constant 0 : index
    %c0_42 = arith.constant 0 : index
    %c0_43 = arith.constant 0 : index
    %70 = vector.load %arg8[%c0_41, %c0_42, %c0_43] : memref<3x1x128xf32, #tpu.memory_space<vmem>>, vector<1x1x128xf32>
    %71 = vector.shape_cast %70 : vector<1x1x128xf32> to vector<1x128xf32>
    %c0_44 = arith.constant 0 : index
    %c0_45 = arith.constant 0 : index
    %c0_46 = arith.constant 0 : index
    %72 = vector.load %arg7[%c0_44, %c0_45, %c0_46] : memref<4x128x128xf32, #tpu.memory_space<vmem>>, vector<1x128x128xf32>
    %73 = vector.shape_cast %72 : vector<1x128x128xf32> to vector<128x128xf32>
    %cst_47 = arith.constant dense<0.000000e+00> : vector<32x128xf32>
    %74 = tpu.matmul %55, %73, %cst_47 {dimension_numbers = #tpu.dot_dimension_numbers<[1], [0], [0], [1], [0, 0, 1, 1], [], []>} : vector<32x128xf32>, vector<128x128xf32>, vector<32x128xf32> -> vector<32x128xf32>
    %75 = vector.broadcast %71 : vector<1x128xf32> to vector<32x128xf32>
    %76 = arith.addf %75, %74 : vector<32x128xf32>
    %c1_48 = arith.constant 1 : index
    %c0_49 = arith.constant 0 : index
    %c0_50 = arith.constant 0 : index
    %77 = vector.load %arg7[%c1_48, %c0_49, %c0_50] : memref<4x128x128xf32, #tpu.memory_space<vmem>>, vector<1x128x128xf32>
    %78 = vector.shape_cast %77 : vector<1x128x128xf32> to vector<128x128xf32>
    %cst_51 = arith.constant dense<0.000000e+00> : vector<32x128xf32>
    %79 = tpu.matmul %69, %78, %cst_51 {dimension_numbers = #tpu.dot_dimension_numbers<[1], [0], [0], [1], [0, 0, 1, 1], [], []>} : vector<32x128xf32>, vector<128x128xf32>, vector<32x128xf32> -> vector<32x128xf32>
    %80 = arith.addf %76, %79 : vector<32x128xf32>
    %cst_52 = arith.constant 0.000000e+00 : f32
    %81 = vector.broadcast %cst_52 : f32 to vector<32x128xf32>
    %82 = arith.cmpf oge, %80, %81 : vector<32x128xf32>
    %cst_53 = arith.constant 0.00999999977 : f32
    %83 = vector.broadcast %cst_53 : f32 to vector<32x128xf32>
    %84 = arith.mulf %83, %80 : vector<32x128xf32>
    %85 = arith.select %82, %80, %84 : vector<32x128xi1>, vector<32x128xf32>
    %c2_54 = arith.constant 2 : index
    %c0_55 = arith.constant 0 : index
    %c0_56 = arith.constant 0 : index
    %86 = vector.load %arg7[%c2_54, %c0_55, %c0_56] : memref<4x128x128xf32, #tpu.memory_space<vmem>>, vector<1x128x128xf32>
    %87 = vector.shape_cast %86 : vector<1x128x128xf32> to vector<128x128xf32>
    %cst_57 = arith.constant dense<0.000000e+00> : vector<32x128xf32>
    %88 = tpu.matmul %85, %87, %cst_57 {dimension_numbers = #tpu.dot_dimension_numbers<[1], [0], [0], [1], [0, 0, 1, 1], [], []>} : vector<32x128xf32>, vector<128x128xf32>, vector<32x128xf32> -> vector<32x128xf32>
    %c1_58 = arith.constant 1 : index
    %c0_59 = arith.constant 0 : index
    %c0_60 = arith.constant 0 : index
    %89 = vector.load %arg8[%c1_58, %c0_59, %c0_60] : memref<3x1x128xf32, #tpu.memory_space<vmem>>, vector<1x1x128xf32>
    %90 = vector.shape_cast %89 : vector<1x1x128xf32> to vector<1x128xf32>
    %91 = vector.broadcast %90 : vector<1x128xf32> to vector<32x128xf32>
    %92 = arith.addf %88, %91 : vector<32x128xf32>
    %cst_61 = arith.constant 0.000000e+00 : f32
    %93 = vector.broadcast %cst_61 : f32 to vector<32x128xf32>
    %94 = arith.cmpf oge, %92, %93 : vector<32x128xf32>
    %cst_62 = arith.constant 0.00999999977 : f32
    %95 = vector.broadcast %cst_62 : f32 to vector<32x128xf32>
    %96 = arith.mulf %95, %92 : vector<32x128xf32>
    %97 = arith.select %94, %92, %96 : vector<32x128xi1>, vector<32x128xf32>
    %c3_63 = arith.constant 3 : index
    %c0_64 = arith.constant 0 : index
    %c0_65 = arith.constant 0 : index
    %98 = vector.load %arg7[%c3_63, %c0_64, %c0_65] : memref<4x128x128xf32, #tpu.memory_space<vmem>>, vector<1x128x128xf32>
    %99 = vector.shape_cast %98 : vector<1x128x128xf32> to vector<128x128xf32>
    %cst_66 = arith.constant dense<0.000000e+00> : vector<32x128xf32>
    %100 = tpu.matmul %97, %99, %cst_66 {dimension_numbers = #tpu.dot_dimension_numbers<[1], [0], [0], [1], [0, 0, 1, 1], [], []>} : vector<32x128xf32>, vector<128x128xf32>, vector<32x128xf32> -> vector<32x128xf32>
    %c2_67 = arith.constant 2 : index
    %c0_68 = arith.constant 0 : index
    %c0_69 = arith.constant 0 : index
    %101 = vector.load %arg8[%c2_67, %c0_68, %c0_69] : memref<3x1x128xf32, #tpu.memory_space<vmem>>, vector<1x1x128xf32>
    %102 = vector.shape_cast %101 : vector<1x1x128xf32> to vector<1x128xf32>
    %103 = vector.broadcast %102 : vector<1x128xf32> to vector<32x128xf32>
    %104 = arith.addf %100, %103 : vector<32x128xf32>
    %c0_70 = arith.constant 0 : index
    %c0_71 = arith.constant 0 : index
    %105 = vector.load %arg9[%c0_70, %c0_71] : memref<32x128xf32, #tpu.memory_space<vmem>>, vector<32x128xf32>
    tpu.vector_store %arg9[%c0_70, %c0_71], %104 {strides = array<i32>} : memref<32x128xf32, #tpu.memory_space<vmem>>, vector<32x128xf32>,
    return
  }
  func.func @transform_0(%arg0: i32) -> (i32, i32) {
    %c0_i32 = arith.constant 0 : i32
    %c0_i32_0 = arith.constant 0 : i32
    return %arg0, %c0_i32 : i32, i32
  }
  func.func @transform_1(%arg0: i32) -> (i32, i32) {
    %c0_i32 = arith.constant 0 : i32
    %c0_i32_0 = arith.constant 0 : i32
    return %arg0, %c0_i32 : i32, i32
  }
  func.func @transform_2(%arg0: i32) -> (i32, i32) {
    %c0_i32 = arith.constant 0 : i32
    %c0_i32_0 = arith.constant 0 : i32
    %c0_i32_1 = arith.constant 0 : i32
    return %c0_i32, %c0_i32_0 : i32, i32
  }
  func.func @transform_3(%arg0: i32) -> (i32, i32) {
    %c0_i32 = arith.constant 0 : i32
    %c0_i32_0 = arith.constant 0 : i32
    return %arg0, %c0_i32 : i32, i32
  }
  func.func @transform_4(%arg0: i32) -> (i32, i32, i32) {
    %c0_i32 = arith.constant 0 : i32
    %c0_i32_0 = arith.constant 0 : i32
    %c0_i32_1 = arith.constant 0 : i32
    %c0_i32_2 = arith.constant 0 : i32
    return %c0_i32, %c0_i32_0, %c0_i32_1 : i32, i32, i32
  }
  func.func @transform_5(%arg0: i32) -> (i32, i32, i32) {
    %c0_i32 = arith.constant 0 : i32
    %c0_i32_0 = arith.constant 0 : i32
    %c0_i32_1 = arith.constant 0 : i32
    %c0_i32_2 = arith.constant 0 : i32
    return %c0_i32, %c0_i32_0, %c0_i32_1 : i32, i32, i32
  }
  func.func @transform_6(%arg0: i32) -> (i32, i32, i32) {
    %c0_i32 = arith.constant 0 : i32
    %c0_i32_0 = arith.constant 0 : i32
    %c0_i32_1 = arith.constant 0 : i32
    %c0_i32_2 = arith.constant 0 : i32
    return %c0_i32, %c0_i32_0, %c0_i32_1 : i32, i32, i32
  }
  func.func @transform_7(%arg0: i32) -> (i32, i32, i32) {
    %c0_i32 = arith.constant 0 : i32
    %c0_i32_0 = arith.constant 0 : i32
    %c0_i32_1 = arith.constant 0 : i32
    %c0_i32_2 = arith.constant 0 : i32
    return %c0_i32, %c0_i32_0, %c0_i32_1 : i32, i32, i32
  }
  func.func @transform_8(%arg0: i32) -> (i32, i32) {
    %c0_i32 = arith.constant 0 : i32
    %c0_i32_0 = arith.constant 0 : i32
    return %arg0, %c0_i32 : i32, i32
  }
  func.func @transform_9(%arg0: i32) -> (i32, i32) {
    %c0_i32 = arith.constant 0 : i32
    %c0_i32_0 = arith.constant 0 : i32
    %c0_i32_1 = arith.constant 0 : i32
    return %c0_i32, %c0_i32_0 : i32, i32
  }
}

module attributes {stable_mosaic.version = 11 : i64} {
  func.func @_node_conv_kernel(%arg0: i32, %arg1: memref<32x1xi32, #tpu.memory_space<vmem>>, %arg2: memref<32x1xi32, #tpu.memory_space<vmem>>, %arg3: memref<1x32xi32, #tpu.memory_space<vmem>>, %arg4: memref<16x128xf32, #tpu.memory_space<vmem>>, %arg5: memref<4x128x128xf32, #tpu.memory_space<vmem>>, %arg6: memref<3x1x128xf32, #tpu.memory_space<vmem>>, %arg7: memref<16x128xf32, #tpu.memory_space<vmem>>) attributes {dimension_semantics = [#tpu.dimension_semantics<parallel>], iteration_bounds = array<i64: 1>, scalar_prefetch = 0 : i64, scratch_operands = 0 : i64, tpu.core_type = #tpu.core_type<tc>, window_params = [{pipeline_mode = #tpu.pipeline_mode<synchronous>, transform_indices = @transform_0, window_bounds = array<i64: 32, 1>}, {pipeline_mode = #tpu.pipeline_mode<synchronous>, transform_indices = @transform_1, window_bounds = array<i64: 32, 1>}, {pipeline_mode = #tpu.pipeline_mode<synchronous>, transform_indices = @transform_2, window_bounds = array<i64: 1, 32>}, {pipeline_mode = #tpu.pipeline_mode<synchronous>, transform_indices = @transform_3, window_bounds = array<i64: 16, 128>}, {pipeline_mode = #tpu.pipeline_mode<synchronous>, transform_indices = @transform_4, window_bounds = array<i64: 4, 128, 128>}, {pipeline_mode = #tpu.pipeline_mode<synchronous>, transform_indices = @transform_5, window_bounds = array<i64: 3, 1, 128>}, {pipeline_mode = #tpu.pipeline_mode<synchronous>, transform_indices = @transform_6, window_bounds = array<i64: 16, 128>}]} {
    %c0 = arith.constant 0 : index
    %c0_0 = arith.constant 0 : index
    %0 = vector.load %arg4[%c0, %c0_0] : memref<16x128xf32, #tpu.memory_space<vmem>>, vector<16x128xf32>
    %1 = tpu.iota {dimensions = array<i32: 1>} : vector<32x16xi32>
    %c0_1 = arith.constant 0 : index
    %c0_2 = arith.constant 0 : index
    %2 = vector.load %arg2[%c0_1, %c0_2] : memref<32x1xi32, #tpu.memory_space<vmem>>, vector<32x1xi32>
    %3 = vector.broadcast %2 : vector<32x1xi32> to vector<32x16xi32>
    %4 = arith.cmpi eq, %1, %3 : vector<32x16xi32>
    %5 = arith.extui %4 : vector<32x16xi1> to vector<32x16xi32>
    %6 = arith.sitofp %5 : vector<32x16xi32> to vector<32x16xf32>
    %c0_3 = arith.constant 0 : index
    %c0_4 = arith.constant 0 : index
    %7 = vector.load %arg1[%c0_3, %c0_4] : memref<32x1xi32, #tpu.memory_space<vmem>>, vector<32x1xi32>
    %8 = vector.broadcast %7 : vector<32x1xi32> to vector<32x16xi32>
    %9 = arith.cmpi eq, %1, %8 : vector<32x16xi32>
    %10 = arith.extui %9 : vector<32x16xi1> to vector<32x16xi32>
    %11 = arith.sitofp %10 : vector<32x16xi32> to vector<32x16xf32>
    %cst = arith.constant dense<0.000000e+00> : vector<32x128xf32>
    %12 = tpu.matmul %6, %0, %cst {dimension_numbers = #tpu.dot_dimension_numbers<[1], [0], [0], [1], [0, 0, 1, 1], [], []>} : vector<32x16xf32>, vector<16x128xf32>, vector<32x128xf32> -> vector<32x128xf32>
    %cst_5 = arith.constant dense<0.000000e+00> : vector<32x128xf32>
    %13 = tpu.matmul %11, %0, %cst_5 {dimension_numbers = #tpu.dot_dimension_numbers<[1], [0], [0], [1], [0, 0, 1, 1], [], []>} : vector<32x16xf32>, vector<16x128xf32>, vector<32x128xf32> -> vector<32x128xf32>
    %c0_6 = arith.constant 0 : index
    %c0_7 = arith.constant 0 : index
    %c0_8 = arith.constant 0 : index
    %14 = vector.load %arg6[%c0_6, %c0_7, %c0_8] : memref<3x1x128xf32, #tpu.memory_space<vmem>>, vector<1x1x128xf32>
    %15 = vector.shape_cast %14 : vector<1x1x128xf32> to vector<1x128xf32>
    %c0_9 = arith.constant 0 : index
    %c0_10 = arith.constant 0 : index
    %c0_11 = arith.constant 0 : index
    %16 = vector.load %arg5[%c0_9, %c0_10, %c0_11] : memref<4x128x128xf32, #tpu.memory_space<vmem>>, vector<1x128x128xf32>
    %17 = vector.shape_cast %16 : vector<1x128x128xf32> to vector<128x128xf32>
    %cst_12 = arith.constant dense<0.000000e+00> : vector<32x128xf32>
    %18 = tpu.matmul %12, %17, %cst_12 {dimension_numbers = #tpu.dot_dimension_numbers<[1], [0], [0], [1], [0, 0, 1, 1], [], []>} : vector<32x128xf32>, vector<128x128xf32>, vector<32x128xf32> -> vector<32x128xf32>
    %19 = vector.broadcast %15 : vector<1x128xf32> to vector<32x128xf32>
    %20 = arith.addf %19, %18 : vector<32x128xf32>
    %c1 = arith.constant 1 : index
    %c0_13 = arith.constant 0 : index
    %c0_14 = arith.constant 0 : index
    %21 = vector.load %arg5[%c1, %c0_13, %c0_14] : memref<4x128x128xf32, #tpu.memory_space<vmem>>, vector<1x128x128xf32>
    %22 = vector.shape_cast %21 : vector<1x128x128xf32> to vector<128x128xf32>
    %cst_15 = arith.constant dense<0.000000e+00> : vector<32x128xf32>
    %23 = tpu.matmul %13, %22, %cst_15 {dimension_numbers = #tpu.dot_dimension_numbers<[1], [0], [0], [1], [0, 0, 1, 1], [], []>} : vector<32x128xf32>, vector<128x128xf32>, vector<32x128xf32> -> vector<32x128xf32>
    %24 = arith.addf %20, %23 : vector<32x128xf32>
    %cst_16 = arith.constant 0.000000e+00 : f32
    %25 = vector.broadcast %cst_16 : f32 to vector<32x128xf32>
    %26 = arith.cmpf oge, %24, %25 : vector<32x128xf32>
    %cst_17 = arith.constant 0.00999999977 : f32
    %27 = vector.broadcast %cst_17 : f32 to vector<32x128xf32>
    %28 = arith.mulf %27, %24 : vector<32x128xf32>
    %29 = arith.select %26, %24, %28 : vector<32x128xi1>, vector<32x128xf32>
    %c2 = arith.constant 2 : index
    %c0_18 = arith.constant 0 : index
    %c0_19 = arith.constant 0 : index
    %30 = vector.load %arg5[%c2, %c0_18, %c0_19] : memref<4x128x128xf32, #tpu.memory_space<vmem>>, vector<1x128x128xf32>
    %31 = vector.shape_cast %30 : vector<1x128x128xf32> to vector<128x128xf32>
    %cst_20 = arith.constant dense<0.000000e+00> : vector<32x128xf32>
    %32 = tpu.matmul %29, %31, %cst_20 {dimension_numbers = #tpu.dot_dimension_numbers<[1], [0], [0], [1], [0, 0, 1, 1], [], []>} : vector<32x128xf32>, vector<128x128xf32>, vector<32x128xf32> -> vector<32x128xf32>
    %c1_21 = arith.constant 1 : index
    %c0_22 = arith.constant 0 : index
    %c0_23 = arith.constant 0 : index
    %33 = vector.load %arg6[%c1_21, %c0_22, %c0_23] : memref<3x1x128xf32, #tpu.memory_space<vmem>>, vector<1x1x128xf32>
    %34 = vector.shape_cast %33 : vector<1x1x128xf32> to vector<1x128xf32>
    %35 = vector.broadcast %34 : vector<1x128xf32> to vector<32x128xf32>
    %36 = arith.addf %32, %35 : vector<32x128xf32>
    %cst_24 = arith.constant 0.000000e+00 : f32
    %37 = vector.broadcast %cst_24 : f32 to vector<32x128xf32>
    %38 = arith.cmpf oge, %36, %37 : vector<32x128xf32>
    %cst_25 = arith.constant 0.00999999977 : f32
    %39 = vector.broadcast %cst_25 : f32 to vector<32x128xf32>
    %40 = arith.mulf %39, %36 : vector<32x128xf32>
    %41 = arith.select %38, %36, %40 : vector<32x128xi1>, vector<32x128xf32>
    %c3 = arith.constant 3 : index
    %c0_26 = arith.constant 0 : index
    %c0_27 = arith.constant 0 : index
    %42 = vector.load %arg5[%c3, %c0_26, %c0_27] : memref<4x128x128xf32, #tpu.memory_space<vmem>>, vector<1x128x128xf32>
    %43 = vector.shape_cast %42 : vector<1x128x128xf32> to vector<128x128xf32>
    %cst_28 = arith.constant dense<0.000000e+00> : vector<32x128xf32>
    %44 = tpu.matmul %41, %43, %cst_28 {dimension_numbers = #tpu.dot_dimension_numbers<[1], [0], [0], [1], [0, 0, 1, 1], [], []>} : vector<32x128xf32>, vector<128x128xf32>, vector<32x128xf32> -> vector<32x128xf32>
    %c2_29 = arith.constant 2 : index
    %c0_30 = arith.constant 0 : index
    %c0_31 = arith.constant 0 : index
    %45 = vector.load %arg6[%c2_29, %c0_30, %c0_31] : memref<3x1x128xf32, #tpu.memory_space<vmem>>, vector<1x1x128xf32>
    %46 = vector.shape_cast %45 : vector<1x1x128xf32> to vector<1x128xf32>
    %47 = vector.broadcast %46 : vector<1x128xf32> to vector<32x128xf32>
    %48 = arith.addf %44, %47 : vector<32x128xf32>
    %49 = tpu.iota {dimensions = array<i32: 0>} : vector<16x32xi32>
    %c0_32 = arith.constant 0 : index
    %c0_33 = arith.constant 0 : index
    %50 = vector.load %arg3[%c0_32, %c0_33] : memref<1x32xi32, #tpu.memory_space<vmem>>, vector<1x32xi32>
    %51 = vector.broadcast %50 : vector<1x32xi32> to vector<16x32xi32>
    %52 = arith.cmpi eq, %49, %51 : vector<16x32xi32>
    %53 = arith.extui %52 : vector<16x32xi1> to vector<16x32xi32>
    %54 = arith.sitofp %53 : vector<16x32xi32> to vector<16x32xf32>
    %cst_34 = arith.constant dense<0.000000e+00> : vector<16x128xf32>
    %55 = tpu.matmul %54, %48, %cst_34 {dimension_numbers = #tpu.dot_dimension_numbers<[1], [0], [0], [1], [0, 0, 1, 1], [], []>} : vector<16x32xf32>, vector<32x128xf32>, vector<16x128xf32> -> vector<16x128xf32>
    %cst_35 = arith.constant dense<0.000000e+00> : vector<16xf32>
    %56 = vector.multi_reduction <add>, %54, %cst_35 [1] : vector<16x32xf32> to vector<16xf32>
    %57 = vector.shape_cast %56 : vector<16xf32> to vector<16x1xf32>
    %cst_36 = arith.constant 1.000000e+00 : f32
    %58 = vector.broadcast %cst_36 : f32 to vector<16x1xf32>
    %59 = arith.maximumf %57, %58 : vector<16x1xf32>
    %60 = vector.broadcast %59 : vector<16x1xf32> to vector<16x128xf32>
    %61 = arith.divf %55, %60 : vector<16x128xf32>
    %c0_37 = arith.constant 0 : index
    %c0_38 = arith.constant 0 : index
    %62 = vector.load %arg7[%c0_37, %c0_38] : memref<16x128xf32, #tpu.memory_space<vmem>>, vector<16x128xf32>
    tpu.vector_store %arg7[%c0_37, %c0_38], %61 {strides = array<i32>} : memref<16x128xf32, #tpu.memory_space<vmem>>, vector<16x128xf32>,
    return
  }
  func.func @transform_0(%arg0: i32) -> (i32, i32) {
    %c0_i32 = arith.constant 0 : i32
    %c0_i32_0 = arith.constant 0 : i32
    %c0_i32_1 = arith.constant 0 : i32
    return %c0_i32, %c0_i32_0 : i32, i32
  }
  func.func @transform_1(%arg0: i32) -> (i32, i32) {
    %c0_i32 = arith.constant 0 : i32
    %c0_i32_0 = arith.constant 0 : i32
    %c0_i32_1 = arith.constant 0 : i32
    return %c0_i32, %c0_i32_0 : i32, i32
  }
  func.func @transform_2(%arg0: i32) -> (i32, i32) {
    %c0_i32 = arith.constant 0 : i32
    %c0_i32_0 = arith.constant 0 : i32
    %c0_i32_1 = arith.constant 0 : i32
    return %c0_i32, %c0_i32_0 : i32, i32
  }
  func.func @transform_3(%arg0: i32) -> (i32, i32) {
    %c0_i32 = arith.constant 0 : i32
    %c0_i32_0 = arith.constant 0 : i32
    %c0_i32_1 = arith.constant 0 : i32
    return %c0_i32, %c0_i32_0 : i32, i32
  }
  func.func @transform_4(%arg0: i32) -> (i32, i32, i32) {
    %c0_i32 = arith.constant 0 : i32
    %c0_i32_0 = arith.constant 0 : i32
    %c0_i32_1 = arith.constant 0 : i32
    %c0_i32_2 = arith.constant 0 : i32
    return %c0_i32, %c0_i32_0, %c0_i32_1 : i32, i32, i32
  }
  func.func @transform_5(%arg0: i32) -> (i32, i32, i32) {
    %c0_i32 = arith.constant 0 : i32
    %c0_i32_0 = arith.constant 0 : i32
    %c0_i32_1 = arith.constant 0 : i32
    %c0_i32_2 = arith.constant 0 : i32
    return %c0_i32, %c0_i32_0, %c0_i32_1 : i32, i32, i32
  }
  func.func @transform_6(%arg0: i32) -> (i32, i32) {
    %c0_i32 = arith.constant 0 : i32
    %c0_i32_0 = arith.constant 0 : i32
    %c0_i32_1 = arith.constant 0 : i32
    return %c0_i32, %c0_i32_0 : i32, i32
  }
}

module attributes {stable_mosaic.version = 11 : i64} {
  func.func @_edge_conv_kernel(%arg0: i32, %arg1: memref<32x1xi32, #tpu.memory_space<vmem>>, %arg2: memref<32x1xi32, #tpu.memory_space<vmem>>, %arg3: memref<16x128xf32, #tpu.memory_space<vmem>>, %arg4: memref<32x128xf32, #tpu.memory_space<vmem>>, %arg5: memref<4x128x128xf32, #tpu.memory_space<vmem>>, %arg6: memref<3x1x128xf32, #tpu.memory_space<vmem>>, %arg7: memref<4x128x128xf32, #tpu.memory_space<vmem>>, %arg8: memref<3x1x128xf32, #tpu.memory_space<vmem>>, %arg9: memref<32x128xf32, #tpu.memory_space<vmem>>, %arg10: memref<1x1xf32, #tpu.memory_space<vmem>>) attributes {dimension_semantics = [#tpu.dimension_semantics<arbitrary>], iteration_bounds = array<i64: 1>, scalar_prefetch = 0 : i64, scratch_operands = 0 : i64, tpu.core_type = #tpu.core_type<tc>, window_params = [{transform_indices = @transform_0, window_bounds = array<i64: 32, 1>}, {transform_indices = @transform_1, window_bounds = array<i64: 32, 1>}, {pipeline_mode = #tpu.pipeline_mode<synchronous>, transform_indices = @transform_2, window_bounds = array<i64: 16, 128>}, {transform_indices = @transform_3, window_bounds = array<i64: 32, 128>}, {pipeline_mode = #tpu.pipeline_mode<synchronous>, transform_indices = @transform_4, window_bounds = array<i64: 4, 128, 128>}, {pipeline_mode = #tpu.pipeline_mode<synchronous>, transform_indices = @transform_5, window_bounds = array<i64: 3, 1, 128>}, {pipeline_mode = #tpu.pipeline_mode<synchronous>, transform_indices = @transform_6, window_bounds = array<i64: 4, 128, 128>}, {pipeline_mode = #tpu.pipeline_mode<synchronous>, transform_indices = @transform_7, window_bounds = array<i64: 3, 1, 128>}, {transform_indices = @transform_8, window_bounds = array<i64: 32, 128>}, {pipeline_mode = #tpu.pipeline_mode<synchronous>, transform_indices = @transform_9, window_bounds = array<i64: 1, 1>}]} {
    %c0 = arith.constant 0 : index
    %c0_0 = arith.constant 0 : index
    %0 = vector.load %arg3[%c0, %c0_0] : memref<16x128xf32, #tpu.memory_space<vmem>>, vector<16x128xf32>
    %1 = tpu.iota {dimensions = array<i32: 1>} : vector<32x16xi32>
    %c0_1 = arith.constant 0 : index
    %c0_2 = arith.constant 0 : index
    %2 = vector.load %arg1[%c0_1, %c0_2] : memref<32x1xi32, #tpu.memory_space<vmem>>, vector<32x1xi32>
    %3 = vector.broadcast %2 : vector<32x1xi32> to vector<32x16xi32>
    %4 = arith.cmpi eq, %1, %3 : vector<32x16xi32>
    %5 = arith.extui %4 : vector<32x16xi1> to vector<32x16xi32>
    %6 = arith.sitofp %5 : vector<32x16xi32> to vector<32x16xf32>
    %c0_3 = arith.constant 0 : index
    %c0_4 = arith.constant 0 : index
    %7 = vector.load %arg2[%c0_3, %c0_4] : memref<32x1xi32, #tpu.memory_space<vmem>>, vector<32x1xi32>
    %8 = vector.broadcast %7 : vector<32x1xi32> to vector<32x16xi32>
    %9 = arith.cmpi eq, %1, %8 : vector<32x16xi32>
    %10 = arith.extui %9 : vector<32x16xi1> to vector<32x16xi32>
    %11 = arith.sitofp %10 : vector<32x16xi32> to vector<32x16xf32>
    %cst = arith.constant dense<0.000000e+00> : vector<32x128xf32>
    %12 = tpu.matmul %6, %0, %cst {dimension_numbers = #tpu.dot_dimension_numbers<[1], [0], [0], [1], [0, 0, 1, 1], [], []>} : vector<32x16xf32>, vector<16x128xf32>, vector<32x128xf32> -> vector<32x128xf32>
    %cst_5 = arith.constant dense<0.000000e+00> : vector<32x128xf32>
    %13 = tpu.matmul %11, %0, %cst_5 {dimension_numbers = #tpu.dot_dimension_numbers<[1], [0], [0], [1], [0, 0, 1, 1], [], []>} : vector<32x16xf32>, vector<16x128xf32>, vector<32x128xf32> -> vector<32x128xf32>
    %14 = tpu.concatenate %12, %13 in 0 : vector<32x128xf32>, vector<32x128xf32> -> vector<64x128xf32>
    %15 = tpu.concatenate %13, %12 in 0 : vector<32x128xf32>, vector<32x128xf32> -> vector<64x128xf32>
    %c0_6 = arith.constant 0 : index
    %c0_7 = arith.constant 0 : index
    %c0_8 = arith.constant 0 : index
    %16 = vector.load %arg6[%c0_6, %c0_7, %c0_8] : memref<3x1x128xf32, #tpu.memory_space<vmem>>, vector<1x1x128xf32>
    %17 = vector.shape_cast %16 : vector<1x1x128xf32> to vector<1x128xf32>
    %c0_9 = arith.constant 0 : index
    %c0_10 = arith.constant 0 : index
    %c0_11 = arith.constant 0 : index
    %18 = vector.load %arg5[%c0_9, %c0_10, %c0_11] : memref<4x128x128xf32, #tpu.memory_space<vmem>>, vector<1x128x128xf32>
    %19 = vector.shape_cast %18 : vector<1x128x128xf32> to vector<128x128xf32>
    %cst_12 = arith.constant dense<0.000000e+00> : vector<64x128xf32>
    %20 = tpu.matmul %14, %19, %cst_12 {dimension_numbers = #tpu.dot_dimension_numbers<[1], [0], [0], [1], [0, 0, 1, 1], [], []>} : vector<64x128xf32>, vector<128x128xf32>, vector<64x128xf32> -> vector<64x128xf32>
    %21 = vector.broadcast %17 : vector<1x128xf32> to vector<64x128xf32>
    %22 = arith.addf %21, %20 : vector<64x128xf32>
    %c1 = arith.constant 1 : index
    %c0_13 = arith.constant 0 : index
    %c0_14 = arith.constant 0 : index
    %23 = vector.load %arg5[%c1, %c0_13, %c0_14] : memref<4x128x128xf32, #tpu.memory_space<vmem>>, vector<1x128x128xf32>
    %24 = vector.shape_cast %23 : vector<1x128x128xf32> to vector<128x128xf32>
    %cst_15 = arith.constant dense<0.000000e+00> : vector<64x128xf32>
    %25 = tpu.matmul %15, %24, %cst_15 {dimension_numbers = #tpu.dot_dimension_numbers<[1], [0], [0], [1], [0, 0, 1, 1], [], []>} : vector<64x128xf32>, vector<128x128xf32>, vector<64x128xf32> -> vector<64x128xf32>
    %26 = arith.addf %22, %25 : vector<64x128xf32>
    %cst_16 = arith.constant 0.000000e+00 : f32
    %27 = vector.broadcast %cst_16 : f32 to vector<64x128xf32>
    %28 = arith.cmpf oge, %26, %27 : vector<64x128xf32>
    %cst_17 = arith.constant 0.00999999977 : f32
    %29 = vector.broadcast %cst_17 : f32 to vector<64x128xf32>
    %30 = arith.mulf %29, %26 : vector<64x128xf32>
    %31 = arith.select %28, %26, %30 : vector<64x128xi1>, vector<64x128xf32>
    %c2 = arith.constant 2 : index
    %c0_18 = arith.constant 0 : index
    %c0_19 = arith.constant 0 : index
    %32 = vector.load %arg5[%c2, %c0_18, %c0_19] : memref<4x128x128xf32, #tpu.memory_space<vmem>>, vector<1x128x128xf32>
    %33 = vector.shape_cast %32 : vector<1x128x128xf32> to vector<128x128xf32>
    %cst_20 = arith.constant dense<0.000000e+00> : vector<64x128xf32>
    %34 = tpu.matmul %31, %33, %cst_20 {dimension_numbers = #tpu.dot_dimension_numbers<[1], [0], [0], [1], [0, 0, 1, 1], [], []>} : vector<64x128xf32>, vector<128x128xf32>, vector<64x128xf32> -> vector<64x128xf32>
    %c1_21 = arith.constant 1 : index
    %c0_22 = arith.constant 0 : index
    %c0_23 = arith.constant 0 : index
    %35 = vector.load %arg6[%c1_21, %c0_22, %c0_23] : memref<3x1x128xf32, #tpu.memory_space<vmem>>, vector<1x1x128xf32>
    %36 = vector.shape_cast %35 : vector<1x1x128xf32> to vector<1x128xf32>
    %37 = vector.broadcast %36 : vector<1x128xf32> to vector<64x128xf32>
    %38 = arith.addf %34, %37 : vector<64x128xf32>
    %cst_24 = arith.constant 0.000000e+00 : f32
    %39 = vector.broadcast %cst_24 : f32 to vector<64x128xf32>
    %40 = arith.cmpf oge, %38, %39 : vector<64x128xf32>
    %cst_25 = arith.constant 0.00999999977 : f32
    %41 = vector.broadcast %cst_25 : f32 to vector<64x128xf32>
    %42 = arith.mulf %41, %38 : vector<64x128xf32>
    %43 = arith.select %40, %38, %42 : vector<64x128xi1>, vector<64x128xf32>
    %c3 = arith.constant 3 : index
    %c0_26 = arith.constant 0 : index
    %c0_27 = arith.constant 0 : index
    %44 = vector.load %arg5[%c3, %c0_26, %c0_27] : memref<4x128x128xf32, #tpu.memory_space<vmem>>, vector<1x128x128xf32>
    %45 = vector.shape_cast %44 : vector<1x128x128xf32> to vector<128x128xf32>
    %cst_28 = arith.constant dense<0.000000e+00> : vector<64x128xf32>
    %46 = tpu.matmul %43, %45, %cst_28 {dimension_numbers = #tpu.dot_dimension_numbers<[1], [0], [0], [1], [0, 0, 1, 1], [], []>} : vector<64x128xf32>, vector<128x128xf32>, vector<64x128xf32> -> vector<64x128xf32>
    %c2_29 = arith.constant 2 : index
    %c0_30 = arith.constant 0 : index
    %c0_31 = arith.constant 0 : index
    %47 = vector.load %arg6[%c2_29, %c0_30, %c0_31] : memref<3x1x128xf32, #tpu.memory_space<vmem>>, vector<1x1x128xf32>
    %48 = vector.shape_cast %47 : vector<1x1x128xf32> to vector<1x128xf32>
    %49 = vector.broadcast %48 : vector<1x128xf32> to vector<64x128xf32>
    %50 = arith.addf %46, %49 : vector<64x128xf32>
    %51 = vector.extract_strided_slice %50 {offsets = [0, 0], sizes = [32, 128], strides = [1, 1]} : vector<64x128xf32> to vector<32x128xf32>
    %52 = vector.extract_strided_slice %50 {offsets = [32, 0], sizes = [32, 128], strides = [1, 1]} : vector<64x128xf32> to vector<32x128xf32>
    %53 = arith.addf %51, %52 : vector<32x128xf32>
    %cst_32 = arith.constant 5.000000e-01 : f32
    %54 = vector.broadcast %cst_32 : f32 to vector<32x128xf32>
    %55 = arith.mulf %54, %53 : vector<32x128xf32>
    %56 = arith.subf %51, %52 : vector<32x128xf32>
    %c0_i32 = arith.constant 0 : i32
    %57 = arith.cmpi eq, %arg0, %c0_i32 : i32
    %58 = arith.extui %57 : i1 to i32
    %c0_i32_33 = arith.constant 0 : i32
    %59 = arith.cmpi ne, %58, %c0_i32_33 : i32
    scf.if %59 {
      %cst_72 = arith.constant 0.000000e+00 : f32
      %106 = vector.broadcast %cst_72 : f32 to vector<1x1xf32>
      %c0_73 = arith.constant 0 : index
      %c0_74 = arith.constant 0 : index
      %107 = vector.load %arg10[%c0_73, %c0_74] : memref<1x1xf32, #tpu.memory_space<vmem>>, vector<1x1xf32>
      tpu.vector_store %arg10[%c0_73, %c0_74], %106 {strides = array<i32>} : memref<1x1xf32, #tpu.memory_space<vmem>>, vector<1x1xf32>,
    } else {
    }
    %c0_34 = arith.constant 0 : index
    %c0_35 = arith.constant 0 : index
    %60 = vector.load %arg10[%c0_34, %c0_35] : memref<1x1xf32, #tpu.memory_space<vmem>>, vector<1x1xf32>
    %61 = arith.mulf %56, %56 : vector<32x128xf32>
    %62 = vector.shape_cast %61 : vector<32x128xf32> to vector<1x32x128xf32>
    %cst_36 = arith.constant dense<0.000000e+00> : vector<1xf32>
    %63 = vector.multi_reduction <add>, %62, %cst_36 [1, 2] : vector<1x32x128xf32> to vector<1xf32>
    %64 = vector.shape_cast %63 : vector<1xf32> to vector<1x1x1xf32>
    %65 = vector.extract %64[0, 0, 0] : f32 from vector<1x1x1xf32>
    %66 = vector.broadcast %65 : f32 to vector<1x1xf32>
    %67 = arith.addf %60, %66 : vector<1x1xf32>
    %c0_37 = arith.constant 0 : index
    %c0_38 = arith.constant 0 : index
    %68 = vector.load %arg10[%c0_37, %c0_38] : memref<1x1xf32, #tpu.memory_space<vmem>>, vector<1x1xf32>
    tpu.vector_store %arg10[%c0_37, %c0_38], %67 {strides = array<i32>} : memref<1x1xf32, #tpu.memory_space<vmem>>, vector<1x1xf32>,
    %c0_39 = arith.constant 0 : index
    %c0_40 = arith.constant 0 : index
    %69 = vector.load %arg4[%c0_39, %c0_40] : memref<32x128xf32, #tpu.memory_space<vmem>>, vector<32x128xf32>
    %c0_41 = arith.constant 0 : index
    %c0_42 = arith.constant 0 : index
    %c0_43 = arith.constant 0 : index
    %70 = vector.load %arg8[%c0_41, %c0_42, %c0_43] : memref<3x1x128xf32, #tpu.memory_space<vmem>>, vector<1x1x128xf32>
    %71 = vector.shape_cast %70 : vector<1x1x128xf32> to vector<1x128xf32>
    %c0_44 = arith.constant 0 : index
    %c0_45 = arith.constant 0 : index
    %c0_46 = arith.constant 0 : index
    %72 = vector.load %arg7[%c0_44, %c0_45, %c0_46] : memref<4x128x128xf32, #tpu.memory_space<vmem>>, vector<1x128x128xf32>
    %73 = vector.shape_cast %72 : vector<1x128x128xf32> to vector<128x128xf32>
    %cst_47 = arith.constant dense<0.000000e+00> : vector<32x128xf32>
    %74 = tpu.matmul %55, %73, %cst_47 {dimension_numbers = #tpu.dot_dimension_numbers<[1], [0], [0], [1], [0, 0, 1, 1], [], []>} : vector<32x128xf32>, vector<128x128xf32>, vector<32x128xf32> -> vector<32x128xf32>
    %75 = vector.broadcast %71 : vector<1x128xf32> to vector<32x128xf32>
    %76 = arith.addf %75, %74 : vector<32x128xf32>
    %c1_48 = arith.constant 1 : index
    %c0_49 = arith.constant 0 : index
    %c0_50 = arith.constant 0 : index
    %77 = vector.load %arg7[%c1_48, %c0_49, %c0_50] : memref<4x128x128xf32, #tpu.memory_space<vmem>>, vector<1x128x128xf32>
    %78 = vector.shape_cast %77 : vector<1x128x128xf32> to vector<128x128xf32>
    %cst_51 = arith.constant dense<0.000000e+00> : vector<32x128xf32>
    %79 = tpu.matmul %69, %78, %cst_51 {dimension_numbers = #tpu.dot_dimension_numbers<[1], [0], [0], [1], [0, 0, 1, 1], [], []>} : vector<32x128xf32>, vector<128x128xf32>, vector<32x128xf32> -> vector<32x128xf32>
    %80 = arith.addf %76, %79 : vector<32x128xf32>
    %cst_52 = arith.constant 0.000000e+00 : f32
    %81 = vector.broadcast %cst_52 : f32 to vector<32x128xf32>
    %82 = arith.cmpf oge, %80, %81 : vector<32x128xf32>
    %cst_53 = arith.constant 0.00999999977 : f32
    %83 = vector.broadcast %cst_53 : f32 to vector<32x128xf32>
    %84 = arith.mulf %83, %80 : vector<32x128xf32>
    %85 = arith.select %82, %80, %84 : vector<32x128xi1>, vector<32x128xf32>
    %c2_54 = arith.constant 2 : index
    %c0_55 = arith.constant 0 : index
    %c0_56 = arith.constant 0 : index
    %86 = vector.load %arg7[%c2_54, %c0_55, %c0_56] : memref<4x128x128xf32, #tpu.memory_space<vmem>>, vector<1x128x128xf32>
    %87 = vector.shape_cast %86 : vector<1x128x128xf32> to vector<128x128xf32>
    %cst_57 = arith.constant dense<0.000000e+00> : vector<32x128xf32>
    %88 = tpu.matmul %85, %87, %cst_57 {dimension_numbers = #tpu.dot_dimension_numbers<[1], [0], [0], [1], [0, 0, 1, 1], [], []>} : vector<32x128xf32>, vector<128x128xf32>, vector<32x128xf32> -> vector<32x128xf32>
    %c1_58 = arith.constant 1 : index
    %c0_59 = arith.constant 0 : index
    %c0_60 = arith.constant 0 : index
    %89 = vector.load %arg8[%c1_58, %c0_59, %c0_60] : memref<3x1x128xf32, #tpu.memory_space<vmem>>, vector<1x1x128xf32>
    %90 = vector.shape_cast %89 : vector<1x1x128xf32> to vector<1x128xf32>
    %91 = vector.broadcast %90 : vector<1x128xf32> to vector<32x128xf32>
    %92 = arith.addf %88, %91 : vector<32x128xf32>
    %cst_61 = arith.constant 0.000000e+00 : f32
    %93 = vector.broadcast %cst_61 : f32 to vector<32x128xf32>
    %94 = arith.cmpf oge, %92, %93 : vector<32x128xf32>
    %cst_62 = arith.constant 0.00999999977 : f32
    %95 = vector.broadcast %cst_62 : f32 to vector<32x128xf32>
    %96 = arith.mulf %95, %92 : vector<32x128xf32>
    %97 = arith.select %94, %92, %96 : vector<32x128xi1>, vector<32x128xf32>
    %c3_63 = arith.constant 3 : index
    %c0_64 = arith.constant 0 : index
    %c0_65 = arith.constant 0 : index
    %98 = vector.load %arg7[%c3_63, %c0_64, %c0_65] : memref<4x128x128xf32, #tpu.memory_space<vmem>>, vector<1x128x128xf32>
    %99 = vector.shape_cast %98 : vector<1x128x128xf32> to vector<128x128xf32>
    %cst_66 = arith.constant dense<0.000000e+00> : vector<32x128xf32>
    %100 = tpu.matmul %97, %99, %cst_66 {dimension_numbers = #tpu.dot_dimension_numbers<[1], [0], [0], [1], [0, 0, 1, 1], [], []>} : vector<32x128xf32>, vector<128x128xf32>, vector<32x128xf32> -> vector<32x128xf32>
    %c2_67 = arith.constant 2 : index
    %c0_68 = arith.constant 0 : index
    %c0_69 = arith.constant 0 : index
    %101 = vector.load %arg8[%c2_67, %c0_68, %c0_69] : memref<3x1x128xf32, #tpu.memory_space<vmem>>, vector<1x1x128xf32>
    %102 = vector.shape_cast %101 : vector<1x1x128xf32> to vector<1x128xf32>
    %103 = vector.broadcast %102 : vector<1x128xf32> to vector<32x128xf32>
    %104 = arith.addf %100, %103 : vector<32x128xf32>
    %c0_70 = arith.constant 0 : index
    %c0_71 = arith.constant 0 : index
    %105 = vector.load %arg9[%c0_70, %c0_71] : memref<32x128xf32, #tpu.memory_space<vmem>>, vector<32x128xf32>
    tpu.vector_store %arg9[%c0_70, %c0_71], %104 {strides = array<i32>} : memref<32x128xf32, #tpu.memory_space<vmem>>, vector<32x128xf32>,
    return
  }
  func.func @transform_0(%arg0: i32) -> (i32, i32) {
    %c0_i32 = arith.constant 0 : i32
    %c0_i32_0 = arith.constant 0 : i32
    return %arg0, %c0_i32 : i32, i32
  }
  func.func @transform_1(%arg0: i32) -> (i32, i32) {
    %c0_i32 = arith.constant 0 : i32
    %c0_i32_0 = arith.constant 0 : i32
    return %arg0, %c0_i32 : i32, i32
  }
  func.func @transform_2(%arg0: i32) -> (i32, i32) {
    %c0_i32 = arith.constant 0 : i32
    %c0_i32_0 = arith.constant 0 : i32
    %c0_i32_1 = arith.constant 0 : i32
    return %c0_i32, %c0_i32_0 : i32, i32
  }
  func.func @transform_3(%arg0: i32) -> (i32, i32) {
    %c0_i32 = arith.constant 0 : i32
    %c0_i32_0 = arith.constant 0 : i32
    return %arg0, %c0_i32 : i32, i32
  }
  func.func @transform_4(%arg0: i32) -> (i32, i32, i32) {
    %c0_i32 = arith.constant 0 : i32
    %c0_i32_0 = arith.constant 0 : i32
    %c0_i32_1 = arith.constant 0 : i32
    %c0_i32_2 = arith.constant 0 : i32
    return %c0_i32, %c0_i32_0, %c0_i32_1 : i32, i32, i32
  }
  func.func @transform_5(%arg0: i32) -> (i32, i32, i32) {
    %c0_i32 = arith.constant 0 : i32
    %c0_i32_0 = arith.constant 0 : i32
    %c0_i32_1 = arith.constant 0 : i32
    %c0_i32_2 = arith.constant 0 : i32
    return %c0_i32, %c0_i32_0, %c0_i32_1 : i32, i32, i32
  }
  func.func @transform_6(%arg0: i32) -> (i32, i32, i32) {
    %c0_i32 = arith.constant 0 : i32
    %c0_i32_0 = arith.constant 0 : i32
    %c0_i32_1 = arith.constant 0 : i32
    %c0_i32_2 = arith.constant 0 : i32
    return %c0_i32, %c0_i32_0, %c0_i32_1 : i32, i32, i32
  }
  func.func @transform_7(%arg0: i32) -> (i32, i32, i32) {
    %c0_i32 = arith.constant 0 : i32
    %c0_i32_0 = arith.constant 0 : i32
    %c0_i32_1 = arith.constant 0 : i32
    %c0_i32_2 = arith.constant 0 : i32
    return %c0_i32, %c0_i32_0, %c0_i32_1 : i32, i32, i32
  }
  func.func @transform_8(%arg0: i32) -> (i32, i32) {
    %c0_i32 = arith.constant 0 : i32
    %c0_i32_0 = arith.constant 0 : i32
    return %arg0, %c0_i32 : i32, i32
  }
  func.func @transform_9(%arg0: i32) -> (i32, i32) {
    %c0_i32 = arith.constant 0 : i32
    %c0_i32_0 = arith.constant 0 : i32
    %c0_i32_1 = arith.constant 0 : i32
    return %c0_i32, %c0_i32_0 : i32, i32
  }
}

</mosaic_0001>

<bundles_post_ra>
// kernel: qgcnn_forward.6
= control target key start
LH: loop header
LB: loop body
LE: loop exit
PB: predicated region body
PF: predicated region fallthrough
CT: control target
= control target key end

     0   :  { %v1217_v0 = vmov 0   ;;  %v25_v13 = vlaneseq  ;;  %vm83_vm0 = vcmask 130048   ;;  %v1218_v17 = vmov 0.0   ;;  %s1518_s1 = inlined_call_operand.vmem [shape: s32[32,1], index: 1, kind: input, shape index: {}]   ;;  %s1519_s0 = inlined_call_operand.vmem [shape: s32[32,1], index: 0, kind: input, shape index: {}]   ;;  %s1520_s3 = inlined_call_operand.vmem [shape: f32[16,128], index: 3, kind: input, shape index: {}]   ;;  %s1521_s4 = inlined_call_operand.vmem [shape: f32[4,128,128], index: 4, kind: input, shape index: {}]   ;;  %s1522_s5 = inlined_call_operand.vmem [shape: f32[3,1,128], index: 5, kind: input, shape index: {}]   ;;  %s1523_s2 = inlined_call_operand.vmem [shape: s32[1,32], index: 2, kind: input, shape index: {}]   ;;  %s1524_s6 = inlined_call_operand.vmem [shape: f32[16,128], index: 6, kind: output, shape index: {}]  }
   0x1   :  { %1212 = vset.pattern.permute.xlu1 %v1217_v0  ;;  %1211 = vset.pattern.permute.xlu0 %v1217_v0  ;;  %v27_v1 = vld [vmem:[%s1518_s1] sm:$0xff]  ;;  %v28_v3 = vld [vmem:[%s1518_s1 + $0x8] sm:$0xff]  ;;  %v29_v7 = vld [vmem:[%s1518_s1 + $0x10] sm:$0xff] }
   0x2   :  { %v55_v2 = vld [vmem:[%s1519_s0] sm:$0xff]  ;;  %32 = vperm.xlu0 %1211, %v27_v1   ;;  %v56_v4 = vld [vmem:[%s1519_s0 + $0x8] sm:$0xff]  ;;  %v30_v8 = vld [vmem:[%s1518_s1 + $0x18] sm:$0xff]  ;;  %v26_v14 = vand.u32 127, %v25_v13 }
   0x3   :  { %60 = vperm.xlu1 %1212, %v55_v2   ;;  %v24_v5 = vld [vmem:[%s1520_s3 + $0x8] sm:$0xff]  ;;  %v23_v6 = vld [vmem:[%s1520_s3] sm:$0xff]  ;;  %v57_v9 = vld [vmem:[%s1519_s0 + $0x10] sm:$0xff] }
   0x4   :  { %1026 = vmatprep.subr.mxu0 %v24_v5  ;;  %1036 = vmatprep.subr.mxu1 %v24_v5  ;;  %v58_v10 = vld [vmem:[%s1519_s0 + $0x18] sm:$0xff]  ;;  %v293_v24 = vld [vmem:[%s1521_s4 + $0x70] sm:$0xff]  ;;  %v292_v28 = vld [vmem:[%s1521_s4 + $0x68] sm:$0xff] }
   0x5   :  { %1027 = vmatpush3.msra.mxu0 %v24_v5  ;;  %1037 = vmatpush3.msra.mxu1 %v24_v5  ;;  %v294_v11 = vld [vmem:[%s1521_s4 + $0x78] sm:$0xff]  ;;  %v885_v25 = vld [vmem:[%s1521_s4 + $0xf0] sm:$0xff]  ;;  %v884_v29 = vld [vmem:[%s1521_s4 + $0xe8] sm:$0xff] }
   0x6   :  { %35 = vperm.xlu0 %1211, %v28_v3   ;;  %1028 = vmatprep.subr.mxu0 %v23_v6  ;;  %v886_v12 = vld [vmem:[%s1521_s4 + $0xf8] sm:$0xff]  ;;  %v291_v32 = vld [vmem:[%s1521_s4 + $0x60] sm:$0xff]  ;;  %v289_v40 = vld [vmem:[%s1521_s4 + $0x50] sm:$0xff] }
   0x7   :  { %63 = vperm.xlu1 %1212, %v56_v4   ;;  %1038 = vmatprep.subr.mxu1 %v23_v6  ;;  %v883_v33 = vld [vmem:[%s1521_s4 + $0xe0] sm:$0xff]  ;;  %v290_v36 = vld [vmem:[%s1521_s4 + $0x58] sm:$0xff]  ;;  %v881_v41 = vld [vmem:[%s1521_s4 + $0xd0] sm:$0xff] }
   0x8   :  { %1029 = vmatpush3.msra.mxu0 %v23_v6  ;;  %1039 = vmatpush3.msra.mxu1 %v23_v6  ;;  %v882_v39 = vld [vmem:[%s1521_s4 + $0xd8] sm:$0xff]  ;;  %v288_v42 = vld [vmem:[%s1521_s4 + $0x48] sm:$0xff]  ;;  %v287_v44 = vld [vmem:[%s1521_s4 + $0x40] sm:$0xff] }
   0x9   :  { %1046 = vmatprep.subr.mxu0 %v294_v11  ;;  %1084 = vmatprep.subr.mxu1 %v886_v12  ;;  %v880_v43 = vld [vmem:[%s1521_s4 + $0xc8] sm:$0xff]  ;;  %v879_v45 = vld [vmem:[%s1521_s4 + $0xc0] sm:$0xff]  ;;  %v286_v46 = vld [vmem:[%s1521_s4 + $0x38] sm:$0xff] }
   0xa   :  { %38 = vperm.xlu0 %1211, %v29_v7   ;;  %v878_v47 = vld [vmem:[%s1521_s4 + $0xb8] sm:$0xff]  ;;  %v285_v48 = vld [vmem:[%s1521_s4 + $0x30] sm:$0xff]  ;;  %v284_v50 = vld [vmem:[%s1521_s4 + $0x28] sm:$0xff] }
   0xb   :  { %41 = vperm.xlu1 %1212, %v30_v8   ;;  %v877_v49 = vld [vmem:[%s1521_s4 + $0xb0] sm:$0xff]  ;;  %v876_v51 = vld [vmem:[%s1521_s4 + $0xa8] sm:$0xff]  ;;  %v283_v52 = vld [vmem:[%s1521_s4 + $0x20] sm:$0xff] }
   0xc   :  { %v875_v53 = vld [vmem:[%s1521_s4 + $0xa0] sm:$0xff]  ;;  %v282_v54 = vld [vmem:[%s1521_s4 + $0x18] sm:$0xff]  ;;  %v281_v56 = vld [vmem:[%s1521_s4 + $0x10] sm:$0xff] }
   0xd   :  { %v874_v55 = vld [vmem:[%s1521_s4 + $0x98] sm:$0xff]  ;;  %v873_v57 = vld [vmem:[%s1521_s4 + $0x90] sm:$0xff]  ;;  %v280_v58 = vld [vmem:[%s1521_s4 + $0x8] sm:$0xff] }
   0xe   :  { %66 = vperm.xlu0 %1211, %v57_v9   ;;  %v872_v59 = vld [vmem:[%s1521_s4 + $0x88] sm:$0xff]  ;;  %v279_v60 = vld [vmem:[%s1521_s4] sm:$0xff]  ;;  %v902_v62 = vld [vmem:[%s1521_s4 + $0x178] sm:$0xff] }
   0xf   :  { %69 = vperm.xlu1 %1212, %v58_v10   ;;  %v871_v61 = vld [vmem:[%s1521_s4 + $0x80] sm:$0xff]  ;;  %v901_v3 = vld [vmem:[%s1521_s4 + $0x170] sm:$0xff]  ;;  %v900_v5 = vld [vmem:[%s1521_s4 + $0x168] sm:$0xff] }
  0x10   :  { %v899_v7 = vld [vmem:[%s1521_s4 + $0x160] sm:$0xff]  ;;  %v898_v9 = vld [vmem:[%s1521_s4 + $0x158] sm:$0xff] }
  0x7d   :  { %v33_v15 = vpop.permute.xlu0 %32 }
  0x7e   :  { %v61_v16 = vpop.permute.xlu1 %60  ;;  %vm43_vm1 = vcmp.eq.s32.totalorder %v26_v14, %v33_v15  ;;  %v894_v15 = vld [vmem:[%s1521_s4 + $0x138] sm:$0xff] }
  0x7f   :  { %vm71_vm2 = vcmp.eq.s32.totalorder %v26_v14, %v61_v16  ;;  %v854_v18 = vsel %vm43_vm1, 1.0, %v1218_v17  ;;  %v893_v16 = vld [vmem:[%s1521_s4 + $0x130] sm:$0xff] }
  0x80   :  { %v858_v19 = vsel %vm71_vm2, 1.0, %v1218_v17  ;;  %1030 = vmatprep.mubr.msk.f32.mxu0 %vm83_vm0, %v854_v18  ;;  %v892_v18 = vld [vmem:[%s1521_s4 + $0x128] sm:$0xff] }
  0x81   :  { %1040 = vmatprep.mubr.msk.f32.mxu1 %vm83_vm0, %v858_v19  ;;  %v36_v20 = vpop.permute.xlu0 %35  ;;  %v891_v19 = vld [vmem:[%s1521_s4 + $0x120] sm:$0xff] }
  0x82   :  { %v64_v21 = vpop.permute.xlu1 %63  ;;  %vm44_vm3 = vcmp.eq.s32.totalorder %v26_v14, %v36_v20  ;;  %v890_v20 = vld [vmem:[%s1521_s4 + $0x118] sm:$0xff] }
  0x83   :  { %vm72_vm4 = vcmp.eq.s32.totalorder %v26_v14, %v64_v21  ;;  %v855_v22 = vsel %vm44_vm3, 1.0, %v1218_v17  ;;  %v889_v21 = vld [vmem:[%s1521_s4 + $0x110] sm:$0xff]  ;;  %vm754_vm3 = vcmask 261120  }
  0x84   :  { %v859_v23 = vsel %vm72_vm4, 1.0, %v1218_v17  ;;  %1031 = vmatmul.mubr.msk.f32.vlgmr.msra.gmra.mxu0 %vm83_vm0, %v855_v22  ;;  %v888_v22 = vld [vmem:[%s1521_s4 + $0x108] sm:$0xff] }
  0x85   :  { %1041 = vmatmul.mubr.msk.f32.vlgmr.msra.gmra.mxu1 %vm83_vm0, %v859_v23  ;;  %v39_v26 = vpop.permute.xlu0 %38  ;;  %1047 = vmatpush3.msra.mxu0 %v294_v11  ;;  %v897_v11 = vld [vmem:[%s1521_s4 + $0x150] sm:$0xff]  ;;  %v887_v23 = vld [vmem:[%s1521_s4 + $0x100] sm:$0xff] }
  0x86   :  { %v42_v27 = vpop.permute.xlu1 %41  ;;  %1085 = vmatpush3.msra.mxu1 %v886_v12  ;;  %vm45_vm5 = vcmp.eq.s32.totalorder %v26_v14, %v39_v26  ;;  %1048 = vmatprep.subr.mxu0 %v293_v24  ;;  %v896_v12 = vld [vmem:[%s1521_s4 + $0x148] sm:$0xff] }
  0x87   :  { %vm46_vm6 = vcmp.eq.s32.totalorder %v26_v14, %v42_v27  ;;  %1086 = vmatprep.subr.mxu1 %v885_v25  ;;  %v856_v30 = vsel %vm45_vm5, 1.0, %v1218_v17  ;;  %1049 = vmatpush3.msra.mxu0 %v293_v24  ;;  %v920_v24 = vld [vmem:[%s1521_s4 + $0x1f8] sm:$0xff]  ;;  %v918_v26 = vld [vmem:[%s1521_s4 + $0x1e8] sm:$0xff]  ;;  %v917_v27 = vld [vmem:[%s1521_s4 + $0x1e0] sm:$0xff] }
  0x88   :  { %v857_v31 = vsel %vm46_vm6, 1.0, %v1218_v17  ;;  %1087 = vmatpush3.msra.mxu1 %v885_v25  ;;  %1033 = vmatprep.mubr.msk.f32.mxu0 %vm83_vm0, %v856_v30  ;;  %v919_v25 = vld [vmem:[%s1521_s4 + $0x1f0] sm:$0xff]  ;;  %v914_v30 = vld [vmem:[%s1521_s4 + $0x1c8] sm:$0xff] }
  0x89   :  { %1050 = vmatprep.subr.mxu0 %v292_v28  ;;  %v67_v34 = vpop.permute.xlu0 %66  ;;  %1034 = vmatmul.mubr.msk.f32.gmra.mxu0 %vm83_vm0, %v857_v31  ;;  %v913_v31 = vld [vmem:[%s1521_s4 + $0x1c0] sm:$0xff] }
  0x8a   :  { %v70_v35 = vpop.permute.xlu1 %69  ;;  %1088 = vmatprep.subr.mxu1 %v884_v29  ;;  %vm73_vm7 = vcmp.eq.s32.totalorder %v26_v14, %v67_v34  ;;  %1051 = vmatpush3.msra.mxu0 %v292_v28  ;;  %v916_v28 = vld [vmem:[%s1521_s4 + $0x1d8] sm:$0xff]  ;;  %v910_v34 = vld [vmem:[%s1521_s4 + $0x1a8] sm:$0xff] }
  0x8b   :  { %vm74_vm8 = vcmp.eq.s32.totalorder %v26_v14, %v70_v35  ;;  %1089 = vmatpush3.msra.mxu1 %v884_v29  ;;  %v860_v37 = vsel %vm73_vm7, 1.0, %v1218_v17  ;;  %1052 = vmatprep.subr.mxu0 %v291_v32  ;;  %v895_v14 = vld [vmem:[%s1521_s4 + $0x140] sm:$0xff]  ;;  %v915_v29 = vld [vmem:[%s1521_s4 + $0x1d0] sm:$0xff] }
  0x8c   :  { %v861_v38 = vsel %vm74_vm8, 1.0, %v1218_v17  ;;  %1090 = vmatprep.subr.mxu1 %v883_v33  ;;  %1043 = vmatprep.mubr.msk.f32.mxu1 %vm83_vm0, %v860_v37  ;;  %v909_v35 = vld [vmem:[%s1521_s4 + $0x1a0] sm:$0xff] }
  0x8d   :  { %1053 = vmatpush3.msra.mxu0 %v291_v32  ;;  %1044 = vmatmul.mubr.msk.f32.gmra.mxu1 %vm83_vm0, %v861_v38  ;;  %v912_v32 = vld [vmem:[%s1521_s4 + $0x1b8] sm:$0xff] }
  0x8e   :  { %1054 = vmatprep.subr.mxu0 %v290_v36  ;;  %1091 = vmatpush3.msra.mxu1 %v883_v33  ;;  %v911_v33 = vld [vmem:[%s1521_s4 + $0x1b0] sm:$0xff] }
  0x8f   :  { %1055 = vmatpush3.msra.mxu0 %v290_v36  ;;  %1092 = vmatprep.subr.mxu1 %v882_v39  ;;  %v870_v36 = vld [vmem:[%s1522_s5] ss:$0 sm:$0xff] }
  0x90   :  { %1056 = vmatprep.subr.mxu0 %v289_v40  ;;  %1093 = vmatpush3.msra.mxu1 %v882_v39 }
  0x91   :  { %1057 = vmatpush3.msra.mxu0 %v289_v40  ;;  %1094 = vmatprep.subr.mxu1 %v881_v41 }
  0x92   :  { %1058 = vmatprep.subr.mxu0 %v288_v42  ;;  %1095 = vmatpush3.msra.mxu1 %v881_v41 }
  0x93   :  { %1059 = vmatpush3.msra.mxu0 %v288_v42  ;;  %1096 = vmatprep.subr.mxu1 %v880_v43 }
  0x94   :  { %1060 = vmatprep.subr.mxu0 %v287_v44  ;;  %1097 = vmatpush3.msra.mxu1 %v880_v43 }
  0x95   :  { %1061 = vmatpush3.msra.mxu0 %v287_v44  ;;  %1098 = vmatprep.subr.mxu1 %v879_v45 }
  0x96   :  { %1062 = vmatprep.subr.mxu0 %v286_v46  ;;  %1099 = vmatpush3.msra.mxu1 %v879_v45 }
  0x97   :  { %1063 = vmatpush3.msra.mxu0 %v286_v46  ;;  %1100 = vmatprep.subr.mxu1 %v878_v47 }
  0x98   :  { %1064 = vmatprep.subr.mxu0 %v285_v48  ;;  %1101 = vmatpush3.msra.mxu1 %v878_v47 }
  0x99   :  { %1065 = vmatpush3.msra.mxu0 %v285_v48  ;;  %1102 = vmatprep.subr.mxu1 %v877_v49 }
  0x9a   :  { %1066 = vmatprep.subr.mxu0 %v284_v50  ;;  %1103 = vmatpush3.msra.mxu1 %v877_v49 }
  0x9b   :  { %1067 = vmatpush3.msra.mxu0 %v284_v50  ;;  %1104 = vmatprep.subr.mxu1 %v876_v51 }
  0x9c   :  { %1068 = vmatprep.subr.mxu0 %v283_v52  ;;  %1105 = vmatpush3.msra.mxu1 %v876_v51 }
  0x9d   :  { %1069 = vmatpush3.msra.mxu0 %v283_v52  ;;  %1106 = vmatprep.subr.mxu1 %v875_v53 }
  0x9e   :  { %1070 = vmatprep.subr.mxu0 %v282_v54  ;;  %1107 = vmatpush3.msra.mxu1 %v875_v53 }
  0x9f   :  { %1071 = vmatpush3.msra.mxu0 %v282_v54  ;;  %1108 = vmatprep.subr.mxu1 %v874_v55 }
  0xa0   :  { %1072 = vmatprep.subr.mxu0 %v281_v56  ;;  %1109 = vmatpush3.msra.mxu1 %v874_v55 }
  0xa1   :  { %1073 = vmatpush3.msra.mxu0 %v281_v56  ;;  %1110 = vmatprep.subr.mxu1 %v873_v57 }
  0xa2   :  { %1111 = vmatpush3.msra.mxu1 %v873_v57  ;;  %1074 = vmatprep.subr.mxu0 %v280_v58 }
  0xa3   :  { %1112 = vmatprep.subr.mxu1 %v872_v59  ;;  %1075 = vmatpush3.msra.mxu0 %v280_v58 }
  0xa4   :  { %1113 = vmatpush3.msra.mxu1 %v872_v59  ;;  %1076 = vmatprep.subr.mxu0 %v279_v60 }
  0xa5   :  { %1114 = vmatprep.subr.mxu1 %v871_v61  ;;  %1077 = vmatpush3.msra.mxu0 %v279_v60 }
  0xa6   :  { %1115 = vmatpush3.msra.mxu1 %v871_v61  ;;  %1122 = vmatprep.subr.mxu0 %v902_v62  ;;  %v908_v61 = vld [vmem:[%s1521_s4 + $0x198] sm:$0xff] }
  0xa7   :  { %1160 = vmatprep.subr.mxu1 %v920_v24 }
 0x144   :  { %v1032_v63 = vpop.f32.mrf.mxu0 }
 0x145   :  { %v1042_v0 = vpop.f32.mrf.mxu1 }
 0x146   :  { %v162_v1 = vpop.f32.mrf.mxu0 }
 0x147   :  { %v259_v2 = vpop.f32.mrf.mxu1  ;;  %1078 = vmatprep.mubr.f32.mxu0 %v162_v1  ;;  %v904_v1 = vld [vmem:[%s1522_s5 + $0x1] ss:$0 sm:$0xff] }
 0x148   :  { %1116 = vmatprep.mubr.f32.mxu1 %v259_v2  ;;  %1079 = vmatmul.mubr.f32.vlgmr.msra.gmra.mxu0 %v1032_v63  ;;  %v906_v63 = vld [vmem:[%s1521_s4 + $0x188] sm:$0xff] }
 0x149   :  { %1117 = vmatmul.mubr.f32.vlgmr.msra.gmra.mxu1 %v1042_v0  ;;  %v1035_v4 = vpop.f32.mrf.mxu0  ;;  %1123 = vmatpush3.msra.mxu0 %v902_v62  ;;  %v907_v62 = vld [vmem:[%s1521_s4 + $0x190] sm:$0xff]  ;;  %v905_v0 = vld [vmem:[%s1521_s4 + $0x180] sm:$0xff] }
 0x14a   :  { %1124 = vmatprep.subr.mxu0 %v901_v3  ;;  %1161 = vmatpush3.msra.mxu1 %v920_v24 }
 0x14b   :  { %v172_v6 = vpop.f32.mrf.mxu0  ;;  %1125 = vmatpush3.msra.mxu0 %v901_v3  ;;  %1162 = vmatprep.subr.mxu1 %v919_v25 }
 0x14c   :  { %1081 = vmatprep.mubr.f32.mxu0 %v172_v6  ;;  %1126 = vmatprep.subr.mxu0 %v900_v5 }
 0x14d   :  { %v1045_v8 = vpop.f32.mrf.mxu1  ;;  %1082 = vmatmul.mubr.f32.gmra.mxu0 %v1035_v4  ;;  %1163 = vmatpush3.msra.mxu1 %v919_v25 }
 0x14e   :  { %1127 = vmatpush3.msra.mxu0 %v900_v5  ;;  %1164 = vmatprep.subr.mxu1 %v918_v26 }
 0x14f   :  { %v269_v10 = vpop.f32.mrf.mxu1  ;;  %1128 = vmatprep.subr.mxu0 %v899_v7  ;;  %1165 = vmatpush3.msra.mxu1 %v918_v26 }
 0x150   :  { %1119 = vmatprep.mubr.f32.mxu1 %v269_v10  ;;  %1129 = vmatpush3.msra.mxu0 %v899_v7 }
 0x151   :  { %1120 = vmatmul.mubr.f32.gmra.mxu1 %v1045_v8  ;;  %1130 = vmatprep.subr.mxu0 %v898_v9 }
 0x152   :  { %1131 = vmatpush3.msra.mxu0 %v898_v9  ;;  %1166 = vmatprep.subr.mxu1 %v917_v27 }
 0x153   :  { %1132 = vmatprep.subr.mxu0 %v897_v11  ;;  %1167 = vmatpush3.msra.mxu1 %v917_v27 }
 0x154   :  { %1133 = vmatpush3.msra.mxu0 %v897_v11  ;;  %1168 = vmatprep.subr.mxu1 %v916_v28 }
 0x155   :  { %1134 = vmatprep.subr.mxu0 %v896_v12  ;;  %1169 = vmatpush3.msra.mxu1 %v916_v28  ;;  %v922_v28 = vld [vmem:[%s1522_s5 + $0x2] ss:$0 sm:$0xff] }
 0x156   :  { %1135 = vmatpush3.msra.mxu0 %v896_v12  ;;  %1170 = vmatprep.subr.mxu1 %v915_v29 }
 0x157   :  { %1136 = vmatprep.subr.mxu0 %v895_v14  ;;  %1171 = vmatpush3.msra.mxu1 %v915_v29 }
 0x158   :  { %1137 = vmatpush3.msra.mxu0 %v895_v14  ;;  %1172 = vmatprep.subr.mxu1 %v914_v30 }
 0x159   :  { %1138 = vmatprep.subr.mxu0 %v894_v15  ;;  %1173 = vmatpush3.msra.mxu1 %v914_v30 }
 0x15a   :  { %1139 = vmatpush3.msra.mxu0 %v894_v15  ;;  %1174 = vmatprep.subr.mxu1 %v913_v31 }
 0x15b   :  { %1140 = vmatprep.subr.mxu0 %v893_v16  ;;  %1175 = vmatpush3.msra.mxu1 %v913_v31 }
 0x15c   :  { %1141 = vmatpush3.msra.mxu0 %v893_v16  ;;  %1176 = vmatprep.subr.mxu1 %v912_v32 }
 0x15d   :  { %1142 = vmatprep.subr.mxu0 %v892_v18  ;;  %1177 = vmatpush3.msra.mxu1 %v912_v32 }
 0x15e   :  { %1143 = vmatpush3.msra.mxu0 %v892_v18  ;;  %1178 = vmatprep.subr.mxu1 %v911_v33 }
 0x15f   :  { %1144 = vmatprep.subr.mxu0 %v891_v19  ;;  %1179 = vmatpush3.msra.mxu1 %v911_v33 }
 0x160   :  { %1145 = vmatpush3.msra.mxu0 %v891_v19  ;;  %1180 = vmatprep.subr.mxu1 %v910_v34 }
 0x161   :  { %1146 = vmatprep.subr.mxu0 %v890_v20  ;;  %1181 = vmatpush3.msra.mxu1 %v910_v34 }
 0x162   :  { %1147 = vmatpush3.msra.mxu0 %v890_v20  ;;  %1182 = vmatprep.subr.mxu1 %v909_v35  ;;  %v741_v20 = vshrl.u32 %v25_v13, 7 }
 0x163   :  { %1148 = vmatprep.subr.mxu0 %v889_v21  ;;  %1183 = vmatpush3.msra.mxu1 %v909_v35 }
 0x164   :  { %1149 = vmatpush3.msra.mxu0 %v889_v21  ;;  %1184 = vmatprep.subr.mxu1 %v908_v61  ;;  %v742_v21 = vadd.s32 8, %v741_v20 }
 0x165   :  { %1150 = vmatprep.subr.mxu0 %v888_v22  ;;  %1185 = vmatpush3.msra.mxu1 %v908_v61 }
 0x166   :  { %1151 = vmatpush3.msra.mxu0 %v888_v22  ;;  %1186 = vmatprep.subr.mxu1 %v907_v62  ;;  %v923_v22 = vld [vmem:[%s1523_s2] ss:$0 sm:$0xff] }
 0x167   :  { %1152 = vmatprep.subr.mxu0 %v887_v23  ;;  %1187 = vmatpush3.msra.mxu1 %v907_v62  ;;  %vm748_vm1 = vcmp.eq.s32.totalorder %v741_v20, %v923_v22  ;;  %vm749_vm2 = vcmp.eq.s32.totalorder %v742_v21, %v923_v22 }
 0x168   :  { %1153 = vmatpush3.msra.mxu0 %v887_v23  ;;  %1188 = vmatprep.subr.mxu1 %v906_v63  ;;  %v924_v23 = vsel %vm748_vm1, 1.0, %v1218_v17  ;;  %v925_v24 = vsel %vm749_vm2, 1.0, %v1218_v17 }
 0x169   :  { %1189 = vmatpush3.msra.mxu1 %v906_v63  ;;  %v839_v25 = vsel %vm754_vm3, %v925_v24, 0.0  ;;  %v836_v26 = vsel %vm754_vm3, %v924_v23, 0.0 }
 0x16a   :  { %1190 = vmatprep.subr.mxu1 %v905_v0  ;;  %840 = vadd.xlane.f32.xlu1 %v839_v25 }
 0x16b   :  { %1191 = vmatpush3.msra.mxu1 %v905_v0  ;;  %837 = vadd.xlane.f32.xlu0 %v836_v26 }
 0x1f3   :  { %v841_v34 = vpop.xlane.xlu1 %840 }
 0x1f4   :  { %v838_v35 = vpop.xlane.xlu0 %837 }
 0x208   :  { %v1080_v37 = vpop.f32.mrf.mxu0 }
 0x209   :  { %v1118_v38 = vpop.f32.mrf.mxu1  ;;  %v387_v39 = vadd.f32 %v1080_v37, %v870_v36  ;;  %v842_v37 = vmax.f32 %v838_v35, 1.0 }
 0x20a   :  { %v361_v40 = vpop.f32.mrf.mxu0 }
 0x20b   :  { %v493_v41 = vadd.f32 %v1118_v38, %v387_v39  ;;  %v386_v42 = vadd.f32 %v870_v36, %v361_v40  ;;  %v473_v43 = vpop.f32.mrf.mxu1 }
 0x20d   :  { %v492_v44 = vadd.f32 %v473_v43, %v386_v42  ;;  %v1083_v45 = vpop.f32.mrf.mxu0  ;;  %v501_v46 = vmul.f32 0.01, %v493_v41  ;;  %vm497_vm9 = vcmp.ge.f32.partialorder %v493_v41, 0.0 }
 0x20e   :  { %v389_v49 = vadd.f32 %v1083_v45, %v870_v36 }
 0x20f   :  { %v500_v47 = vmul.f32 0.01, %v492_v44  ;;  %v371_v48 = vpop.f32.mrf.mxu0  ;;  %vm496_vm10 = vcmp.ge.f32.partialorder %v492_v44, 0.0  ;;  %v505_v52 = vsel %vm497_vm9, %v493_v41, %v501_v46 }
 0x210   :  { %v388_v53 = vadd.f32 %v870_v36, %v371_v48  ;;  %v843_v36 = vmax.f32 %v841_v34, 1.0 }
 0x211   :  { %v1121_v50 = vpop.f32.mrf.mxu1  ;;  %v504_v51 = vsel %vm496_vm10, %v492_v44, %v500_v47 }
 0x212   :  { %v495_v54 = vadd.f32 %v1121_v50, %v389_v49  ;;  %1154 = vmatprep.mubr.f32.mxu0 %v504_v51  ;;  %1213 = vrcp.f32 %v843_v36 }
 0x213   :  { %v483_v55 = vpop.f32.mrf.mxu1  ;;  %1155 = vmatmul.mubr.f32.vlgmr.msra.gmra.mxu0 %v505_v52  ;;  %1215 = vrcp.f32 %v842_v37 }
 0x214   :  { %v494_v56 = vadd.f32 %v483_v55, %v388_v53  ;;  %v503_v57 = vmul.f32 0.01, %v495_v54  ;;  %vm499_vm12 = vcmp.ge.f32.partialorder %v495_v54, 0.0 }
 0x216   :  { %v502_v58 = vmul.f32 0.01, %v494_v56  ;;  %vm498_vm11 = vcmp.ge.f32.partialorder %v494_v56, 0.0  ;;  %v507_v60 = vsel %vm499_vm12, %v495_v54, %v503_v57 }
 0x218   :  { %v506_v59 = vsel %vm498_vm11, %v494_v56, %v502_v58 }
 0x219   :  { %1157 = vmatprep.mubr.f32.mxu0 %v506_v59 }
 0x21a   :  { %1158 = vmatmul.mubr.f32.gmra.mxu0 %v507_v60 }
 0x21b   :  { %1206 = vmatprep.mubr.msk.f32.mxu0 %vm754_vm3, %v924_v23 }
 0x21f   :  { %v1214_v38 = vpop.eup %1213 }
 0x220   :  { %v1216_v39 = vpop.eup %1215 }
 0x2d3   :  { %v1156_v2 = vpop.f32.mrf.mxu0 }
 0x2d4   :  { %v605_v3 = vadd.f32 %v1156_v2, %v904_v1 }
 0x2d5   :  { %v599_v4 = vpop.f32.mrf.mxu0 }
 0x2d6   :  { %v600_v5 = vadd.f32 %v904_v1, %v599_v4  ;;  %v623_v6 = vmul.f32 0.01, %v605_v3  ;;  %vm619_vm13 = vcmp.ge.f32.partialorder %v605_v3, 0.0 }
 0x2d8   :  { %v622_v7 = vmul.f32 0.01, %v600_v5  ;;  %vm618_vm14 = vcmp.ge.f32.partialorder %v600_v5, 0.0  ;;  %v627_v10 = vsel %vm619_vm13, %v605_v3, %v623_v6 }
 0x2da   :  { %v1159_v8 = vpop.f32.mrf.mxu0  ;;  %v626_v9 = vsel %vm618_vm14, %v600_v5, %v622_v7 }
 0x2db   :  { %v615_v11 = vadd.f32 %v1159_v8, %v904_v1  ;;  %1192 = vmatprep.mubr.f32.mxu1 %v626_v9 }
 0x2dc   :  { %v609_v12 = vpop.f32.mrf.mxu0  ;;  %1193 = vmatmul.mubr.f32.vlgmr.msra.gmra.mxu1 %v627_v10 }
 0x2dd   :  { %v610_v14 = vadd.f32 %v904_v1, %v609_v12  ;;  %v625_v15 = vmul.f32 0.01, %v615_v11  ;;  %vm621_vm0 = vcmp.ge.f32.partialorder %v615_v11, 0.0 }
 0x2df   :  { %v624_v16 = vmul.f32 0.01, %v610_v14  ;;  %vm620_vm15 = vcmp.ge.f32.partialorder %v610_v14, 0.0  ;;  %v629_v19 = vsel %vm621_vm0, %v615_v11, %v625_v15 }
 0x2e1   :  { %v628_v18 = vsel %vm620_vm15, %v610_v14, %v624_v16 }
 0x2e2   :  { %1195 = vmatprep.mubr.f32.mxu1 %v628_v18 }
 0x2e3   :  { %1196 = vmatmul.mubr.f32.gmra.mxu1 %v629_v19 }
 0x39c   :  { %v1194_v13 = vpop.f32.mrf.mxu1 }
 0x39d   :  { %v727_v17 = vadd.f32 %v1194_v13, %v922_v28 }
 0x39e   :  { %v721_v27 = vpop.f32.mrf.mxu1 }
 0x39f   :  { %v722_v33 = vadd.f32 %v922_v28, %v721_v27 }
 0x3a3   :  { %v1197_v29 = vpop.f32.mrf.mxu1 }
 0x3a4   :  { %v737_v30 = vadd.f32 %v1197_v29, %v922_v28 }
 0x3a5   :  { %v731_v31 = vpop.f32.mrf.mxu1 }
 0x3a6   :  { %v732_v32 = vadd.f32 %v922_v28, %v731_v31  ;;  %1198 = vmatprep.subr.mxu0 %v737_v30 }
 0x3a7   :  { %1199 = vmatpush3.msra.mxu0 %v737_v30 }
 0x3a8   :  { %1200 = vmatprep.subr.mxu0 %v732_v32 }
 0x3a9   :  { %1201 = vmatpush3.msra.mxu0 %v732_v32 }
 0x3aa   :  { %1202 = vmatprep.subr.mxu0 %v727_v17 }
 0x3ab   :  { %1203 = vmatpush3.msra.mxu0 %v727_v17 }
 0x3ac   :  { %1204 = vmatprep.subr.mxu0 %v722_v33 }
 0x3ad   :  { %1205 = vmatpush3.msra.mxu0 %v722_v33 }
 0x3ae   :  { %1207 = vmatmul.mubr.msk.f32.vlgmr.msra.gmra.mxu0 %vm754_vm3, %v925_v24 }
 0x46e   :  { %v1208_v40 = vpop.f32.mrf.mxu0 }
 0x46f   :  { %v847_v41 = vmul.f32 %v1214_v38, %v1208_v40 }
 0x470   :  { %v827_v42 = vpop.f32.mrf.mxu0 }
 0x471   :  { %849 = vst [vmem:[%s1524_s6 + $0x8] sm:$0xff] %v847_v41  ;;  %v845_v43 = vmul.f32 %v1216_v39, %v827_v42 }
 0x473   :  { %848 = vst [vmem:[%s1524_s6] sm:$0xff] %v845_v43 }

// kernel: qgcnn_forward.4
= control target key start
LH: loop header
LB: loop body
LE: loop exit
PB: predicated region body
PF: predicated region fallthrough
CT: control target
= control target key end

     0   :  { %11 = vsyncpa [#allocation3], 0  ;;  %s1209_s21 = smov [#allocation2]   ;;  %s1324_s0 = inlined_call_operand.vmem [shape: s32[32,1], index: 0, kind: input, shape index: {}]   ;;  %s1325_s1 = inlined_call_operand.vmem [shape: s32[32,1], index: 1, kind: input, shape index: {}]   ;;  %s1326_s2 = inlined_call_operand.vmem [shape: s32[1,32], index: 2, kind: input, shape index: {}]   ;;  %s1327_s3 = inlined_call_operand.vmem [shape: f32[16,128], index: 3, kind: input, shape index: {}]   ;;  %s1328_s4 = inlined_call_operand.hbm [shape: f32[4,128,128], index: 4, kind: input, shape index: {}]   ;;  %s1329_s5 = inlined_call_operand.vmem [shape: f32[3,1,128], index: 5, kind: input, shape index: {}]   ;;  %s1330_s6 = inlined_call_operand.vmem [shape: f32[16,128], index: 6, kind: output, shape index: {}]  }
   0x1   :  { %s25_s22 = sshll.u32 %s1209_s21, 4  ;;  %s26_s22 = int_to_ptr.vmem [resolvable:$true] %s25_s22 }
   0x2   :  { %s1195_s23 = scalar_lea.vmem %s26_s22, 8192  ;;  %p1200_p1 = scmp.lt.s32.totalorder %s26_s22, %s26_s22 }
   0x3   :  { %p1196_p0 = scmp.ne.s32.totalorder %s26_s22, %s1195_s23  ;;  %p1201_p2 = scmp.lt.s32.totalorder %s1195_s23, %s1195_s23 }
   0x5   :  { %p1202_p3 = por %p1201_p2, %p1200_p1 }
   0x7   :  { %p1203_p4 = pnand %p1202_p3, %p1196_p0 }
   0x9   :  { %1206 = shalt.err (!%p1203_p4)
}
   0xa   :  { %s1210_s24 = smov 128   ;;  %s1211_s25 = smov 8  }
   0xb   :  { %31 = dma.hbm_to_vmem [thread:$0]  %s1328_s4, 8192, %s26_s22, [#allocation3], %s1210_s24, %s1210_s24, %s1211_s25  }
   0xc   :  { %1207 = dma.done.wait [#allocation3], 8192  }
   0xd   :  { %1208 = vsyncadd [#allocation3], 4294959104  ;;  %v1212_v0 = vmov 0   ;;  %v69_v1 = vld [vmem:[%s1324_s0] sm:$0xff]  ;;  %v70_v3 = vld [vmem:[%s1324_s0 + $0x8] sm:$0xff]  ;;  %v39_v13 = vlaneseq  ;;  %vm97_vm0 = vcmask 130048  }
   0xe   :  { %1182 = vset.pattern.permute.xlu1 %v1212_v0  ;;  %1181 = vset.pattern.permute.xlu0 %v1212_v0  ;;  %v41_v2 = vld [vmem:[%s1325_s1] sm:$0xff]  ;;  %v42_v4 = vld [vmem:[%s1325_s1 + $0x8] sm:$0xff]  ;;  %v44_v7 = vld [vmem:[%s1325_s1 + $0x18] sm:$0xff]  ;;  %v1213_v17 = vmov 0.0  }
   0xf   :  { %74 = vperm.xlu1 %1182, %v69_v1   ;;  %46 = vperm.xlu0 %1181, %v41_v2   ;;  %v38_v5 = vld [vmem:[%s1327_s3 + $0x8] sm:$0xff]  ;;  %v37_v6 = vld [vmem:[%s1327_s3] sm:$0xff]  ;;  %v43_v8 = vld [vmem:[%s1325_s1 + $0x10] sm:$0xff]  ;;  %v40_v14 = vand.u32 127, %v39_v13 }
  0x10   :  { %993 = vmatprep.subr.mxu0 %v38_v5  ;;  %1003 = vmatprep.subr.mxu1 %v38_v5  ;;  %v72_v9 = vld [vmem:[%s1324_s0 + $0x18] sm:$0xff]  ;;  %v71_v10 = vld [vmem:[%s1324_s0 + $0x10] sm:$0xff]  ;;  %v306_v28 = vld [vmem:[#allocation2 + $0x68] sm:$0xff] }
  0x11   :  { %994 = vmatpush3.msra.mxu0 %v38_v5  ;;  %1004 = vmatpush3.msra.mxu1 %v38_v5  ;;  %v308_v11 = vld [vmem:[#allocation2 + $0x78] sm:$0xff]  ;;  %v307_v24 = vld [vmem:[#allocation2 + $0x70] sm:$0xff]  ;;  %v418_v29 = vld [vmem:[#allocation2 + $0xe8] sm:$0xff] }
  0x12   :  { %995 = vmatprep.subr.mxu0 %v37_v6  ;;  %1005 = vmatprep.subr.mxu1 %v37_v6  ;;  %v420_v12 = vld [vmem:[#allocation2 + $0xf8] sm:$0xff]  ;;  %v419_v25 = vld [vmem:[#allocation2 + $0xf0] sm:$0xff]  ;;  %v305_v32 = vld [vmem:[#allocation2 + $0x60] sm:$0xff] }
  0x13   :  { %77 = vperm.xlu1 %1182, %v70_v3   ;;  %49 = vperm.xlu0 %1181, %v42_v4   ;;  %v417_v33 = vld [vmem:[#allocation2 + $0xe0] sm:$0xff]  ;;  %v304_v36 = vld [vmem:[#allocation2 + $0x58] sm:$0xff]  ;;  %v303_v40 = vld [vmem:[#allocation2 + $0x50] sm:$0xff] }
  0x14   :  { %996 = vmatpush3.msra.mxu0 %v37_v6  ;;  %1006 = vmatpush3.msra.mxu1 %v37_v6  ;;  %v416_v39 = vld [vmem:[#allocation2 + $0xd8] sm:$0xff]  ;;  %v415_v41 = vld [vmem:[#allocation2 + $0xd0] sm:$0xff]  ;;  %v302_v42 = vld [vmem:[#allocation2 + $0x48] sm:$0xff] }
  0x15   :  { %1013 = vmatprep.subr.mxu0 %v308_v11  ;;  %1051 = vmatprep.subr.mxu1 %v420_v12  ;;  %v414_v43 = vld [vmem:[#allocation2 + $0xc8] sm:$0xff]  ;;  %v301_v44 = vld [vmem:[#allocation2 + $0x40] sm:$0xff]  ;;  %v300_v46 = vld [vmem:[#allocation2 + $0x38] sm:$0xff] }
  0x16   :  { %v413_v45 = vld [vmem:[#allocation2 + $0xc0] sm:$0xff]  ;;  %v412_v47 = vld [vmem:[#allocation2 + $0xb8] sm:$0xff]  ;;  %v299_v48 = vld [vmem:[#allocation2 + $0x30] sm:$0xff] }
  0x17   :  { %55 = vperm.xlu1 %1182, %v44_v7   ;;  %52 = vperm.xlu0 %1181, %v43_v8   ;;  %v411_v49 = vld [vmem:[#allocation2 + $0xb0] sm:$0xff]  ;;  %v298_v50 = vld [vmem:[#allocation2 + $0x28] sm:$0xff]  ;;  %v297_v52 = vld [vmem:[#allocation2 + $0x20] sm:$0xff] }
  0x18   :  { %v410_v51 = vld [vmem:[#allocation2 + $0xa8] sm:$0xff]  ;;  %v409_v53 = vld [vmem:[#allocation2 + $0xa0] sm:$0xff]  ;;  %v296_v54 = vld [vmem:[#allocation2 + $0x18] sm:$0xff] }
  0x19   :  { %v408_v55 = vld [vmem:[#allocation2 + $0x98] sm:$0xff]  ;;  %v295_v56 = vld [vmem:[#allocation2 + $0x10] sm:$0xff]  ;;  %v294_v58 = vld [vmem:[#allocation2 + $0x8] sm:$0xff] }
  0x1a   :  { %v407_v57 = vld [vmem:[#allocation2 + $0x90] sm:$0xff]  ;;  %v406_v59 = vld [vmem:[#allocation2 + $0x88] sm:$0xff]  ;;  %v293_v60 = vld [vmem:[#allocation2] sm:$0xff] }
  0x1b   :  { %83 = vperm.xlu1 %1182, %v72_v9   ;;  %80 = vperm.xlu0 %1181, %v71_v10   ;;  %v405_v61 = vld [vmem:[#allocation2 + $0x80] sm:$0xff]  ;;  %v538_v62 = vld [vmem:[#allocation2 + $0x178] sm:$0xff]  ;;  %v537_v3 = vld [vmem:[#allocation2 + $0x170] sm:$0xff] }
  0x1c   :  { %v536_v5 = vld [vmem:[#allocation2 + $0x168] sm:$0xff]  ;;  %v535_v7 = vld [vmem:[#allocation2 + $0x160] sm:$0xff]  ;;  %v534_v9 = vld [vmem:[#allocation2 + $0x158] sm:$0xff] }
  0x8a   :  { %v75_v15 = vpop.permute.xlu1 %74  ;;  %v47_v16 = vpop.permute.xlu0 %46 }
  0x8b   :  { %vm85_vm1 = vcmp.eq.s32.totalorder %v40_v14, %v75_v15  ;;  %vm57_vm2 = vcmp.eq.s32.totalorder %v40_v14, %v47_v16  ;;  %v530_v15 = vld [vmem:[#allocation2 + $0x138] sm:$0xff]  ;;  %v529_v16 = vld [vmem:[#allocation2 + $0x130] sm:$0xff] }
  0x8c   :  { %v869_v18 = vsel %vm57_vm2, 1.0, %v1213_v17  ;;  %v873_v19 = vsel %vm85_vm1, 1.0, %v1213_v17 }
  0x8d   :  { %997 = vmatprep.mubr.msk.f32.mxu0 %vm97_vm0, %v869_v18  ;;  %1007 = vmatprep.mubr.msk.f32.mxu1 %vm97_vm0, %v873_v19  ;;  %v528_v18 = vld [vmem:[#allocation2 + $0x128] sm:$0xff]  ;;  %v527_v19 = vld [vmem:[#allocation2 + $0x120] sm:$0xff] }
  0x8e   :  { %v78_v20 = vpop.permute.xlu1 %77  ;;  %v50_v21 = vpop.permute.xlu0 %49 }
  0x8f   :  { %vm86_vm3 = vcmp.eq.s32.totalorder %v40_v14, %v78_v20  ;;  %vm58_vm4 = vcmp.eq.s32.totalorder %v40_v14, %v50_v21  ;;  %v526_v20 = vld [vmem:[#allocation2 + $0x118] sm:$0xff]  ;;  %v525_v21 = vld [vmem:[#allocation2 + $0x110] sm:$0xff] }
  0x90   :  { %v874_v22 = vsel %vm86_vm3, 1.0, %v1213_v17  ;;  %v870_v23 = vsel %vm58_vm4, 1.0, %v1213_v17  ;;  %vm768_vm3 = vcmask 261120  }
  0x91   :  { %998 = vmatmul.mubr.msk.f32.vlgmr.msra.gmra.mxu0 %vm97_vm0, %v870_v23  ;;  %1008 = vmatmul.mubr.msk.f32.vlgmr.msra.gmra.mxu1 %vm97_vm0, %v874_v22  ;;  %v524_v22 = vld [vmem:[#allocation2 + $0x108] sm:$0xff]  ;;  %v523_v23 = vld [vmem:[#allocation2 + $0x100] sm:$0xff] }
  0x92   :  { %v56_v26 = vpop.permute.xlu1 %55  ;;  %v53_v27 = vpop.permute.xlu0 %52  ;;  %1014 = vmatpush3.msra.mxu0 %v308_v11  ;;  %1052 = vmatpush3.msra.mxu1 %v420_v12  ;;  %v533_v11 = vld [vmem:[#allocation2 + $0x150] sm:$0xff]  ;;  %v532_v12 = vld [vmem:[#allocation2 + $0x148] sm:$0xff] }
  0x93   :  { %vm60_vm5 = vcmp.eq.s32.totalorder %v40_v14, %v56_v26  ;;  %vm59_vm6 = vcmp.eq.s32.totalorder %v40_v14, %v53_v27  ;;  %1015 = vmatprep.subr.mxu0 %v307_v24  ;;  %1053 = vmatprep.subr.mxu1 %v419_v25  ;;  %v658_v26 = vld [vmem:[#allocation2 + $0x1e8] sm:$0xff]  ;;  %v657_v27 = vld [vmem:[#allocation2 + $0x1e0] sm:$0xff] }
  0x94   :  { %v872_v30 = vsel %vm60_vm5, 1.0, %v1213_v17  ;;  %v871_v31 = vsel %vm59_vm6, 1.0, %v1213_v17  ;;  %1016 = vmatpush3.msra.mxu0 %v307_v24  ;;  %1054 = vmatpush3.msra.mxu1 %v419_v25  ;;  %v660_v24 = vld [vmem:[#allocation2 + $0x1f8] sm:$0xff]  ;;  %v659_v25 = vld [vmem:[#allocation2 + $0x1f0] sm:$0xff] }
  0x95   :  { %1000 = vmatprep.mubr.msk.f32.mxu0 %vm97_vm0, %v871_v31  ;;  %1017 = vmatprep.subr.mxu0 %v306_v28  ;;  %v653_v31 = vld [vmem:[#allocation2 + $0x1c0] sm:$0xff] }
  0x96   :  { %v84_v34 = vpop.permute.xlu1 %83  ;;  %v81_v35 = vpop.permute.xlu0 %80  ;;  %1001 = vmatmul.mubr.msk.f32.gmra.mxu0 %vm97_vm0, %v872_v30  ;;  %1055 = vmatprep.subr.mxu1 %v418_v29  ;;  %v654_v30 = vld [vmem:[#allocation2 + $0x1c8] sm:$0xff] }
  0x97   :  { %vm88_vm7 = vcmp.eq.s32.totalorder %v40_v14, %v84_v34  ;;  %vm87_vm8 = vcmp.eq.s32.totalorder %v40_v14, %v81_v35  ;;  %1018 = vmatpush3.msra.mxu0 %v306_v28  ;;  %1056 = vmatpush3.msra.mxu1 %v418_v29  ;;  %v531_v14 = vld [vmem:[#allocation2 + $0x140] sm:$0xff]  ;;  %v656_v28 = vld [vmem:[#allocation2 + $0x1d8] sm:$0xff]  ;;  %v655_v29 = vld [vmem:[#allocation2 + $0x1d0] sm:$0xff] }
  0x98   :  { %v876_v37 = vsel %vm88_vm7, 1.0, %v1213_v17  ;;  %v875_v38 = vsel %vm87_vm8, 1.0, %v1213_v17  ;;  %1019 = vmatprep.subr.mxu0 %v305_v32  ;;  %1057 = vmatprep.subr.mxu1 %v417_v33  ;;  %v650_v34 = vld [vmem:[#allocation2 + $0x1a8] sm:$0xff]  ;;  %v649_v35 = vld [vmem:[#allocation2 + $0x1a0] sm:$0xff] }
  0x99   :  { %1010 = vmatprep.mubr.msk.f32.mxu1 %vm97_vm0, %v875_v38  ;;  %1020 = vmatpush3.msra.mxu0 %v305_v32  ;;  %v652_v32 = vld [vmem:[#allocation2 + $0x1b8] sm:$0xff] }
  0x9a   :  { %1011 = vmatmul.mubr.msk.f32.gmra.mxu1 %vm97_vm0, %v876_v37  ;;  %1021 = vmatprep.subr.mxu0 %v304_v36 }
  0x9b   :  { %1058 = vmatpush3.msra.mxu1 %v417_v33  ;;  %1022 = vmatpush3.msra.mxu0 %v304_v36  ;;  %v651_v33 = vld [vmem:[#allocation2 + $0x1b0] sm:$0xff]  ;;  %v885_v36 = vld [vmem:[%s1329_s5] ss:$0 sm:$0xff] }
  0x9c   :  { %1059 = vmatprep.subr.mxu1 %v416_v39  ;;  %1023 = vmatprep.subr.mxu0 %v303_v40 }
  0x9d   :  { %1060 = vmatpush3.msra.mxu1 %v416_v39  ;;  %1024 = vmatpush3.msra.mxu0 %v303_v40 }
  0x9e   :  { %1061 = vmatprep.subr.mxu1 %v415_v41  ;;  %1025 = vmatprep.subr.mxu0 %v302_v42 }
  0x9f   :  { %1062 = vmatpush3.msra.mxu1 %v415_v41  ;;  %1026 = vmatpush3.msra.mxu0 %v302_v42 }
  0xa0   :  { %1063 = vmatprep.subr.mxu1 %v414_v43  ;;  %1027 = vmatprep.subr.mxu0 %v301_v44 }
  0xa1   :  { %1064 = vmatpush3.msra.mxu1 %v414_v43  ;;  %1028 = vmatpush3.msra.mxu0 %v301_v44 }
  0xa2   :  { %1065 = vmatprep.subr.mxu1 %v413_v45  ;;  %1029 = vmatprep.subr.mxu0 %v300_v46 }
  0xa3   :  { %1066 = vmatpush3.msra.mxu1 %v413_v45  ;;  %1030 = vmatpush3.msra.mxu0 %v300_v46 }
  0xa4   :  { %1067 = vmatprep.subr.mxu1 %v412_v47  ;;  %1031 = vmatprep.subr.mxu0 %v299_v48 }
  0xa5   :  { %1068 = vmatpush3.msra.mxu1 %v412_v47  ;;  %1032 = vmatpush3.msra.mxu0 %v299_v48 }
  0xa6   :  { %1069 = vmatprep.subr.mxu1 %v411_v49  ;;  %1033 = vmatprep.subr.mxu0 %v298_v50 }
  0xa7   :  { %1070 = vmatpush3.msra.mxu1 %v411_v49  ;;  %1034 = vmatpush3.msra.mxu0 %v298_v50 }
  0xa8   :  { %1071 = vmatprep.subr.mxu1 %v410_v51  ;;  %1035 = vmatprep.subr.mxu0 %v297_v52 }
  0xa9   :  { %1072 = vmatpush3.msra.mxu1 %v410_v51  ;;  %1036 = vmatpush3.msra.mxu0 %v297_v52 }
  0xaa   :  { %1073 = vmatprep.subr.mxu1 %v409_v53  ;;  %1037 = vmatprep.subr.mxu0 %v296_v54 }
  0xab   :  { %1074 = vmatpush3.msra.mxu1 %v409_v53  ;;  %1038 = vmatpush3.msra.mxu0 %v296_v54 }
  0xac   :  { %1075 = vmatprep.subr.mxu1 %v408_v55  ;;  %1039 = vmatprep.subr.mxu0 %v295_v56 }
  0xad   :  { %1076 = vmatpush3.msra.mxu1 %v408_v55  ;;  %1040 = vmatpush3.msra.mxu0 %v295_v56 }
  0xae   :  { %1077 = vmatprep.subr.mxu1 %v407_v57  ;;  %1041 = vmatprep.subr.mxu0 %v294_v58 }
  0xaf   :  { %1078 = vmatpush3.msra.mxu1 %v407_v57  ;;  %1042 = vmatpush3.msra.mxu0 %v294_v58 }
  0xb0   :  { %1079 = vmatprep.subr.mxu1 %v406_v59  ;;  %1043 = vmatprep.subr.mxu0 %v293_v60 }
  0xb1   :  { %1080 = vmatpush3.msra.mxu1 %v406_v59  ;;  %1044 = vmatpush3.msra.mxu0 %v293_v60 }
  0xb2   :  { %1081 = vmatprep.subr.mxu1 %v405_v61  ;;  %1089 = vmatprep.subr.mxu0 %v538_v62 }
  0xb3   :  { %1082 = vmatpush3.msra.mxu1 %v405_v61  ;;  %v648_v61 = vld [vmem:[#allocation2 + $0x198] sm:$0xff] }
  0xb4   :  { %1127 = vmatprep.subr.mxu1 %v660_v24 }
 0x151   :  { %v999_v63 = vpop.f32.mrf.mxu0  ;;  %v1009_v0 = vpop.f32.mrf.mxu1 }
 0x153   :  { %v176_v1 = vpop.f32.mrf.mxu0  ;;  %v273_v2 = vpop.f32.mrf.mxu1 }
 0x154   :  { %1045 = vmatprep.mubr.f32.mxu0 %v176_v1  ;;  %1083 = vmatprep.mubr.f32.mxu1 %v273_v2  ;;  %v887_v1 = vld [vmem:[%s1329_s5 + $0x1] ss:$0 sm:$0xff] }
 0x155   :  { %1046 = vmatmul.mubr.f32.vlgmr.msra.gmra.mxu0 %v999_v63  ;;  %1084 = vmatmul.mubr.f32.vlgmr.msra.gmra.mxu1 %v1009_v0  ;;  %v646_v63 = vld [vmem:[#allocation2 + $0x188] sm:$0xff]  ;;  %v645_v0 = vld [vmem:[#allocation2 + $0x180] sm:$0xff] }
 0x156   :  { %v1002_v4 = vpop.f32.mrf.mxu0  ;;  %1090 = vmatpush3.msra.mxu0 %v538_v62  ;;  %1128 = vmatpush3.msra.mxu1 %v660_v24  ;;  %v647_v62 = vld [vmem:[#allocation2 + $0x190] sm:$0xff] }
 0x157   :  { %1091 = vmatprep.subr.mxu0 %v537_v3  ;;  %1129 = vmatprep.subr.mxu1 %v659_v25 }
 0x158   :  { %v186_v6 = vpop.f32.mrf.mxu0  ;;  %1092 = vmatpush3.msra.mxu0 %v537_v3  ;;  %1130 = vmatpush3.msra.mxu1 %v659_v25 }
 0x159   :  { %1048 = vmatprep.mubr.f32.mxu0 %v186_v6  ;;  %1093 = vmatprep.subr.mxu0 %v536_v5 }
 0x15a   :  { %v1012_v8 = vpop.f32.mrf.mxu1  ;;  %1049 = vmatmul.mubr.f32.gmra.mxu0 %v1002_v4  ;;  %1131 = vmatprep.subr.mxu1 %v658_v26 }
 0x15b   :  { %1094 = vmatpush3.msra.mxu0 %v536_v5  ;;  %1132 = vmatpush3.msra.mxu1 %v658_v26 }
 0x15c   :  { %v283_v10 = vpop.f32.mrf.mxu1  ;;  %1095 = vmatprep.subr.mxu0 %v535_v7  ;;  %1133 = vmatprep.subr.mxu1 %v657_v27 }
 0x15d   :  { %1086 = vmatprep.mubr.f32.mxu1 %v283_v10  ;;  %1096 = vmatpush3.msra.mxu0 %v535_v7 }
 0x15e   :  { %1087 = vmatmul.mubr.f32.gmra.mxu1 %v1012_v8  ;;  %1097 = vmatprep.subr.mxu0 %v534_v9 }
 0x15f   :  { %1098 = vmatpush3.msra.mxu0 %v534_v9  ;;  %1134 = vmatpush3.msra.mxu1 %v657_v27 }
 0x160   :  { %1099 = vmatprep.subr.mxu0 %v533_v11  ;;  %1135 = vmatprep.subr.mxu1 %v656_v28 }
 0x161   :  { %1100 = vmatpush3.msra.mxu0 %v533_v11  ;;  %1136 = vmatpush3.msra.mxu1 %v656_v28  ;;  %v889_v28 = vld [vmem:[%s1329_s5 + $0x2] ss:$0 sm:$0xff] }
 0x162   :  { %1101 = vmatprep.subr.mxu0 %v532_v12  ;;  %1137 = vmatprep.subr.mxu1 %v655_v29 }
 0x163   :  { %1102 = vmatpush3.msra.mxu0 %v532_v12  ;;  %1138 = vmatpush3.msra.mxu1 %v655_v29 }
 0x164   :  { %1103 = vmatprep.subr.mxu0 %v531_v14  ;;  %1139 = vmatprep.subr.mxu1 %v654_v30 }
 0x165   :  { %1104 = vmatpush3.msra.mxu0 %v531_v14  ;;  %1140 = vmatpush3.msra.mxu1 %v654_v30 }
 0x166   :  { %1105 = vmatprep.subr.mxu0 %v530_v15  ;;  %1141 = vmatprep.subr.mxu1 %v653_v31 }
 0x167   :  { %1106 = vmatpush3.msra.mxu0 %v530_v15  ;;  %1142 = vmatpush3.msra.mxu1 %v653_v31 }
 0x168   :  { %1107 = vmatprep.subr.mxu0 %v529_v16  ;;  %1143 = vmatprep.subr.mxu1 %v652_v32 }
 0x169   :  { %1108 = vmatpush3.msra.mxu0 %v529_v16  ;;  %1144 = vmatpush3.msra.mxu1 %v652_v32 }
 0x16a   :  { %1109 = vmatprep.subr.mxu0 %v528_v18  ;;  %1145 = vmatprep.subr.mxu1 %v651_v33 }
 0x16b   :  { %1110 = vmatpush3.msra.mxu0 %v528_v18  ;;  %1146 = vmatpush3.msra.mxu1 %v651_v33 }
 0x16c   :  { %1111 = vmatprep.subr.mxu0 %v527_v19  ;;  %1147 = vmatprep.subr.mxu1 %v650_v34 }
 0x16d   :  { %1112 = vmatpush3.msra.mxu0 %v527_v19  ;;  %1148 = vmatpush3.msra.mxu1 %v650_v34 }
 0x16e   :  { %1113 = vmatprep.subr.mxu0 %v526_v20  ;;  %1149 = vmatprep.subr.mxu1 %v649_v35 }
 0x16f   :  { %1114 = vmatpush3.msra.mxu0 %v526_v20  ;;  %1150 = vmatpush3.msra.mxu1 %v649_v35  ;;  %v755_v20 = vshrl.u32 %v39_v13, 7 }
 0x170   :  { %1115 = vmatprep.subr.mxu0 %v525_v21  ;;  %1151 = vmatprep.subr.mxu1 %v648_v61 }
 0x171   :  { %1116 = vmatpush3.msra.mxu0 %v525_v21  ;;  %1152 = vmatpush3.msra.mxu1 %v648_v61  ;;  %v756_v21 = vadd.s32 8, %v755_v20 }
 0x172   :  { %1117 = vmatprep.subr.mxu0 %v524_v22  ;;  %1153 = vmatprep.subr.mxu1 %v647_v62 }
 0x173   :  { %1118 = vmatpush3.msra.mxu0 %v524_v22  ;;  %1154 = vmatpush3.msra.mxu1 %v647_v62  ;;  %v890_v22 = vld [vmem:[%s1326_s2] ss:$0 sm:$0xff] }
 0x174   :  { %1119 = vmatprep.subr.mxu0 %v523_v23  ;;  %1155 = vmatprep.subr.mxu1 %v646_v63  ;;  %vm762_vm1 = vcmp.eq.s32.totalorder %v755_v20, %v890_v22  ;;  %vm763_vm2 = vcmp.eq.s32.totalorder %v756_v21, %v890_v22 }
 0x175   :  { %1120 = vmatpush3.msra.mxu0 %v523_v23  ;;  %1156 = vmatpush3.msra.mxu1 %v646_v63  ;;  %v891_v23 = vsel %vm762_vm1, 1.0, %v1213_v17  ;;  %v892_v24 = vsel %vm763_vm2, 1.0, %v1213_v17 }
 0x176   :  { %1157 = vmatprep.subr.mxu1 %v645_v0  ;;  %v853_v25 = vsel %vm768_vm3, %v892_v24, 0.0  ;;  %v850_v26 = vsel %vm768_vm3, %v891_v23, 0.0 }
 0x177   :  { %1158 = vmatpush3.msra.mxu1 %v645_v0  ;;  %854 = vadd.xlane.f32.xlu1 %v853_v25 }
 0x178   :  { %851 = vadd.xlane.f32.xlu0 %v850_v26 }
 0x200   :  { %v855_v34 = vpop.xlane.xlu1 %854 }
 0x201   :  { %v852_v35 = vpop.xlane.xlu0 %851 }
 0x215   :  { %v1047_v37 = vpop.f32.mrf.mxu0  ;;  %v1085_v38 = vpop.f32.mrf.mxu1 }
 0x216   :  { %v401_v39 = vadd.f32 %v1047_v37, %v885_v36  ;;  %v856_v37 = vmax.f32 %v852_v35, 1.0 }
 0x217   :  { %v375_v40 = vpop.f32.mrf.mxu0  ;;  %v487_v43 = vpop.f32.mrf.mxu1 }
 0x218   :  { %v507_v41 = vadd.f32 %v1085_v38, %v401_v39  ;;  %v400_v42 = vadd.f32 %v885_v36, %v375_v40 }
 0x21a   :  { %v506_v44 = vadd.f32 %v487_v43, %v400_v42  ;;  %v1050_v45 = vpop.f32.mrf.mxu0  ;;  %v515_v46 = vmul.f32 0.01, %v507_v41  ;;  %vm511_vm9 = vcmp.ge.f32.partialorder %v507_v41, 0.0 }
 0x21b   :  { %v403_v49 = vadd.f32 %v1050_v45, %v885_v36 }
 0x21c   :  { %v514_v47 = vmul.f32 0.01, %v506_v44  ;;  %v385_v48 = vpop.f32.mrf.mxu0  ;;  %vm510_vm10 = vcmp.ge.f32.partialorder %v506_v44, 0.0  ;;  %v519_v52 = vsel %vm511_vm9, %v507_v41, %v515_v46 }
 0x21d   :  { %v402_v53 = vadd.f32 %v885_v36, %v385_v48  ;;  %v857_v36 = vmax.f32 %v855_v34, 1.0 }
 0x21e   :  { %v1088_v50 = vpop.f32.mrf.mxu1  ;;  %v518_v51 = vsel %vm510_vm10, %v506_v44, %v514_v47 }
 0x21f   :  { %v509_v54 = vadd.f32 %v1088_v50, %v403_v49  ;;  %1121 = vmatprep.mubr.f32.mxu0 %v518_v51  ;;  %1183 = vrcp.f32 %v857_v36 }
 0x220   :  { %v497_v55 = vpop.f32.mrf.mxu1  ;;  %1122 = vmatmul.mubr.f32.vlgmr.msra.gmra.mxu0 %v519_v52  ;;  %1185 = vrcp.f32 %v856_v37 }
 0x221   :  { %v508_v56 = vadd.f32 %v497_v55, %v402_v53  ;;  %v517_v57 = vmul.f32 0.01, %v509_v54  ;;  %vm513_vm12 = vcmp.ge.f32.partialorder %v509_v54, 0.0 }
 0x223   :  { %v516_v58 = vmul.f32 0.01, %v508_v56  ;;  %vm512_vm11 = vcmp.ge.f32.partialorder %v508_v56, 0.0  ;;  %v521_v60 = vsel %vm513_vm12, %v509_v54, %v517_v57 }
 0x225   :  { %v520_v59 = vsel %vm512_vm11, %v508_v56, %v516_v58 }
 0x226   :  { %1124 = vmatprep.mubr.f32.mxu0 %v520_v59 }
 0x227   :  { %1125 = vmatmul.mubr.f32.gmra.mxu0 %v521_v60 }
 0x228   :  { %1173 = vmatprep.mubr.msk.f32.mxu0 %vm768_vm3, %v891_v23 }
 0x22c   :  { %v1184_v38 = vpop.eup %1183 }
 0x22d   :  { %v1186_v39 = vpop.eup %1185 }
 0x2e0   :  { %v1123_v2 = vpop.f32.mrf.mxu0 }
 0x2e1   :  { %v619_v3 = vadd.f32 %v1123_v2, %v887_v1 }
 0x2e2   :  { %v613_v4 = vpop.f32.mrf.mxu0 }
 0x2e3   :  { %v614_v5 = vadd.f32 %v887_v1, %v613_v4  ;;  %v637_v6 = vmul.f32 0.01, %v619_v3  ;;  %vm633_vm13 = vcmp.ge.f32.partialorder %v619_v3, 0.0 }
 0x2e5   :  { %v636_v7 = vmul.f32 0.01, %v614_v5  ;;  %vm632_vm14 = vcmp.ge.f32.partialorder %v614_v5, 0.0  ;;  %v641_v10 = vsel %vm633_vm13, %v619_v3, %v637_v6 }
 0x2e7   :  { %v1126_v8 = vpop.f32.mrf.mxu0  ;;  %v640_v9 = vsel %vm632_vm14, %v614_v5, %v636_v7 }
 0x2e8   :  { %v629_v11 = vadd.f32 %v1126_v8, %v887_v1  ;;  %1159 = vmatprep.mubr.f32.mxu1 %v640_v9 }
 0x2e9   :  { %v623_v12 = vpop.f32.mrf.mxu0  ;;  %1160 = vmatmul.mubr.f32.vlgmr.msra.gmra.mxu1 %v641_v10 }
 0x2ea   :  { %v624_v14 = vadd.f32 %v887_v1, %v623_v12  ;;  %v639_v15 = vmul.f32 0.01, %v629_v11  ;;  %vm635_vm0 = vcmp.ge.f32.partialorder %v629_v11, 0.0 }
 0x2ec   :  { %v638_v16 = vmul.f32 0.01, %v624_v14  ;;  %vm634_vm15 = vcmp.ge.f32.partialorder %v624_v14, 0.0  ;;  %v643_v19 = vsel %vm635_vm0, %v629_v11, %v639_v15 }
 0x2ee   :  { %v642_v18 = vsel %vm634_vm15, %v624_v14, %v638_v16 }
 0x2ef   :  { %1162 = vmatprep.mubr.f32.mxu1 %v642_v18 }
 0x2f0   :  { %1163 = vmatmul.mubr.f32.gmra.mxu1 %v643_v19 }
 0x3a9   :  { %v1161_v13 = vpop.f32.mrf.mxu1 }
 0x3aa   :  { %v741_v17 = vadd.f32 %v1161_v13, %v889_v28 }
 0x3ab   :  { %v735_v27 = vpop.f32.mrf.mxu1 }
 0x3ac   :  { %v736_v33 = vadd.f32 %v889_v28, %v735_v27 }
 0x3b0   :  { %v1164_v29 = vpop.f32.mrf.mxu1 }
 0x3b1   :  { %v751_v30 = vadd.f32 %v1164_v29, %v889_v28 }
 0x3b2   :  { %v745_v31 = vpop.f32.mrf.mxu1 }
 0x3b3   :  { %v746_v32 = vadd.f32 %v889_v28, %v745_v31  ;;  %1165 = vmatprep.subr.mxu0 %v751_v30 }
 0x3b4   :  { %1166 = vmatpush3.msra.mxu0 %v751_v30 }
 0x3b5   :  { %1167 = vmatprep.subr.mxu0 %v746_v32 }
 0x3b6   :  { %1168 = vmatpush3.msra.mxu0 %v746_v32 }
 0x3b7   :  { %1169 = vmatprep.subr.mxu0 %v741_v17 }
 0x3b8   :  { %1170 = vmatpush3.msra.mxu0 %v741_v17 }
 0x3b9   :  { %1171 = vmatprep.subr.mxu0 %v736_v33 }
 0x3ba   :  { %1172 = vmatpush3.msra.mxu0 %v736_v33 }
 0x3bb   :  { %1174 = vmatmul.mubr.msk.f32.vlgmr.msra.gmra.mxu0 %vm768_vm3, %v892_v24 }
 0x47b   :  { %v1175_v40 = vpop.f32.mrf.mxu0 }
 0x47c   :  { %v861_v41 = vmul.f32 %v1184_v38, %v1175_v40 }
 0x47d   :  { %v841_v42 = vpop.f32.mrf.mxu0 }
 0x47e   :  { %863 = vst [vmem:[%s1330_s6 + $0x8] sm:$0xff] %v861_v41  ;;  %v859_v43 = vmul.f32 %v1186_v39, %v841_v42 }
 0x480   :  { %862 = vst [vmem:[%s1330_s6] sm:$0xff] %v859_v43 }
 0x481   :  { %868 = vsyncpa [#allocation3], 1 }

// kernel: qgcnn_forward.7
= control target key start
LH: loop header
LB: loop body
LE: loop exit
PB: predicated region body
PF: predicated region fallthrough
CT: control target
= control target key end

     0   :  { %v2075_v2 = vmov 0   ;;  %s2606_s0 = inlined_call_operand.vmem [shape: s32[32,1], index: 0, kind: input, shape index: {}]   ;;  %s2607_s1 = inlined_call_operand.vmem [shape: s32[32,1], index: 1, kind: input, shape index: {}]   ;;  %s2608_s2 = inlined_call_operand.vmem [shape: f32[16,128], index: 2, kind: input, shape index: {}]   ;;  %s2609_s3 = inlined_call_operand.vmem [shape: f32[32,128], index: 3, kind: input, shape index: {}]   ;;  %s2610_s4 = inlined_call_operand.vmem [shape: f32[4,128,128], index: 4, kind: input, shape index: {}]   ;;  %s2611_s5 = inlined_call_operand.vmem [shape: f32[3,1,128], index: 5, kind: input, shape index: {}]   ;;  %s2612_s6 = inlined_call_operand.vmem [shape: f32[4,128,128], index: 6, kind: input, shape index: {}]   ;;  %s2613_s7 = inlined_call_operand.vmem [shape: f32[3,1,128], index: 7, kind: input, shape index: {}]   ;;  %s2614_s8 = inlined_call_operand.vmem [shape: f32[32,128], index: 8, kind: output, shape index: {0}]   ;;  %s2615_s9 = inlined_call_operand.hbm [shape: f32[1,1], index: 9, kind: output, shape index: {1}]  }
   0x1   :  { %v64_v0 = vld [vmem:[%s2607_s1] sm:$0xff]  ;;  %2052 = vset.pattern.permute.xlu1 %v2075_v2  ;;  %2051 = vset.pattern.permute.xlu0 %v2075_v2  ;;  %v65_v3 = vld [vmem:[%s2607_s1 + $0x8] sm:$0xff] }
   0x2   :  { %v36_v1 = vld [vmem:[%s2606_s0] sm:$0xff]  ;;  %69 = vperm.xlu1 %2052, %v64_v0   ;;  %v33_v4 = vld [vmem:[%s2608_s2 + $0x8] sm:$0xff] }
   0x3   :  { %41 = vperm.xlu0 %2051, %v36_v1   ;;  %v37_v5 = vld [vmem:[%s2606_s0 + $0x8] sm:$0xff]  ;;  %1698 = vmatprep.subr.mxu0 %v33_v4  ;;  %v32_v6 = vld [vmem:[%s2608_s2] sm:$0xff] }
   0x4   :  { %1708 = vmatprep.subr.mxu1 %v33_v4 }
   0x5   :  { %15 = vsyncpa [#allocation3], 0  ;;  %1699 = vmatpush3.msra.mxu0 %v33_v4  ;;  %1709 = vmatpush3.msra.mxu1 %v33_v4  ;;  %v39_v7 = vld [vmem:[%s2606_s0 + $0x18] sm:$0xff]  ;;  %v38_v8 = vld [vmem:[%s2606_s0 + $0x10] sm:$0xff]  ;;  %v34_v13 = vlaneseq  ;;  %vm92_vm0 = vcmask 130048   ;;  %v2076_v17 = vmov 0.0  }
   0x6   :  { %1700 = vmatprep.subr.mxu0 %v32_v6  ;;  %1710 = vmatprep.subr.mxu1 %v32_v6  ;;  %v67_v9 = vld [vmem:[%s2607_s1 + $0x18] sm:$0xff]  ;;  %v66_v10 = vld [vmem:[%s2607_s1 + $0x10] sm:$0xff]  ;;  %v301_v28 = vld [vmem:[%s2610_s4 + $0x68] sm:$0xff] }
   0x7   :  { %72 = vperm.xlu1 %2052, %v65_v3   ;;  %44 = vperm.xlu0 %2051, %v37_v5   ;;  %v303_v11 = vld [vmem:[%s2610_s4 + $0x78] sm:$0xff]  ;;  %v35_v14 = vand.u32 127, %v34_v13  ;;  %v302_v24 = vld [vmem:[%s2610_s4 + $0x70] sm:$0xff]  ;;  %v1418_v29 = vld [vmem:[%s2610_s4 + $0xe8] sm:$0xff] }
   0x8   :  { %1701 = vmatpush3.msra.mxu0 %v32_v6  ;;  %1711 = vmatpush3.msra.mxu1 %v32_v6  ;;  %v1420_v12 = vld [vmem:[%s2610_s4 + $0xf8] sm:$0xff]  ;;  %v1419_v25 = vld [vmem:[%s2610_s4 + $0xf0] sm:$0xff]  ;;  %v300_v32 = vld [vmem:[%s2610_s4 + $0x60] sm:$0xff] }
   0x9   :  { %1718 = vmatprep.subr.mxu0 %v303_v11  ;;  %1762 = vmatprep.subr.mxu1 %v1420_v12  ;;  %v1417_v33 = vld [vmem:[%s2610_s4 + $0xe0] sm:$0xff]  ;;  %v299_v36 = vld [vmem:[%s2610_s4 + $0x58] sm:$0xff]  ;;  %v298_v40 = vld [vmem:[%s2610_s4 + $0x50] sm:$0xff] }
   0xa   :  { %v1416_v39 = vld [vmem:[%s2610_s4 + $0xd8] sm:$0xff]  ;;  %v1415_v41 = vld [vmem:[%s2610_s4 + $0xd0] sm:$0xff]  ;;  %v297_v42 = vld [vmem:[%s2610_s4 + $0x48] sm:$0xff] }
   0xb   :  { %50 = vperm.xlu1 %2052, %v39_v7   ;;  %47 = vperm.xlu0 %2051, %v38_v8   ;;  %v1414_v43 = vld [vmem:[%s2610_s4 + $0xc8] sm:$0xff]  ;;  %v296_v44 = vld [vmem:[%s2610_s4 + $0x40] sm:$0xff]  ;;  %v295_v46 = vld [vmem:[%s2610_s4 + $0x38] sm:$0xff] }
   0xc   :  { %v1413_v45 = vld [vmem:[%s2610_s4 + $0xc0] sm:$0xff]  ;;  %v1412_v47 = vld [vmem:[%s2610_s4 + $0xb8] sm:$0xff]  ;;  %v294_v48 = vld [vmem:[%s2610_s4 + $0x30] sm:$0xff] }
   0xd   :  { %v1411_v49 = vld [vmem:[%s2610_s4 + $0xb0] sm:$0xff]  ;;  %v293_v50 = vld [vmem:[%s2610_s4 + $0x28] sm:$0xff]  ;;  %v292_v52 = vld [vmem:[%s2610_s4 + $0x20] sm:$0xff] }
   0xe   :  { %v1410_v51 = vld [vmem:[%s2610_s4 + $0xa8] sm:$0xff]  ;;  %v1409_v53 = vld [vmem:[%s2610_s4 + $0xa0] sm:$0xff]  ;;  %v291_v54 = vld [vmem:[%s2610_s4 + $0x18] sm:$0xff] }
   0xf   :  { %78 = vperm.xlu1 %2052, %v67_v9   ;;  %75 = vperm.xlu0 %2051, %v66_v10   ;;  %v1408_v55 = vld [vmem:[%s2610_s4 + $0x98] sm:$0xff]  ;;  %v290_v56 = vld [vmem:[%s2610_s4 + $0x10] sm:$0xff]  ;;  %v289_v58 = vld [vmem:[%s2610_s4 + $0x8] sm:$0xff] }
  0x10   :  { %v1407_v57 = vld [vmem:[%s2610_s4 + $0x90] sm:$0xff]  ;;  %v1406_v59 = vld [vmem:[%s2610_s4 + $0x88] sm:$0xff]  ;;  %v288_v60 = vld [vmem:[%s2610_s4] sm:$0xff] }
  0x11   :  { %v1405_v61 = vld [vmem:[%s2610_s4 + $0x80] sm:$0xff]  ;;  %v1436_v62 = vld [vmem:[%s2610_s4 + $0x178] sm:$0xff]  ;;  %v1435_v3 = vld [vmem:[%s2610_s4 + $0x170] sm:$0xff] }
  0x12   :  { %v1434_v5 = vld [vmem:[%s2610_s4 + $0x168] sm:$0xff]  ;;  %v1433_v7 = vld [vmem:[%s2610_s4 + $0x160] sm:$0xff]  ;;  %v1432_v10 = vld [vmem:[%s2610_s4 + $0x158] sm:$0xff] }
  0x13   :  { %v1429_v13 = vld [vmem:[%s2610_s4 + $0x140] sm:$0xff] }
  0x7d   :  { %v70_v15 = vpop.permute.xlu1 %69 }
  0x7e   :  { %v42_v16 = vpop.permute.xlu0 %41  ;;  %vm80_vm1 = vcmp.eq.s32.totalorder %v35_v14, %v70_v15  ;;  %v1427_v15 = vld [vmem:[%s2610_s4 + $0x130] sm:$0xff] }
  0x7f   :  { %vm52_vm2 = vcmp.eq.s32.totalorder %v35_v14, %v42_v16  ;;  %v1392_v19 = vsel %vm80_vm1, 1.0, %v2076_v17  ;;  %v1426_v16 = vld [vmem:[%s2610_s4 + $0x128] sm:$0xff] }
  0x80   :  { %v1388_v18 = vsel %vm52_vm2, 1.0, %v2076_v17  ;;  %1712 = vmatprep.mubr.msk.f32.mxu1 %vm92_vm0, %v1392_v19  ;;  %v1424_v19 = vld [vmem:[%s2610_s4 + $0x118] sm:$0xff] }
  0x81   :  { %1702 = vmatprep.mubr.msk.f32.mxu0 %vm92_vm0, %v1388_v18  ;;  %v1425_v18 = vld [vmem:[%s2610_s4 + $0x120] sm:$0xff] }
  0x82   :  { %v73_v20 = vpop.permute.xlu1 %72  ;;  %v45_v21 = vpop.permute.xlu0 %44 }
  0x83   :  { %vm81_vm3 = vcmp.eq.s32.totalorder %v35_v14, %v73_v20  ;;  %vm53_vm4 = vcmp.eq.s32.totalorder %v35_v14, %v45_v21  ;;  %v1423_v20 = vld [vmem:[%s2610_s4 + $0x110] sm:$0xff]  ;;  %v1422_v21 = vld [vmem:[%s2610_s4 + $0x108] sm:$0xff] }
  0x84   :  { %v1393_v22 = vsel %vm81_vm3, 1.0, %v2076_v17  ;;  %v1389_v23 = vsel %vm53_vm4, 1.0, %v2076_v17 }
  0x85   :  { %1703 = vmatmul.mubr.msk.f32.vlgmr.msra.gmra.mxu0 %vm92_vm0, %v1389_v23  ;;  %1713 = vmatmul.mubr.msk.f32.vlgmr.msra.gmra.mxu1 %vm92_vm0, %v1393_v22  ;;  %v1421_v22 = vld [vmem:[%s2610_s4 + $0x100] sm:$0xff]  ;;  %v1454_v23 = vld [vmem:[%s2610_s4 + $0x1f8] sm:$0xff] }
  0x86   :  { %v51_v26 = vpop.permute.xlu1 %50  ;;  %v48_v27 = vpop.permute.xlu0 %47  ;;  %1719 = vmatpush3.msra.mxu0 %v303_v11  ;;  %1763 = vmatpush3.msra.mxu1 %v1420_v12  ;;  %v1431_v11 = vld [vmem:[%s2610_s4 + $0x150] sm:$0xff]  ;;  %v1430_v12 = vld [vmem:[%s2610_s4 + $0x148] sm:$0xff] }
  0x87   :  { %vm55_vm5 = vcmp.eq.s32.totalorder %v35_v14, %v51_v26  ;;  %vm54_vm6 = vcmp.eq.s32.totalorder %v35_v14, %v48_v27  ;;  %1720 = vmatprep.subr.mxu0 %v302_v24  ;;  %1764 = vmatprep.subr.mxu1 %v1419_v25  ;;  %v1451_v26 = vld [vmem:[%s2610_s4 + $0x1e0] sm:$0xff]  ;;  %v1450_v27 = vld [vmem:[%s2610_s4 + $0x1d8] sm:$0xff] }
  0x88   :  { %v1391_v30 = vsel %vm55_vm5, 1.0, %v2076_v17  ;;  %v1390_v31 = vsel %vm54_vm6, 1.0, %v2076_v17  ;;  %1721 = vmatpush3.msra.mxu0 %v302_v24  ;;  %1765 = vmatpush3.msra.mxu1 %v1419_v25  ;;  %v1453_v24 = vld [vmem:[%s2610_s4 + $0x1f0] sm:$0xff]  ;;  %v1452_v25 = vld [vmem:[%s2610_s4 + $0x1e8] sm:$0xff] }
  0x89   :  { %1705 = vmatprep.mubr.msk.f32.mxu0 %vm92_vm0, %v1390_v31  ;;  %1722 = vmatprep.subr.mxu0 %v301_v28  ;;  %v1446_v31 = vld [vmem:[%s2610_s4 + $0x1b8] sm:$0xff] }
  0x8a   :  { %v79_v34 = vpop.permute.xlu1 %78  ;;  %v76_v35 = vpop.permute.xlu0 %75  ;;  %1706 = vmatmul.mubr.msk.f32.gmra.mxu0 %vm92_vm0, %v1391_v30  ;;  %1766 = vmatprep.subr.mxu1 %v1418_v29  ;;  %v1447_v30 = vld [vmem:[%s2610_s4 + $0x1c0] sm:$0xff] }
  0x8b   :  { %vm83_vm7 = vcmp.eq.s32.totalorder %v35_v14, %v79_v34  ;;  %vm82_vm8 = vcmp.eq.s32.totalorder %v35_v14, %v76_v35  ;;  %1723 = vmatpush3.msra.mxu0 %v301_v28  ;;  %1767 = vmatpush3.msra.mxu1 %v1418_v29  ;;  %v1428_v14 = vld [vmem:[%s2610_s4 + $0x138] sm:$0xff]  ;;  %v1449_v28 = vld [vmem:[%s2610_s4 + $0x1d0] sm:$0xff]  ;;  %v1448_v29 = vld [vmem:[%s2610_s4 + $0x1c8] sm:$0xff] }
  0x8c   :  { %v1395_v37 = vsel %vm83_vm7, 1.0, %v2076_v17  ;;  %v1394_v38 = vsel %vm82_vm8, 1.0, %v2076_v17  ;;  %1724 = vmatprep.subr.mxu0 %v300_v32  ;;  %1768 = vmatprep.subr.mxu1 %v1417_v33  ;;  %v1443_v34 = vld [vmem:[%s2610_s4 + $0x1a0] sm:$0xff] }
  0x8d   :  { %1715 = vmatprep.mubr.msk.f32.mxu1 %vm92_vm0, %v1394_v38  ;;  %1725 = vmatpush3.msra.mxu0 %v300_v32  ;;  %v1445_v32 = vld [vmem:[%s2610_s4 + $0x1b0] sm:$0xff]  ;;  %v1404_v35 = vld [vmem:[%s2611_s5] ss:$0 sm:$0xff] }
  0x8e   :  { %1716 = vmatmul.mubr.msk.f32.gmra.mxu1 %vm92_vm0, %v1395_v37  ;;  %1726 = vmatprep.subr.mxu0 %v299_v36 }
  0x8f   :  { %1769 = vmatpush3.msra.mxu1 %v1417_v33  ;;  %1727 = vmatpush3.msra.mxu0 %v299_v36  ;;  %v1444_v33 = vld [vmem:[%s2610_s4 + $0x1a8] sm:$0xff] }
  0x90   :  { %1770 = vmatprep.subr.mxu1 %v1416_v39  ;;  %1728 = vmatprep.subr.mxu0 %v298_v40 }
  0x91   :  { %1771 = vmatpush3.msra.mxu1 %v1416_v39  ;;  %1729 = vmatpush3.msra.mxu0 %v298_v40 }
  0x92   :  { %1772 = vmatprep.subr.mxu1 %v1415_v41  ;;  %1730 = vmatprep.subr.mxu0 %v297_v42 }
  0x93   :  { %1773 = vmatpush3.msra.mxu1 %v1415_v41  ;;  %1731 = vmatpush3.msra.mxu0 %v297_v42 }
  0x94   :  { %1774 = vmatprep.subr.mxu1 %v1414_v43  ;;  %1732 = vmatprep.subr.mxu0 %v296_v44 }
  0x95   :  { %1775 = vmatpush3.msra.mxu1 %v1414_v43  ;;  %1733 = vmatpush3.msra.mxu0 %v296_v44 }
  0x96   :  { %1776 = vmatprep.subr.mxu1 %v1413_v45  ;;  %1734 = vmatprep.subr.mxu0 %v295_v46 }
  0x97   :  { %1777 = vmatpush3.msra.mxu1 %v1413_v45  ;;  %1735 = vmatpush3.msra.mxu0 %v295_v46 }
  0x98   :  { %1778 = vmatprep.subr.mxu1 %v1412_v47  ;;  %1736 = vmatprep.subr.mxu0 %v294_v48 }
  0x99   :  { %1779 = vmatpush3.msra.mxu1 %v1412_v47  ;;  %1737 = vmatpush3.msra.mxu0 %v294_v48 }
  0x9a   :  { %1780 = vmatprep.subr.mxu1 %v1411_v49  ;;  %1738 = vmatprep.subr.mxu0 %v293_v50 }
  0x9b   :  { %1781 = vmatpush3.msra.mxu1 %v1411_v49  ;;  %1739 = vmatpush3.msra.mxu0 %v293_v50 }
  0x9c   :  { %1782 = vmatprep.subr.mxu1 %v1410_v51  ;;  %1740 = vmatprep.subr.mxu0 %v292_v52 }
  0x9d   :  { %1783 = vmatpush3.msra.mxu1 %v1410_v51  ;;  %1741 = vmatpush3.msra.mxu0 %v292_v52 }
  0x9e   :  { %1784 = vmatprep.subr.mxu1 %v1409_v53  ;;  %1742 = vmatprep.subr.mxu0 %v291_v54 }
  0x9f   :  { %1785 = vmatpush3.msra.mxu1 %v1409_v53  ;;  %1743 = vmatpush3.msra.mxu0 %v291_v54 }
  0xa0   :  { %1786 = vmatprep.subr.mxu1 %v1408_v55  ;;  %1744 = vmatprep.subr.mxu0 %v290_v56 }
  0xa1   :  { %1787 = vmatpush3.msra.mxu1 %v1408_v55  ;;  %1745 = vmatpush3.msra.mxu0 %v290_v56 }
  0xa2   :  { %1788 = vmatprep.subr.mxu1 %v1407_v57  ;;  %1746 = vmatprep.subr.mxu0 %v289_v58 }
  0xa3   :  { %1789 = vmatpush3.msra.mxu1 %v1407_v57  ;;  %1747 = vmatpush3.msra.mxu0 %v289_v58 }
  0xa4   :  { %1790 = vmatprep.subr.mxu1 %v1406_v59  ;;  %1748 = vmatprep.subr.mxu0 %v288_v60 }
  0xa5   :  { %1791 = vmatpush3.msra.mxu1 %v1406_v59  ;;  %1749 = vmatpush3.msra.mxu0 %v288_v60 }
  0xa6   :  { %1792 = vmatprep.subr.mxu1 %v1405_v61  ;;  %1806 = vmatprep.subr.mxu0 %v1436_v62 }
  0xa7   :  { %1793 = vmatpush3.msra.mxu1 %v1405_v61 }
  0xa8   :  { %1850 = vmatprep.subr.mxu1 %v1454_v23 }
 0x145   :  { %v1704_v63 = vpop.f32.mrf.mxu0  ;;  %v1714_v0 = vpop.f32.mrf.mxu1 }
 0x147   :  { %v171_v1 = vpop.f32.mrf.mxu0  ;;  %v268_v2 = vpop.f32.mrf.mxu1 }
 0x148   :  { %1750 = vmatprep.mubr.f32.mxu0 %v171_v1  ;;  %1794 = vmatprep.mubr.f32.mxu1 %v268_v2 }
 0x149   :  { %1751 = vmatmul.mubr.f32.vlgmr.msra.gmra.mxu0 %v1704_v63  ;;  %1795 = vmatmul.mubr.f32.vlgmr.msra.gmra.mxu1 %v1714_v0 }
 0x14a   :  { %v1707_v4 = vpop.f32.mrf.mxu0  ;;  %1807 = vmatpush3.msra.mxu0 %v1436_v62  ;;  %1851 = vmatpush3.msra.mxu1 %v1454_v23  ;;  %v1440_v23 = vld [vmem:[%s2610_s4 + $0x188] sm:$0xff] }
 0x14b   :  { %1808 = vmatprep.subr.mxu0 %v1435_v3  ;;  %1852 = vmatprep.subr.mxu1 %v1453_v24 }
 0x14c   :  { %v181_v6 = vpop.f32.mrf.mxu0  ;;  %1809 = vmatpush3.msra.mxu0 %v1435_v3  ;;  %1853 = vmatpush3.msra.mxu1 %v1453_v24  ;;  %v1439_v24 = vld [vmem:[%s2610_s4 + $0x180] sm:$0xff] }
 0x14d   :  { %1753 = vmatprep.mubr.f32.mxu0 %v181_v6  ;;  %1810 = vmatprep.subr.mxu0 %v1434_v5 }
 0x14e   :  { %v1717_v8 = vpop.f32.mrf.mxu1  ;;  %1754 = vmatmul.mubr.f32.gmra.mxu0 %v1707_v4  ;;  %1854 = vmatprep.subr.mxu1 %v1452_v25 }
 0x14f   :  { %1756 = vmatprep.mubr.f32.mxu0 %v268_v2  ;;  %1811 = vmatpush3.msra.mxu0 %v1434_v5 }
 0x150   :  { %v278_v9 = vpop.f32.mrf.mxu1  ;;  %1812 = vmatprep.subr.mxu0 %v1433_v7  ;;  %1855 = vmatpush3.msra.mxu1 %v1452_v25  ;;  %v920_v25 = vld [vmem:[%s2612_s6 + $0x78] sm:$0xff] }
 0x151   :  { %1797 = vmatprep.mubr.f32.mxu1 %v278_v9  ;;  %1813 = vmatpush3.msra.mxu0 %v1433_v7 }
 0x152   :  { %1757 = vmatmul.mubr.f32.gmra.mxu0 %v1714_v0  ;;  %1798 = vmatmul.mubr.f32.gmra.mxu1 %v1717_v8 }
 0x153   :  { %1759 = vmatprep.mubr.f32.mxu0 %v278_v9  ;;  %1800 = vmatprep.mubr.f32.mxu1 %v171_v1 }
 0x154   :  { %1814 = vmatprep.subr.mxu0 %v1432_v10  ;;  %1856 = vmatprep.subr.mxu1 %v1451_v26 }
 0x155   :  { %1815 = vmatpush3.msra.mxu0 %v1432_v10  ;;  %1857 = vmatpush3.msra.mxu1 %v1451_v26  ;;  %v1473_v26 = vld [vmem:[%s2612_s6 + $0xf8] sm:$0xff] }
 0x156   :  { %1760 = vmatmul.mubr.f32.gmra.mxu0 %v1717_v8  ;;  %1801 = vmatmul.mubr.f32.gmra.mxu1 %v1704_v63 }
 0x157   :  { %1803 = vmatprep.mubr.f32.mxu1 %v181_v6  ;;  %1816 = vmatprep.subr.mxu0 %v1431_v11 }
 0x158   :  { %1817 = vmatpush3.msra.mxu0 %v1431_v11  ;;  %1858 = vmatprep.subr.mxu1 %v1450_v27 }
 0x159   :  { %1818 = vmatprep.subr.mxu0 %v1430_v12  ;;  %1859 = vmatpush3.msra.mxu1 %v1450_v27  ;;  %v919_v27 = vld [vmem:[%s2612_s6 + $0x70] sm:$0xff] }
 0x15a   :  { %1804 = vmatmul.mubr.f32.gmra.mxu1 %v1707_v4  ;;  %1819 = vmatpush3.msra.mxu0 %v1430_v12 }
 0x15b   :  { %1820 = vmatprep.subr.mxu0 %v1429_v13  ;;  %1860 = vmatprep.subr.mxu1 %v1449_v28 }
 0x15c   :  { %1821 = vmatpush3.msra.mxu0 %v1429_v13  ;;  %1861 = vmatpush3.msra.mxu1 %v1449_v28  ;;  %v918_v28 = vld [vmem:[%s2612_s6 + $0x68] sm:$0xff] }
 0x15d   :  { %1822 = vmatprep.subr.mxu0 %v1428_v14  ;;  %1862 = vmatprep.subr.mxu1 %v1448_v29 }
 0x15e   :  { %1823 = vmatpush3.msra.mxu0 %v1428_v14  ;;  %1863 = vmatpush3.msra.mxu1 %v1448_v29  ;;  %v917_v29 = vld [vmem:[%s2612_s6 + $0x60] sm:$0xff] }
 0x15f   :  { %1824 = vmatprep.subr.mxu0 %v1427_v15  ;;  %1864 = vmatprep.subr.mxu1 %v1447_v30 }
 0x160   :  { %1825 = vmatpush3.msra.mxu0 %v1427_v15  ;;  %1865 = vmatpush3.msra.mxu1 %v1447_v30  ;;  %v916_v30 = vld [vmem:[%s2612_s6 + $0x58] sm:$0xff] }
 0x161   :  { %1826 = vmatprep.subr.mxu0 %v1426_v16  ;;  %1866 = vmatprep.subr.mxu1 %v1446_v31 }
 0x162   :  { %1827 = vmatpush3.msra.mxu0 %v1426_v16  ;;  %1867 = vmatpush3.msra.mxu1 %v1446_v31  ;;  %v915_v31 = vld [vmem:[%s2612_s6 + $0x50] sm:$0xff] }
 0x163   :  { %1828 = vmatprep.subr.mxu0 %v1425_v18  ;;  %1868 = vmatprep.subr.mxu1 %v1445_v32 }
 0x164   :  { %1829 = vmatpush3.msra.mxu0 %v1425_v18  ;;  %1869 = vmatpush3.msra.mxu1 %v1445_v32  ;;  %v1438_v32 = vld [vmem:[%s2611_s5 + $0x1] ss:$0 sm:$0xff] }
 0x165   :  { %1830 = vmatprep.subr.mxu0 %v1424_v19  ;;  %1870 = vmatprep.subr.mxu1 %v1444_v33 }
 0x166   :  { %1831 = vmatpush3.msra.mxu0 %v1424_v19  ;;  %1871 = vmatpush3.msra.mxu1 %v1444_v33 }
 0x167   :  { %1832 = vmatprep.subr.mxu0 %v1423_v20  ;;  %1872 = vmatprep.subr.mxu1 %v1443_v34 }
 0x168   :  { %1833 = vmatpush3.msra.mxu0 %v1423_v20  ;;  %1873 = vmatpush3.msra.mxu1 %v1443_v34 }
 0x169   :  { %1834 = vmatprep.subr.mxu0 %v1422_v21 }
 0x16a   :  { %1835 = vmatpush3.msra.mxu0 %v1422_v21  ;;  %v1442_v21 = vld [vmem:[%s2610_s4 + $0x198] sm:$0xff] }
 0x16b   :  { %1836 = vmatprep.subr.mxu0 %v1421_v22  ;;  %1874 = vmatprep.subr.mxu1 %v1442_v21 }
 0x16c   :  { %1837 = vmatpush3.msra.mxu0 %v1421_v22  ;;  %1875 = vmatpush3.msra.mxu1 %v1442_v21  ;;  %v1441_v22 = vld [vmem:[%s2610_s4 + $0x190] sm:$0xff] }
 0x16d   :  { %1876 = vmatprep.subr.mxu1 %v1441_v22  ;;  %1894 = vmatprep.subr.mxu0 %v920_v25  ;;  %v907_v21 = vld [vmem:[%s2612_s6 + $0x10] sm:$0xff] }
 0x16e   :  { %1877 = vmatpush3.msra.mxu1 %v1441_v22  ;;  %v1460_v22 = vld [vmem:[%s2612_s6 + $0x90] sm:$0xff] }
 0x16f   :  { %1878 = vmatprep.subr.mxu1 %v1440_v23 }
 0x170   :  { %1879 = vmatpush3.msra.mxu1 %v1440_v23  ;;  %v906_v23 = vld [vmem:[%s2612_s6 + $0x8] sm:$0xff] }
 0x171   :  { %1880 = vmatprep.subr.mxu1 %v1439_v24 }
 0x172   :  { %1881 = vmatpush3.msra.mxu1 %v1439_v24  ;;  %v1459_v24 = vld [vmem:[%s2612_s6 + $0x88] sm:$0xff] }
 0x173   :  { %1932 = vmatprep.subr.mxu1 %v1473_v26 }
 0x209   :  { %v1752_v36 = vpop.f32.mrf.mxu0  ;;  %v1796_v37 = vpop.f32.mrf.mxu1 }
 0x20a   :  { %v416_v38 = vadd.f32 %v1752_v36, %v1404_v35 }
 0x20b   :  { %v370_v39 = vpop.f32.mrf.mxu0  ;;  %v506_v42 = vpop.f32.mrf.mxu1 }
 0x20c   :  { %v546_v40 = vadd.f32 %v1796_v37, %v416_v38  ;;  %v415_v41 = vadd.f32 %v1404_v35, %v370_v39 }
 0x20e   :  { %v545_v43 = vadd.f32 %v506_v42, %v415_v41  ;;  %v1755_v44 = vpop.f32.mrf.mxu0  ;;  %v562_v45 = vmul.f32 0.01, %v546_v40  ;;  %vm554_vm9 = vcmp.ge.f32.partialorder %v546_v40, 0.0 }
 0x20f   :  { %v418_v48 = vadd.f32 %v1755_v44, %v1404_v35 }
 0x210   :  { %v561_v46 = vmul.f32 0.01, %v545_v43  ;;  %v380_v47 = vpop.f32.mrf.mxu0  ;;  %vm553_vm10 = vcmp.ge.f32.partialorder %v545_v43, 0.0  ;;  %v570_v52 = vsel %vm554_vm9, %v546_v40, %v562_v45  ;;  %vm877_vm9 = vcmask 0  }
 0x211   :  { %v417_v53 = vadd.f32 %v1404_v35, %v380_v47  ;;  %878 = vst.msk [vmem:[#allocation2] sm:$0x1] %vm877_vm9, %v2076_v17  ;;  %v1504_v17 = vld [vmem:[%s2612_s6 + $0x1e0] sm:$0xff] }
 0x212   :  { %v1758_v49 = vpop.f32.mrf.mxu0  ;;  %v1799_v50 = vpop.f32.mrf.mxu1  ;;  %v569_v51 = vsel %vm553_vm10, %v545_v43, %v561_v46  ;;  %v1472_v43 = vld [vmem:[%s2612_s6 + $0xf0] sm:$0xff]  ;;  %v1471_v46 = vld [vmem:[%s2612_s6 + $0xe8] sm:$0xff] }
 0x213   :  { %v548_v54 = vadd.f32 %v1799_v50, %v418_v48  ;;  %1838 = vmatprep.mubr.f32.mxu0 %v569_v51  ;;  %v420_v57 = vadd.f32 %v1758_v49, %v1404_v35  ;;  %v1470_v51 = vld [vmem:[%s2612_s6 + $0xe0] sm:$0xff] }
 0x214   :  { %v390_v55 = vpop.f32.mrf.mxu0  ;;  %v516_v56 = vpop.f32.mrf.mxu1  ;;  %1839 = vmatmul.mubr.f32.vlgmr.msra.gmra.mxu0 %v570_v52 }
 0x215   :  { %v547_v58 = vadd.f32 %v516_v56, %v417_v53  ;;  %v564_v59 = vmul.f32 0.01, %v548_v54  ;;  %v419_v60 = vadd.f32 %v1404_v35, %v390_v55  ;;  %vm556_vm12 = vcmp.ge.f32.partialorder %v548_v54, 0.0  ;;  %1895 = vmatpush3.msra.mxu0 %v920_v25  ;;  %v905_v25 = vld [vmem:[%s2612_s6] sm:$0xff] }
 0x216   :  { %v1761_v61 = vpop.f32.mrf.mxu0  ;;  %v1802_v62 = vpop.f32.mrf.mxu1  ;;  %1896 = vmatprep.subr.mxu0 %v919_v27 }
 0x217   :  { %v563_v63 = vmul.f32 0.01, %v547_v58  ;;  %v550_v0 = vadd.f32 %v1802_v62, %v420_v57  ;;  %vm555_vm11 = vcmp.ge.f32.partialorder %v547_v58, 0.0  ;;  %v422_v3 = vadd.f32 %v1761_v61, %v1404_v35  ;;  %1897 = vmatpush3.msra.mxu0 %v919_v27  ;;  %v1468_v62 = vld [vmem:[%s2612_s6 + $0xd0] sm:$0xff]  ;;  %v900_v27 = vld [vmem:[%s2609_s3] sm:$0xff] }
 0x218   :  { %v400_v1 = vpop.f32.mrf.mxu0  ;;  %v526_v2 = vpop.f32.mrf.mxu1  ;;  %v572_v9 = vsel %vm556_vm12, %v548_v54, %v564_v59  ;;  %1898 = vmatprep.subr.mxu0 %v918_v28 }
 0x219   :  { %v549_v4 = vadd.f32 %v526_v2, %v419_v60  ;;  %v571_v5 = vsel %vm555_vm11, %v547_v58, %v563_v63  ;;  %v566_v6 = vmul.f32 0.01, %v550_v0  ;;  %v421_v7 = vadd.f32 %v1404_v35, %v400_v1  ;;  %1899 = vmatpush3.msra.mxu0 %v918_v28  ;;  %v1469_v58 = vld [vmem:[%s2612_s6 + $0xd8] sm:$0xff]  ;;  %v901_v28 = vld [vmem:[%s2609_s3 + $0x8] sm:$0xff] }
 0x21a   :  { %v1805_v8 = vpop.f32.mrf.mxu1  ;;  %1841 = vmatprep.mubr.f32.mxu0 %v571_v5  ;;  %vm558_vm14 = vcmp.ge.f32.partialorder %v550_v0, 0.0  ;;  %1900 = vmatprep.subr.mxu0 %v917_v29 }
 0x21b   :  { %v565_v10 = vmul.f32 0.01, %v549_v4  ;;  %v552_v11 = vadd.f32 %v1805_v8, %v422_v3  ;;  %1842 = vmatmul.mubr.f32.gmra.mxu0 %v572_v9  ;;  %vm557_vm13 = vcmp.ge.f32.partialorder %v549_v4, 0.0  ;;  %v574_v16 = vsel %vm558_vm14, %v550_v0, %v566_v6  ;;  %v914_v6 = vld [vmem:[%s2612_s6 + $0x48] sm:$0xff]  ;;  %v913_v8 = vld [vmem:[%s2612_s6 + $0x40] sm:$0xff] }
 0x21c   :  { %v536_v12 = vpop.f32.mrf.mxu1  ;;  %1901 = vmatpush3.msra.mxu0 %v917_v29  ;;  %v1466_v9 = vld [vmem:[%s2612_s6 + $0xc0] sm:$0xff]  ;;  %v902_v29 = vld [vmem:[%s2609_s3 + $0x10] sm:$0xff] }
 0x21d   :  { %v551_v13 = vadd.f32 %v536_v12, %v421_v7  ;;  %v573_v14 = vsel %vm557_vm13, %v549_v4, %v565_v10  ;;  %v568_v15 = vmul.f32 0.01, %v552_v11  ;;  %vm560_vm0 = vcmp.ge.f32.partialorder %v552_v11, 0.0  ;;  %1902 = vmatprep.subr.mxu0 %v916_v30  ;;  %v1467_v7 = vld [vmem:[%s2612_s6 + $0xc8] sm:$0xff]  ;;  %v912_v10 = vld [vmem:[%s2612_s6 + $0x38] sm:$0xff]  ;;  %v911_v12 = vld [vmem:[%s2612_s6 + $0x30] sm:$0xff] }
 0x21e   :  { %1844 = vmatprep.mubr.f32.mxu0 %v573_v14  ;;  %1903 = vmatpush3.msra.mxu0 %v916_v30  ;;  %v910_v14 = vld [vmem:[%s2612_s6 + $0x28] sm:$0xff]  ;;  %v903_v30 = vld [vmem:[%s2609_s3 + $0x18] sm:$0xff] }
 0x21f   :  { %v567_v18 = vmul.f32 0.01, %v551_v13  ;;  %1845 = vmatmul.mubr.f32.gmra.mxu0 %v574_v16  ;;  %vm559_vm15 = vcmp.ge.f32.partialorder %v551_v13, 0.0  ;;  %v576_v20 = vsel %vm560_vm0, %v552_v11, %v568_v15  ;;  %1904 = vmatprep.subr.mxu0 %v915_v31  ;;  %v1465_v11 = vld [vmem:[%s2612_s6 + $0xb8] sm:$0xff]  ;;  %v1463_v15 = vld [vmem:[%s2612_s6 + $0xa8] sm:$0xff]  ;;  %v909_v16 = vld [vmem:[%s2612_s6 + $0x20] sm:$0xff] }
 0x220   :  { %1905 = vmatpush3.msra.mxu0 %v915_v31 }
 0x221   :  { %v575_v19 = vsel %vm559_vm15, %v551_v13, %v567_v18  ;;  %1906 = vmatprep.subr.mxu0 %v914_v6  ;;  %v1464_v13 = vld [vmem:[%s2612_s6 + $0xb0] sm:$0xff]  ;;  %v1462_v18 = vld [vmem:[%s2612_s6 + $0xa0] sm:$0xff] }
 0x222   :  { %1847 = vmatprep.mubr.f32.mxu0 %v575_v19  ;;  %1907 = vmatpush3.msra.mxu0 %v914_v6  ;;  %v908_v19 = vld [vmem:[%s2612_s6 + $0x18] sm:$0xff]  ;;  %v1486_v6 = vld [vmem:[%s2612_s6 + $0x160] sm:$0xff] }
 0x223   :  { %1848 = vmatmul.mubr.f32.gmra.mxu0 %v576_v20  ;;  %1908 = vmatprep.subr.mxu0 %v913_v8  ;;  %v1461_v20 = vld [vmem:[%s2612_s6 + $0x98] sm:$0xff] }
 0x224   :  { %1909 = vmatpush3.msra.mxu0 %v913_v8  ;;  %v1484_v8 = vld [vmem:[%s2612_s6 + $0x150] sm:$0xff] }
 0x225   :  { %1910 = vmatprep.subr.mxu0 %v912_v10 }
 0x226   :  { %1911 = vmatpush3.msra.mxu0 %v912_v10  ;;  %v1482_v10 = vld [vmem:[%s2612_s6 + $0x140] sm:$0xff] }
 0x227   :  { %1912 = vmatprep.subr.mxu0 %v911_v12 }
 0x228   :  { %1913 = vmatpush3.msra.mxu0 %v911_v12  ;;  %v1480_v12 = vld [vmem:[%s2612_s6 + $0x130] sm:$0xff] }
 0x229   :  { %1914 = vmatprep.subr.mxu0 %v910_v14 }
 0x22a   :  { %1915 = vmatpush3.msra.mxu0 %v910_v14  ;;  %v1478_v14 = vld [vmem:[%s2612_s6 + $0x120] sm:$0xff] }
 0x22b   :  { %1916 = vmatprep.subr.mxu0 %v909_v16 }
 0x22c   :  { %1917 = vmatpush3.msra.mxu0 %v909_v16  ;;  %v1476_v16 = vld [vmem:[%s2612_s6 + $0x110] sm:$0xff] }
 0x22d   :  { %1918 = vmatprep.subr.mxu0 %v908_v19 }
 0x22e   :  { %1919 = vmatpush3.msra.mxu0 %v908_v19  ;;  %v1474_v19 = vld [vmem:[%s2612_s6 + $0x100] sm:$0xff] }
 0x22f   :  { %1920 = vmatprep.subr.mxu0 %v907_v21 }
 0x230   :  { %1921 = vmatpush3.msra.mxu0 %v907_v21  ;;  %v1506_v21 = vld [vmem:[%s2612_s6 + $0x1f0] sm:$0xff] }
 0x231   :  { %1922 = vmatprep.subr.mxu0 %v906_v23 }
 0x232   :  { %1923 = vmatpush3.msra.mxu0 %v906_v23  ;;  %v1503_v23 = vld [vmem:[%s2612_s6 + $0x1d8] sm:$0xff] }
 0x233   :  { %1924 = vmatprep.subr.mxu0 %v905_v25 }
 0x234   :  { %1925 = vmatpush3.msra.mxu0 %v905_v25  ;;  %v1501_v25 = vld [vmem:[%s2612_s6 + $0x1c8] sm:$0xff] }
 0x2d4   :  { %v1840_v33 = vpop.f32.mrf.mxu0 }
 0x2d5   :  { %v674_v34 = vadd.f32 %v1840_v33, %v1438_v32 }
 0x2d6   :  { %v668_v35 = vpop.f32.mrf.mxu0 }
 0x2d7   :  { %v669_v36 = vadd.f32 %v1438_v32, %v668_v35  ;;  %v716_v37 = vmul.f32 0.01, %v674_v34  ;;  %vm708_vm1 = vcmp.ge.f32.partialorder %v674_v34, 0.0  ;;  %v1456_v35 = vld [vmem:[%s2611_s5 + $0x2] ss:$0 sm:$0xff] }
 0x2d9   :  { %v715_v38 = vmul.f32 0.01, %v669_v36  ;;  %vm707_vm2 = vcmp.ge.f32.partialorder %v669_v36, 0.0  ;;  %v724_v41 = vsel %vm708_vm1, %v674_v34, %v716_v37 }
 0x2db   :  { %v1843_v39 = vpop.f32.mrf.mxu0  ;;  %v723_v40 = vsel %vm707_vm2, %v669_v36, %v715_v38 }
 0x2dc   :  { %v684_v42 = vadd.f32 %v1843_v39, %v1438_v32  ;;  %1882 = vmatprep.mubr.f32.mxu1 %v723_v40 }
 0x2dd   :  { %v678_v44 = vpop.f32.mrf.mxu0  ;;  %1883 = vmatmul.mubr.f32.vlgmr.msra.gmra.mxu1 %v724_v41 }
 0x2de   :  { %v679_v45 = vadd.f32 %v1438_v32, %v678_v44  ;;  %1933 = vmatpush3.msra.mxu1 %v1473_v26  ;;  %v718_v47 = vmul.f32 0.01, %v684_v42  ;;  %vm710_vm4 = vcmp.ge.f32.partialorder %v684_v42, 0.0  ;;  %v1458_v26 = vld [vmem:[%s2612_s6 + $0x80] sm:$0xff] }
 0x2df   :  { %v1846_v48 = vpop.f32.mrf.mxu0  ;;  %1934 = vmatprep.subr.mxu1 %v1472_v43 }
 0x2e0   :  { %v717_v49 = vmul.f32 0.01, %v679_v45  ;;  %v694_v50 = vadd.f32 %v1846_v48, %v1438_v32  ;;  %vm709_vm3 = vcmp.ge.f32.partialorder %v679_v45, 0.0  ;;  %1935 = vmatpush3.msra.mxu1 %v1472_v43  ;;  %v726_v57 = vsel %vm710_vm4, %v684_v42, %v718_v47 }
 0x2e1   :  { %v688_v52 = vpop.f32.mrf.mxu0  ;;  %1936 = vmatprep.subr.mxu1 %v1471_v46 }
 0x2e2   :  { %v689_v53 = vadd.f32 %v1438_v32, %v688_v52  ;;  %v725_v54 = vsel %vm709_vm3, %v679_v45, %v717_v49  ;;  %1937 = vmatpush3.msra.mxu1 %v1471_v46  ;;  %v720_v55 = vmul.f32 0.01, %v694_v50  ;;  %vm712_vm6 = vcmp.ge.f32.partialorder %v694_v50, 0.0 }
 0x2e3   :  { %v1849_v56 = vpop.f32.mrf.mxu0  ;;  %1885 = vmatprep.mubr.f32.mxu1 %v725_v54  ;;  %1938 = vmatprep.subr.mxu1 %v1470_v51 }
 0x2e4   :  { %v719_v59 = vmul.f32 0.01, %v689_v53  ;;  %v704_v60 = vadd.f32 %v1849_v56, %v1438_v32  ;;  %1886 = vmatmul.mubr.f32.gmra.mxu1 %v726_v57  ;;  %vm711_vm5 = vcmp.ge.f32.partialorder %v689_v53, 0.0  ;;  %v728_v2 = vsel %vm712_vm6, %v694_v50, %v720_v55 }
 0x2e5   :  { %v698_v61 = vpop.f32.mrf.mxu0  ;;  %1939 = vmatpush3.msra.mxu1 %v1470_v51 }
 0x2e6   :  { %v699_v63 = vadd.f32 %v1438_v32, %v698_v61  ;;  %v727_v0 = vsel %vm711_vm5, %v689_v53, %v719_v59  ;;  %1940 = vmatprep.subr.mxu1 %v1469_v58  ;;  %v722_v1 = vmul.f32 0.01, %v704_v60  ;;  %vm714_vm8 = vcmp.ge.f32.partialorder %v704_v60, 0.0 }
 0x2e7   :  { %1888 = vmatprep.mubr.f32.mxu1 %v727_v0  ;;  %1941 = vmatpush3.msra.mxu1 %v1469_v58 }
 0x2e8   :  { %v721_v3 = vmul.f32 0.01, %v699_v63  ;;  %1889 = vmatmul.mubr.f32.gmra.mxu1 %v728_v2  ;;  %vm713_vm7 = vcmp.ge.f32.partialorder %v699_v63, 0.0  ;;  %1942 = vmatprep.subr.mxu1 %v1468_v62  ;;  %v730_v5 = vsel %vm714_vm8, %v704_v60, %v722_v1 }
 0x2e9   :  { %1943 = vmatpush3.msra.mxu1 %v1468_v62 }
 0x2ea   :  { %v729_v4 = vsel %vm713_vm7, %v699_v63, %v721_v3  ;;  %1944 = vmatprep.subr.mxu1 %v1467_v7  ;;  %v1489_v3 = vld [vmem:[%s2612_s6 + $0x178] sm:$0xff] }
 0x2eb   :  { %1891 = vmatprep.mubr.f32.mxu1 %v729_v4  ;;  %1945 = vmatpush3.msra.mxu1 %v1467_v7  ;;  %v1488_v4 = vld [vmem:[%s2612_s6 + $0x170] sm:$0xff]  ;;  %v1485_v7 = vld [vmem:[%s2612_s6 + $0x158] sm:$0xff] }
 0x2ec   :  { %1892 = vmatmul.mubr.f32.gmra.mxu1 %v730_v5  ;;  %1946 = vmatprep.subr.mxu1 %v1466_v9  ;;  %v1487_v5 = vld [vmem:[%s2612_s6 + $0x168] sm:$0xff] }
 0x2ed   :  { %1947 = vmatpush3.msra.mxu1 %v1466_v9  ;;  %1964 = vmatprep.mubr.f32.mxu1 %v900_v27  ;;  %v1483_v9 = vld [vmem:[%s2612_s6 + $0x148] sm:$0xff]  ;;  %v1499_v27 = vld [vmem:[%s2612_s6 + $0x1b8] sm:$0xff] }
 0x2ee   :  { %1948 = vmatprep.subr.mxu1 %v1465_v11  ;;  %1970 = vmatprep.subr.mxu0 %v1489_v3 }
 0x2ef   :  { %1949 = vmatpush3.msra.mxu1 %v1465_v11  ;;  %v1481_v11 = vld [vmem:[%s2612_s6 + $0x138] sm:$0xff] }
 0x2f0   :  { %1950 = vmatprep.subr.mxu1 %v1464_v13 }
 0x2f1   :  { %1951 = vmatpush3.msra.mxu1 %v1464_v13  ;;  %v1479_v13 = vld [vmem:[%s2612_s6 + $0x128] sm:$0xff] }
 0x2f2   :  { %1952 = vmatprep.subr.mxu1 %v1463_v15 }
 0x2f3   :  { %1953 = vmatpush3.msra.mxu1 %v1463_v15  ;;  %v1477_v15 = vld [vmem:[%s2612_s6 + $0x118] sm:$0xff] }
 0x2f4   :  { %1954 = vmatprep.subr.mxu1 %v1462_v18 }
 0x2f5   :  { %1955 = vmatpush3.msra.mxu1 %v1462_v18  ;;  %v1475_v18 = vld [vmem:[%s2612_s6 + $0x108] sm:$0xff] }
 0x2f6   :  { %1956 = vmatprep.subr.mxu1 %v1461_v20 }
 0x2f7   :  { %1957 = vmatpush3.msra.mxu1 %v1461_v20  ;;  %v1507_v20 = vld [vmem:[%s2612_s6 + $0x1f8] sm:$0xff] }
 0x2f8   :  { %1958 = vmatprep.subr.mxu1 %v1460_v22 }
 0x2f9   :  { %1959 = vmatpush3.msra.mxu1 %v1460_v22  ;;  %v1505_v22 = vld [vmem:[%s2612_s6 + $0x1e8] sm:$0xff] }
 0x2fa   :  { %1960 = vmatprep.subr.mxu1 %v1459_v24 }
 0x2fb   :  { %1961 = vmatpush3.msra.mxu1 %v1459_v24  ;;  %v1502_v24 = vld [vmem:[%s2612_s6 + $0x1d0] sm:$0xff] }
 0x2fc   :  { %1962 = vmatprep.subr.mxu1 %v1458_v26 }
 0x2fd   :  { %1963 = vmatpush3.msra.mxu1 %v1458_v26  ;;  %v1500_v26 = vld [vmem:[%s2612_s6 + $0x1c0] sm:$0xff] }
 0x2fe   :  { %1965 = vmatmul.mubr.f32.vlgmr.msra.gmra.mxu1 %v901_v28  ;;  %2008 = vmatprep.subr.mxu1 %v1507_v20  ;;  %v1498_v28 = vld [vmem:[%s2612_s6 + $0x1b0] sm:$0xff] }
 0x2ff   :  { %1967 = vmatprep.mubr.f32.mxu1 %v902_v29  ;;  %2009 = vmatpush3.msra.mxu1 %v1507_v20  ;;  %v1497_v29 = vld [vmem:[%s2612_s6 + $0x1a8] sm:$0xff] }
 0x300   :  { %2010 = vmatprep.subr.mxu1 %v1506_v21 }
 0x301   :  { %2011 = vmatpush3.msra.mxu1 %v1506_v21 }
 0x302   :  { %1968 = vmatmul.mubr.f32.gmra.mxu1 %v903_v30  ;;  %2012 = vmatprep.subr.mxu1 %v1505_v22  ;;  %v1496_v30 = vld [vmem:[%s2612_s6 + $0x1a0] sm:$0xff] }
 0x303   :  { %2013 = vmatpush3.msra.mxu1 %v1505_v22 }
 0x304   :  { %2014 = vmatprep.subr.mxu1 %v1504_v17 }
 0x305   :  { %2015 = vmatpush3.msra.mxu1 %v1504_v17 }
 0x306   :  { %2016 = vmatprep.subr.mxu1 %v1503_v23 }
 0x307   :  { %2017 = vmatpush3.msra.mxu1 %v1503_v23 }
 0x308   :  { %2018 = vmatprep.subr.mxu1 %v1502_v24 }
 0x309   :  { %2019 = vmatpush3.msra.mxu1 %v1502_v24 }
 0x30a   :  { %2020 = vmatprep.subr.mxu1 %v1501_v25 }
 0x30b   :  { %2021 = vmatpush3.msra.mxu1 %v1501_v25 }
 0x30c   :  { %2022 = vmatprep.subr.mxu1 %v1500_v26 }
 0x30d   :  { %2023 = vmatpush3.msra.mxu1 %v1500_v26 }
 0x30e   :  { %2024 = vmatprep.subr.mxu1 %v1499_v27 }
 0x30f   :  { %2025 = vmatpush3.msra.mxu1 %v1499_v27 }
 0x310   :  { %2026 = vmatprep.subr.mxu1 %v1498_v28 }
 0x311   :  { %2027 = vmatpush3.msra.mxu1 %v1498_v28 }
 0x312   :  { %2028 = vmatprep.subr.mxu1 %v1497_v29 }
 0x313   :  { %2029 = vmatpush3.msra.mxu1 %v1497_v29 }
 0x314   :  { %2030 = vmatprep.subr.mxu1 %v1496_v30 }
 0x315   :  { %2031 = vmatpush3.msra.mxu1 %v1496_v30 }
 0x39d   :  { %v1884_v31 = vpop.f32.mrf.mxu1 }
 0x39e   :  { %v828_v38 = vadd.f32 %v1884_v31, %v1456_v35 }
 0x39f   :  { %v822_v32 = vpop.f32.mrf.mxu1 }
 0x3a0   :  { %v823_v40 = vadd.f32 %v1456_v35, %v822_v32 }
 0x3a4   :  { %v1887_v33 = vpop.f32.mrf.mxu1 }
 0x3a5   :  { %v838_v47 = vadd.f32 %v1887_v33, %v1456_v35 }
 0x3a6   :  { %v832_v34 = vpop.f32.mrf.mxu1 }
 0x3a7   :  { %v833_v50 = vadd.f32 %v1456_v35, %v832_v34 }
 0x3a8   :  { %v1890_v36 = vpop.f32.mrf.mxu1 }
 0x3a9   :  { %v848_v37 = vadd.f32 %v1890_v36, %v1456_v35 }
 0x3aa   :  { %v842_v39 = vpop.f32.mrf.mxu1 }
 0x3ab   :  { %v843_v41 = vadd.f32 %v1456_v35, %v842_v39  ;;  %v862_v42 = vadd.f32 %v848_v37, %v828_v38  ;;  %v870_v44 = vsub.f32 %v828_v38, %v848_v37  ;;  %v1457_v39 = vld [vmem:[%s2613_s7] ss:$0 sm:$0xff] }
 0x3ac   :  { %v1893_v43 = vpop.f32.mrf.mxu1 }
 0x3ad   :  { %v861_v45 = vadd.f32 %v843_v41, %v823_v40  ;;  %v869_v46 = vsub.f32 %v823_v40, %v843_v41  ;;  %v858_v48 = vadd.f32 %v1893_v43, %v1456_v35  ;;  %v866_v54 = vmul.f32 0.5, %v862_v42 }
 0x3ae   :  { %v852_v49 = vpop.f32.mrf.mxu1  ;;  %v881_v56 = vmul.f32 %v870_v44, %v870_v44 }
 0x3af   :  { %v865_v51 = vmul.f32 0.5, %v861_v45  ;;  %v880_v52 = vmul.f32 %v869_v46, %v869_v46  ;;  %v853_v53 = vadd.f32 %v1456_v35, %v852_v49  ;;  %v864_v55 = vadd.f32 %v858_v48, %v838_v47 }
 0x3b0   :  { %v872_v57 = vsub.f32 %v838_v47, %v858_v48 }
 0x3b1   :  { %v863_v58 = vadd.f32 %v853_v53, %v833_v50  ;;  %v871_v59 = vsub.f32 %v833_v50, %v853_v53  ;;  %1926 = vmatprep.mubr.f32.mxu0 %v865_v51  ;;  %v884_v60 = vadd.f32 %v881_v56, %v880_v52  ;;  %v868_v63 = vmul.f32 0.5, %v864_v55 }
 0x3b2   :  { %1927 = vmatmul.mubr.f32.vlgmr.msra.gmra.mxu0 %v866_v54  ;;  %v883_v0 = vmul.f32 %v872_v57, %v872_v57 }
 0x3b3   :  { %v867_v61 = vmul.f32 0.5, %v863_v58  ;;  %v882_v62 = vmul.f32 %v871_v59, %v871_v59  ;;  %1971 = vmatpush3.msra.mxu0 %v1489_v3  ;;  %v1494_v3 = vld [vmem:[%s2612_s6 + $0x190] sm:$0xff] }
 0x3b4   :  { %1972 = vmatprep.subr.mxu0 %v1488_v4 }
 0x3b5   :  { %1929 = vmatprep.mubr.f32.mxu0 %v867_v61  ;;  %v885_v1 = vadd.f32 %v884_v60, %v882_v62  ;;  %1973 = vmatpush3.msra.mxu0 %v1488_v4  ;;  %v879_v61 = vld [vmem:[#allocation2] sm:$0x1]  ;;  %v1493_v4 = vld [vmem:[%s2612_s6 + $0x188] sm:$0xff] }
 0x3b6   :  { %1930 = vmatmul.mubr.f32.gmra.mxu0 %v868_v63  ;;  %1974 = vmatprep.subr.mxu0 %v1487_v5 }
 0x3b7   :  { %v886_v2 = vadd.f32 %v885_v1, %v883_v0  ;;  %1975 = vmatpush3.msra.mxu0 %v1487_v5  ;;  %v1492_v5 = vld [vmem:[%s2612_s6 + $0x180] sm:$0xff] }
 0x3b8   :  { %1976 = vmatprep.subr.mxu0 %v1486_v6 }
 0x3b9   :  { %887 = vadd.xlane.f32.xlu0 %v886_v2  ;;  %1977 = vmatpush3.msra.mxu0 %v1486_v6  ;;  %v1495_v2 = vld [vmem:[%s2612_s6 + $0x198] sm:$0xff]  ;;  %v1491_v6 = vld [vmem:[%s2613_s7 + $0x1] ss:$0 sm:$0xff]  ;;  %s2077_s6 = smov [#allocation2]  }
 0x3ba   :  { %1978 = vmatprep.subr.mxu0 %v1485_v7  ;;  %2032 = vmatprep.subr.mxu1 %v1495_v2  ;;  %s1378_s27 = sshll.u32 %s2077_s6, 4  ;;  %s1379_s27 = int_to_ptr.vmem [resolvable:$true] %s1378_s27 }
 0x3bb   :  { %1979 = vmatpush3.msra.mxu0 %v1485_v7  ;;  %2033 = vmatpush3.msra.mxu1 %v1495_v2  ;;  %s2053_s28 = scalar_lea.vmem %s1379_s27, 16  ;;  %s2057_s29 = scalar_lea.vmem %s1379_s27, 32 }
 0x3bc   :  { %1980 = vmatprep.subr.mxu0 %v1484_v8  ;;  %2034 = vmatprep.subr.mxu1 %v1494_v3  ;;  %p2054_p0 = scmp.ne.s32.totalorder %s1379_s27, %s2053_s28  ;;  %p2058_p1 = scmp.lt.s32.totalorder %s1379_s27, %s1379_s27 }
 0x3bd   :  { %1981 = vmatpush3.msra.mxu0 %v1484_v8  ;;  %2035 = vmatpush3.msra.mxu1 %v1494_v3  ;;  %p2059_p2 = scmp.lt.s32.totalorder %s2057_s29, %s2053_s28 }
 0x3be   :  { %1982 = vmatprep.subr.mxu0 %v1483_v9  ;;  %v1966_v38 = vpop.f32.mrf.mxu1  ;;  %2036 = vmatprep.subr.mxu1 %v1493_v4 }
 0x3bf   :  { %1983 = vmatpush3.msra.mxu0 %v1483_v9  ;;  %2037 = vmatpush3.msra.mxu1 %v1493_v4  ;;  %p2060_p3 = por %p2059_p2, %p2058_p1 }
 0x3c0   :  { %1984 = vmatprep.subr.mxu0 %v1482_v10  ;;  %v1099_v41 = vpop.f32.mrf.mxu1  ;;  %2038 = vmatprep.subr.mxu1 %v1492_v5 }
 0x3c1   :  { %1985 = vmatpush3.msra.mxu0 %v1482_v10  ;;  %2039 = vmatpush3.msra.mxu1 %v1492_v5  ;;  %p2061_p4 = pnand %p2060_p3, %p2054_p0 }
 0x3c2   :  { %1986 = vmatprep.subr.mxu0 %v1481_v11  ;;  %v1969_v47 = vpop.f32.mrf.mxu1 }
 0x3c3   :  { %1987 = vmatpush3.msra.mxu0 %v1481_v11 }
 0x3c4   :  { %1988 = vmatprep.subr.mxu0 %v1480_v12  ;;  %v1109_v55 = vpop.f32.mrf.mxu1 }
 0x3c5   :  { %1989 = vmatpush3.msra.mxu0 %v1480_v12 }
 0x3c6   :  { %1990 = vmatprep.subr.mxu0 %v1479_v13 }
 0x3c7   :  { %1991 = vmatpush3.msra.mxu0 %v1479_v13 }
 0x3c8   :  { %1992 = vmatprep.subr.mxu0 %v1478_v14 }
 0x3c9   :  { %1993 = vmatpush3.msra.mxu0 %v1478_v14 }
 0x3ca   :  { %1994 = vmatprep.subr.mxu0 %v1477_v15 }
 0x3cb   :  { %1995 = vmatpush3.msra.mxu0 %v1477_v15 }
 0x3cc   :  { %1996 = vmatprep.subr.mxu0 %v1476_v16 }
 0x3cd   :  { %1997 = vmatpush3.msra.mxu0 %v1476_v16 }
 0x3ce   :  { %1998 = vmatprep.subr.mxu0 %v1475_v18 }
 0x3cf   :  { %1999 = vmatpush3.msra.mxu0 %v1475_v18 }
 0x3d0   :  { %2000 = vmatprep.subr.mxu0 %v1474_v19 }
 0x3d1   :  { %2001 = vmatpush3.msra.mxu0 %v1474_v19 }
 0x442   :  { %v888_v31 = vpop.xlane.xlu0 %887 }
 0x443   :  { %v889_v32 = vrot.slane %v888_v31, 4 }
 0x445   :  { %v890_v33 = vadd.f32 %v889_v32, %v888_v31 }
 0x447   :  { %v891_v34 = vrot.slane %v890_v33, 2 }
 0x449   :  { %v892_v35 = vadd.f32 %v891_v34, %v890_v33 }
 0x44b   :  { %v893_v36 = vrot.slane %v892_v35, 1 }
 0x44d   :  { %v894_v37 = vadd.f32 %v893_v36, %v892_v35 }
 0x44f   :  { %2046 = vpush %v894_v37 }
 0x472   :  { %v1928_v40 = vpop.f32.mrf.mxu0 }
 0x473   :  { %v1013_v42 = vadd.f32 %v1928_v40, %v1457_v39 }
 0x474   :  { %v987_v43 = vpop.f32.mrf.mxu0 }
 0x475   :  { %v1119_v44 = vadd.f32 %v1966_v38, %v1013_v42  ;;  %v1012_v45 = vadd.f32 %v1457_v39, %v987_v43 }
 0x476   :  { %v1931_v46 = vpop.f32.mrf.mxu0 }
 0x477   :  { %v1118_v48 = vadd.f32 %v1099_v41, %v1012_v45  ;;  %v1015_v49 = vadd.f32 %v1931_v46, %v1457_v39  ;;  %v1127_v50 = vmul.f32 0.01, %v1119_v44  ;;  %vm1123_vm10 = vcmp.ge.f32.partialorder %v1119_v44, 0.0 }
 0x478   :  { %v997_v51 = vpop.f32.mrf.mxu0 }
 0x479   :  { %v1126_v52 = vmul.f32 0.01, %v1118_v48  ;;  %v1121_v53 = vadd.f32 %v1969_v47, %v1015_v49  ;;  %v1014_v54 = vadd.f32 %v1457_v39, %v997_v51  ;;  %vm1122_vm11 = vcmp.ge.f32.partialorder %v1118_v48, 0.0 }
 0x47a   :  { %v1131_v58 = vsel %vm1123_vm10, %v1119_v44, %v1127_v50 }
 0x47b   :  { %v1120_v56 = vadd.f32 %v1109_v55, %v1014_v54  ;;  %v1130_v57 = vsel %vm1122_vm11, %v1118_v48, %v1126_v52  ;;  %v1129_v59 = vmul.f32 0.01, %v1121_v53  ;;  %vm1125_vm13 = vcmp.ge.f32.partialorder %v1121_v53, 0.0 }
 0x47c   :  { %2002 = vmatprep.mubr.f32.mxu0 %v1130_v57 }
 0x47d   :  { %v1128_v60 = vmul.f32 0.01, %v1120_v56  ;;  %2003 = vmatmul.mubr.f32.vlgmr.msra.gmra.mxu0 %v1131_v58  ;;  %vm1124_vm12 = vcmp.ge.f32.partialorder %v1120_v56, 0.0  ;;  %v1133_v63 = vsel %vm1125_vm13, %v1121_v53, %v1129_v59 }
 0x47f   :  { %v1132_v62 = vsel %vm1124_vm12, %v1120_v56, %v1128_v60 }
 0x480   :  { %s2047_s18 = spop %2046  ;;  %2005 = vmatprep.mubr.f32.mxu0 %v1132_v62 }
 0x481   :  { %v896_v0 = vstv %s2047_s18  ;;  %2006 = vmatmul.mubr.f32.gmra.mxu0 %v1133_v63 }
 0x482   :  { %v897_v1 = vadd.f32 %v896_v0, %v879_v61 }
 0x484   :  { %899 = vst.msk [vmem:[#allocation2] sm:$0x1] %vm877_vm9, %v897_v1 }
 0x53d   :  { %v2004_v7 = vpop.f32.mrf.mxu0 }
 0x53e   :  { %v1231_v8 = vadd.f32 %v2004_v7, %v1491_v6 }
 0x53f   :  { %v1225_v9 = vpop.f32.mrf.mxu0 }
 0x540   :  { %v1226_v10 = vadd.f32 %v1491_v6, %v1225_v9  ;;  %v1249_v11 = vmul.f32 0.01, %v1231_v8  ;;  %vm1245_vm14 = vcmp.ge.f32.partialorder %v1231_v8, 0.0 }
 0x541   :  { %v2007_v12 = vpop.f32.mrf.mxu0 }
 0x542   :  { %v1248_v13 = vmul.f32 0.01, %v1226_v10  ;;  %v1241_v14 = vadd.f32 %v2007_v12, %v1491_v6  ;;  %vm1244_vm15 = vcmp.ge.f32.partialorder %v1226_v10, 0.0  ;;  %v1253_v19 = vsel %vm1245_vm14, %v1231_v8, %v1249_v11 }
 0x543   :  { %v1235_v15 = vpop.f32.mrf.mxu0 }
 0x544   :  { %v1236_v16 = vadd.f32 %v1491_v6, %v1235_v15  ;;  %v1252_v18 = vsel %vm1244_vm15, %v1226_v10, %v1248_v13  ;;  %v1251_v20 = vmul.f32 0.01, %v1241_v14  ;;  %vm1247_vm1 = vcmp.ge.f32.partialorder %v1241_v14, 0.0 }
 0x545   :  { %2040 = vmatprep.mubr.f32.mxu1 %v1252_v18 }
 0x546   :  { %v1250_v21 = vmul.f32 0.01, %v1236_v16  ;;  %2041 = vmatmul.mubr.f32.vlgmr.msra.gmra.mxu1 %v1253_v19  ;;  %vm1246_vm0 = vcmp.ge.f32.partialorder %v1236_v16, 0.0  ;;  %v1255_v17 = vsel %vm1247_vm1, %v1241_v14, %v1251_v20 }
 0x548   :  { %v1254_v22 = vsel %vm1246_vm0, %v1236_v16, %v1250_v21 }
 0x549   :  { %2043 = vmatprep.mubr.f32.mxu1 %v1254_v22 }
 0x54a   :  { %2044 = vmatmul.mubr.f32.gmra.mxu1 %v1255_v17 }
 0x54b   :  { %2064 = shalt.err (!%p2061_p4)
}
 0x54c   :  { %1381 = dma.vmem_to_hbm [thread:$0]  %s1379_s27, 16, %s2615_s9, [#allocation3]   ;;  %v1509_v23 = vld [vmem:[%s2613_s7 + $0x2] ss:$0 sm:$0xff] }
 0x606   :  { %v2042_v24 = vpop.f32.mrf.mxu1 }
 0x607   :  { %v1353_v25 = vadd.f32 %v2042_v24, %v1509_v23 }
 0x608   :  { %v1347_v26 = vpop.f32.mrf.mxu1 }
 0x609   :  { %1367 = vst [vmem:[%s2614_s8 + $0x8] sm:$0xff] %v1353_v25  ;;  %v1348_v27 = vadd.f32 %v1509_v23, %v1347_v26 }
 0x60a   :  { %v2045_v28 = vpop.f32.mrf.mxu1 }
 0x60b   :  { %1366 = vst [vmem:[%s2614_s8] sm:$0xff] %v1348_v27  ;;  %v1363_v29 = vadd.f32 %v2045_v28, %v1509_v23 }
 0x60c   :  { %v1357_v30 = vpop.f32.mrf.mxu1 }
 0x60d   :  { %1369 = vst [vmem:[%s2614_s8 + $0x18] sm:$0xff] %v1363_v29  ;;  %v1358_v31 = vadd.f32 %v1509_v23, %v1357_v30 }
 0x60f   :  { %1368 = vst [vmem:[%s2614_s8 + $0x10] sm:$0xff] %v1358_v31 }
 0x610   :  { %2073 = dma.done.wait [#allocation3], 16  }
 0x611   :  { %2074 = vsyncadd [#allocation3], 4294967280 }
 0x612   :  { %1387 = vsyncpa [#allocation3], 1 }

// kernel: qgcnn_forward.5
= control target key start
LH: loop header
LB: loop body
LE: loop exit
PB: predicated region body
PF: predicated region fallthrough
CT: control target
= control target key end

     0   :  { %15 = vsyncpa [#allocation3], 0  ;;  %s2412_s0 = inlined_call_operand.vmem [shape: s32[32,1], index: 0, kind: input, shape index: {}]   ;;  %s2413_s1 = inlined_call_operand.vmem [shape: s32[32,1], index: 1, kind: input, shape index: {}]   ;;  %s2414_s2 = inlined_call_operand.vmem [shape: f32[16,128], index: 2, kind: input, shape index: {}]   ;;  %s2415_s3 = inlined_call_operand.vmem [shape: f32[32,128], index: 3, kind: input, shape index: {}]   ;;  %s2416_s4 = inlined_call_operand.vmem [shape: f32[4,128,128], index: 4, kind: input, shape index: {}]   ;;  %s2417_s5 = inlined_call_operand.vmem [shape: f32[3,1,128], index: 5, kind: input, shape index: {}]   ;;  %s2418_s6 = inlined_call_operand.hbm [shape: f32[4,128,128], index: 6, kind: input, shape index: {}]   ;;  %s2419_s7 = inlined_call_operand.vmem [shape: f32[3,1,128], index: 7, kind: input, shape index: {}]   ;;  %s2420_s8 = inlined_call_operand.vmem [shape: f32[32,128], index: 8, kind: output, shape index: {0}]   ;;  %s2421_s9 = inlined_call_operand.hbm [shape: f32[1,1], index: 9, kind: output, shape index: {1}]  }
   0x1   :  { %16 = vsyncpa [#allocation4], 0  ;;  %s2067_s30 = smov [#allocation2]  }
   0x2   :  { %s34_s10 = sshll.u32 %s2067_s30, 4  ;;  %s35_s10 = int_to_ptr.vmem [resolvable:$true] %s34_s10 }
   0x3   :  { %s2031_s11 = scalar_lea.vmem %s35_s10, 8192  ;;  %p2036_p1 = scmp.lt.s32.totalorder %s35_s10, %s35_s10 }
   0x4   :  { %p2032_p0 = scmp.ne.s32.totalorder %s35_s10, %s2031_s11  ;;  %p2037_p2 = scmp.lt.s32.totalorder %s2031_s11, %s2031_s11 }
   0x6   :  { %p2038_p3 = por %p2037_p2, %p2036_p1 }
   0x8   :  { %p2039_p4 = pnand %p2038_p3, %p2032_p0 }
   0xa   :  { %2042 = shalt.err (!%p2039_p4)
}
   0xb   :  { %s2068_s12 = smov 128   ;;  %s2069_s13 = smov 8  }
   0xc   :  { %40 = dma.hbm_to_vmem [thread:$0]  %s2418_s6, 8192, %s35_s10, [#allocation3], %s2068_s12, %s2068_s12, %s2069_s13  }
   0xd   :  { %2063 = dma.done.wait [#allocation3], 8192  }
   0xe   :  { %2064 = vsyncadd [#allocation3], 4294959104  ;;  %v2070_v0 = vmov 0   ;;  %v78_v1 = vld [vmem:[%s2413_s1] sm:$0xff]  ;;  %v79_v3 = vld [vmem:[%s2413_s1 + $0x8] sm:$0xff]  ;;  %v48_v13 = vlaneseq  ;;  %vm106_vm0 = vcmask 130048  }
   0xf   :  { %2022 = vset.pattern.permute.xlu1 %v2070_v0  ;;  %2021 = vset.pattern.permute.xlu0 %v2070_v0  ;;  %v50_v2 = vld [vmem:[%s2412_s0] sm:$0xff]  ;;  %v51_v4 = vld [vmem:[%s2412_s0 + $0x8] sm:$0xff]  ;;  %v53_v7 = vld [vmem:[%s2412_s0 + $0x18] sm:$0xff]  ;;  %v2071_v17 = vmov 0.0   ;;  %s2072_s29 = smov [#allocation5]  }
  0x10   :  { %83 = vperm.xlu1 %2022, %v78_v1   ;;  %55 = vperm.xlu0 %2021, %v50_v2   ;;  %v47_v5 = vld [vmem:[%s2414_s2 + $0x8] sm:$0xff]  ;;  %v46_v6 = vld [vmem:[%s2414_s2] sm:$0xff]  ;;  %v52_v8 = vld [vmem:[%s2412_s0 + $0x10] sm:$0xff]  ;;  %v49_v14 = vand.u32 127, %v48_v13  ;;  %s1392_s30 = sshll.u32 %s2072_s29, 4  ;;  %s1393_s30 = int_to_ptr.vmem [resolvable:$true] %s1392_s30 }
  0x11   :  { %1665 = vmatprep.subr.mxu0 %v47_v5  ;;  %1675 = vmatprep.subr.mxu1 %v47_v5  ;;  %v81_v9 = vld [vmem:[%s2413_s1 + $0x18] sm:$0xff]  ;;  %v80_v10 = vld [vmem:[%s2413_s1 + $0x10] sm:$0xff]  ;;  %v315_v28 = vld [vmem:[%s2416_s4 + $0x68] sm:$0xff]  ;;  %s2043_s10 = scalar_lea.vmem %s1393_s30, 16  ;;  %s2047_s2 = scalar_lea.vmem %s1393_s30, 32 }
  0x12   :  { %1666 = vmatpush3.msra.mxu0 %v47_v5  ;;  %1676 = vmatpush3.msra.mxu1 %v47_v5  ;;  %v317_v11 = vld [vmem:[%s2416_s4 + $0x78] sm:$0xff]  ;;  %v316_v24 = vld [vmem:[%s2416_s4 + $0x70] sm:$0xff]  ;;  %v1433_v29 = vld [vmem:[%s2416_s4 + $0xe8] sm:$0xff]  ;;  %p2044_p5 = scmp.ne.s32.totalorder %s1393_s30, %s2043_s10  ;;  %p2048_p6 = scmp.lt.s32.totalorder %s1393_s30, %s1393_s30 }
  0x13   :  { %1667 = vmatprep.subr.mxu0 %v46_v6  ;;  %1677 = vmatprep.subr.mxu1 %v46_v6  ;;  %v1435_v12 = vld [vmem:[%s2416_s4 + $0xf8] sm:$0xff]  ;;  %v1434_v25 = vld [vmem:[%s2416_s4 + $0xf0] sm:$0xff]  ;;  %v314_v32 = vld [vmem:[%s2416_s4 + $0x60] sm:$0xff]  ;;  %p2049_p7 = scmp.lt.s32.totalorder %s2047_s2, %s2043_s10 }
  0x14   :  { %86 = vperm.xlu1 %2022, %v79_v3   ;;  %58 = vperm.xlu0 %2021, %v51_v4   ;;  %v1432_v33 = vld [vmem:[%s2416_s4 + $0xe0] sm:$0xff]  ;;  %v313_v36 = vld [vmem:[%s2416_s4 + $0x58] sm:$0xff]  ;;  %v312_v40 = vld [vmem:[%s2416_s4 + $0x50] sm:$0xff] }
  0x15   :  { %1668 = vmatpush3.msra.mxu0 %v46_v6  ;;  %1678 = vmatpush3.msra.mxu1 %v46_v6  ;;  %v1431_v39 = vld [vmem:[%s2416_s4 + $0xd8] sm:$0xff]  ;;  %v1430_v41 = vld [vmem:[%s2416_s4 + $0xd0] sm:$0xff]  ;;  %v311_v42 = vld [vmem:[%s2416_s4 + $0x48] sm:$0xff]  ;;  %p2050_p8 = por %p2049_p7, %p2048_p6 }
  0x16   :  { %1685 = vmatprep.subr.mxu0 %v317_v11  ;;  %1729 = vmatprep.subr.mxu1 %v1435_v12  ;;  %v1429_v43 = vld [vmem:[%s2416_s4 + $0xc8] sm:$0xff]  ;;  %v310_v44 = vld [vmem:[%s2416_s4 + $0x40] sm:$0xff]  ;;  %v309_v46 = vld [vmem:[%s2416_s4 + $0x38] sm:$0xff] }
  0x17   :  { %v1428_v45 = vld [vmem:[%s2416_s4 + $0xc0] sm:$0xff]  ;;  %v1427_v47 = vld [vmem:[%s2416_s4 + $0xb8] sm:$0xff]  ;;  %v308_v48 = vld [vmem:[%s2416_s4 + $0x30] sm:$0xff]  ;;  %p2051_p9 = pnand %p2050_p8, %p2044_p5 }
  0x18   :  { %64 = vperm.xlu1 %2022, %v53_v7   ;;  %61 = vperm.xlu0 %2021, %v52_v8   ;;  %v1426_v49 = vld [vmem:[%s2416_s4 + $0xb0] sm:$0xff]  ;;  %v307_v50 = vld [vmem:[%s2416_s4 + $0x28] sm:$0xff]  ;;  %v306_v52 = vld [vmem:[%s2416_s4 + $0x20] sm:$0xff] }
  0x19   :  { %v1425_v51 = vld [vmem:[%s2416_s4 + $0xa8] sm:$0xff]  ;;  %v1424_v53 = vld [vmem:[%s2416_s4 + $0xa0] sm:$0xff]  ;;  %v305_v54 = vld [vmem:[%s2416_s4 + $0x18] sm:$0xff] }
  0x1a   :  { %v1423_v55 = vld [vmem:[%s2416_s4 + $0x98] sm:$0xff]  ;;  %v304_v56 = vld [vmem:[%s2416_s4 + $0x10] sm:$0xff]  ;;  %v303_v58 = vld [vmem:[%s2416_s4 + $0x8] sm:$0xff] }
  0x1b   :  { %v1422_v57 = vld [vmem:[%s2416_s4 + $0x90] sm:$0xff]  ;;  %v1421_v59 = vld [vmem:[%s2416_s4 + $0x88] sm:$0xff]  ;;  %v302_v60 = vld [vmem:[%s2416_s4] sm:$0xff] }
  0x1c   :  { %92 = vperm.xlu1 %2022, %v81_v9   ;;  %89 = vperm.xlu0 %2021, %v80_v10   ;;  %v1420_v61 = vld [vmem:[%s2416_s4 + $0x80] sm:$0xff]  ;;  %v1451_v62 = vld [vmem:[%s2416_s4 + $0x178] sm:$0xff]  ;;  %v1450_v3 = vld [vmem:[%s2416_s4 + $0x170] sm:$0xff] }
  0x1d   :  { %v1449_v5 = vld [vmem:[%s2416_s4 + $0x168] sm:$0xff]  ;;  %v1448_v7 = vld [vmem:[%s2416_s4 + $0x160] sm:$0xff]  ;;  %v1447_v10 = vld [vmem:[%s2416_s4 + $0x158] sm:$0xff] }
  0x1e   :  { %v1444_v13 = vld [vmem:[%s2416_s4 + $0x140] sm:$0xff] }
  0x8b   :  { %v84_v15 = vpop.permute.xlu1 %83  ;;  %v56_v16 = vpop.permute.xlu0 %55 }
  0x8c   :  { %vm94_vm1 = vcmp.eq.s32.totalorder %v49_v14, %v84_v15  ;;  %vm66_vm2 = vcmp.eq.s32.totalorder %v49_v14, %v56_v16  ;;  %v1442_v15 = vld [vmem:[%s2416_s4 + $0x130] sm:$0xff]  ;;  %v1441_v16 = vld [vmem:[%s2416_s4 + $0x128] sm:$0xff] }
  0x8d   :  { %v1403_v18 = vsel %vm66_vm2, 1.0, %v2071_v17  ;;  %v1407_v19 = vsel %vm94_vm1, 1.0, %v2071_v17 }
  0x8e   :  { %1669 = vmatprep.mubr.msk.f32.mxu0 %vm106_vm0, %v1403_v18  ;;  %1679 = vmatprep.mubr.msk.f32.mxu1 %vm106_vm0, %v1407_v19  ;;  %v1440_v18 = vld [vmem:[%s2416_s4 + $0x120] sm:$0xff]  ;;  %v1439_v19 = vld [vmem:[%s2416_s4 + $0x118] sm:$0xff] }
  0x8f   :  { %v87_v20 = vpop.permute.xlu1 %86  ;;  %v59_v21 = vpop.permute.xlu0 %58 }
  0x90   :  { %vm95_vm3 = vcmp.eq.s32.totalorder %v49_v14, %v87_v20  ;;  %vm67_vm4 = vcmp.eq.s32.totalorder %v49_v14, %v59_v21  ;;  %v1438_v20 = vld [vmem:[%s2416_s4 + $0x110] sm:$0xff]  ;;  %v1437_v21 = vld [vmem:[%s2416_s4 + $0x108] sm:$0xff] }
  0x91   :  { %v1408_v22 = vsel %vm95_vm3, 1.0, %v2071_v17  ;;  %v1404_v23 = vsel %vm67_vm4, 1.0, %v2071_v17 }
  0x92   :  { %1670 = vmatmul.mubr.msk.f32.vlgmr.msra.gmra.mxu0 %vm106_vm0, %v1404_v23  ;;  %1680 = vmatmul.mubr.msk.f32.vlgmr.msra.gmra.mxu1 %vm106_vm0, %v1408_v22  ;;  %v1436_v22 = vld [vmem:[%s2416_s4 + $0x100] sm:$0xff]  ;;  %v1469_v23 = vld [vmem:[%s2416_s4 + $0x1f8] sm:$0xff] }
  0x93   :  { %v65_v26 = vpop.permute.xlu1 %64  ;;  %v62_v27 = vpop.permute.xlu0 %61  ;;  %1686 = vmatpush3.msra.mxu0 %v317_v11  ;;  %1730 = vmatpush3.msra.mxu1 %v1435_v12  ;;  %v1446_v11 = vld [vmem:[%s2416_s4 + $0x150] sm:$0xff]  ;;  %v1445_v12 = vld [vmem:[%s2416_s4 + $0x148] sm:$0xff] }
  0x94   :  { %vm69_vm5 = vcmp.eq.s32.totalorder %v49_v14, %v65_v26  ;;  %vm68_vm6 = vcmp.eq.s32.totalorder %v49_v14, %v62_v27  ;;  %1687 = vmatprep.subr.mxu0 %v316_v24  ;;  %1731 = vmatprep.subr.mxu1 %v1434_v25  ;;  %v1466_v26 = vld [vmem:[%s2416_s4 + $0x1e0] sm:$0xff]  ;;  %v1465_v27 = vld [vmem:[%s2416_s4 + $0x1d8] sm:$0xff] }
  0x95   :  { %v1406_v30 = vsel %vm69_vm5, 1.0, %v2071_v17  ;;  %v1405_v31 = vsel %vm68_vm6, 1.0, %v2071_v17  ;;  %1688 = vmatpush3.msra.mxu0 %v316_v24  ;;  %1732 = vmatpush3.msra.mxu1 %v1434_v25  ;;  %v1468_v24 = vld [vmem:[%s2416_s4 + $0x1f0] sm:$0xff]  ;;  %v1467_v25 = vld [vmem:[%s2416_s4 + $0x1e8] sm:$0xff] }
  0x96   :  { %1672 = vmatprep.mubr.msk.f32.mxu0 %vm106_vm0, %v1405_v31  ;;  %1689 = vmatprep.subr.mxu0 %v315_v28  ;;  %v1461_v31 = vld [vmem:[%s2416_s4 + $0x1b8] sm:$0xff] }
  0x97   :  { %v93_v34 = vpop.permute.xlu1 %92  ;;  %v90_v35 = vpop.permute.xlu0 %89  ;;  %1673 = vmatmul.mubr.msk.f32.gmra.mxu0 %vm106_vm0, %v1406_v30  ;;  %1733 = vmatprep.subr.mxu1 %v1433_v29  ;;  %v1462_v30 = vld [vmem:[%s2416_s4 + $0x1c0] sm:$0xff] }
  0x98   :  { %vm97_vm7 = vcmp.eq.s32.totalorder %v49_v14, %v93_v34  ;;  %vm96_vm8 = vcmp.eq.s32.totalorder %v49_v14, %v90_v35  ;;  %1690 = vmatpush3.msra.mxu0 %v315_v28  ;;  %1734 = vmatpush3.msra.mxu1 %v1433_v29  ;;  %v1443_v14 = vld [vmem:[%s2416_s4 + $0x138] sm:$0xff]  ;;  %v1464_v28 = vld [vmem:[%s2416_s4 + $0x1d0] sm:$0xff]  ;;  %v1463_v29 = vld [vmem:[%s2416_s4 + $0x1c8] sm:$0xff] }
  0x99   :  { %v1410_v37 = vsel %vm97_vm7, 1.0, %v2071_v17  ;;  %v1409_v38 = vsel %vm96_vm8, 1.0, %v2071_v17  ;;  %1691 = vmatprep.subr.mxu0 %v314_v32  ;;  %1735 = vmatprep.subr.mxu1 %v1432_v33  ;;  %v1458_v34 = vld [vmem:[%s2416_s4 + $0x1a0] sm:$0xff] }
  0x9a   :  { %1682 = vmatprep.mubr.msk.f32.mxu1 %vm106_vm0, %v1409_v38  ;;  %1692 = vmatpush3.msra.mxu0 %v314_v32  ;;  %v1460_v32 = vld [vmem:[%s2416_s4 + $0x1b0] sm:$0xff]  ;;  %v1419_v35 = vld [vmem:[%s2417_s5] ss:$0 sm:$0xff] }
  0x9b   :  { %1683 = vmatmul.mubr.msk.f32.gmra.mxu1 %vm106_vm0, %v1410_v37  ;;  %1693 = vmatprep.subr.mxu0 %v313_v36 }
  0x9c   :  { %1736 = vmatpush3.msra.mxu1 %v1432_v33  ;;  %1694 = vmatpush3.msra.mxu0 %v313_v36  ;;  %v1459_v33 = vld [vmem:[%s2416_s4 + $0x1a8] sm:$0xff] }
  0x9d   :  { %1737 = vmatprep.subr.mxu1 %v1431_v39  ;;  %1695 = vmatprep.subr.mxu0 %v312_v40 }
  0x9e   :  { %1738 = vmatpush3.msra.mxu1 %v1431_v39  ;;  %1696 = vmatpush3.msra.mxu0 %v312_v40 }
  0x9f   :  { %1739 = vmatprep.subr.mxu1 %v1430_v41  ;;  %1697 = vmatprep.subr.mxu0 %v311_v42 }
  0xa0   :  { %1740 = vmatpush3.msra.mxu1 %v1430_v41  ;;  %1698 = vmatpush3.msra.mxu0 %v311_v42 }
  0xa1   :  { %1741 = vmatprep.subr.mxu1 %v1429_v43  ;;  %1699 = vmatprep.subr.mxu0 %v310_v44 }
  0xa2   :  { %1742 = vmatpush3.msra.mxu1 %v1429_v43  ;;  %1700 = vmatpush3.msra.mxu0 %v310_v44 }
  0xa3   :  { %1743 = vmatprep.subr.mxu1 %v1428_v45  ;;  %1701 = vmatprep.subr.mxu0 %v309_v46 }
  0xa4   :  { %1744 = vmatpush3.msra.mxu1 %v1428_v45  ;;  %1702 = vmatpush3.msra.mxu0 %v309_v46 }
  0xa5   :  { %1745 = vmatprep.subr.mxu1 %v1427_v47  ;;  %1703 = vmatprep.subr.mxu0 %v308_v48 }
  0xa6   :  { %1746 = vmatpush3.msra.mxu1 %v1427_v47  ;;  %1704 = vmatpush3.msra.mxu0 %v308_v48 }
  0xa7   :  { %1747 = vmatprep.subr.mxu1 %v1426_v49  ;;  %1705 = vmatprep.subr.mxu0 %v307_v50 }
  0xa8   :  { %1748 = vmatpush3.msra.mxu1 %v1426_v49  ;;  %1706 = vmatpush3.msra.mxu0 %v307_v50 }
  0xa9   :  { %1749 = vmatprep.subr.mxu1 %v1425_v51  ;;  %1707 = vmatprep.subr.mxu0 %v306_v52 }
  0xaa   :  { %1750 = vmatpush3.msra.mxu1 %v1425_v51  ;;  %1708 = vmatpush3.msra.mxu0 %v306_v52 }
  0xab   :  { %1751 = vmatprep.subr.mxu1 %v1424_v53  ;;  %1709 = vmatprep.subr.mxu0 %v305_v54 }
  0xac   :  { %1752 = vmatpush3.msra.mxu1 %v1424_v53  ;;  %1710 = vmatpush3.msra.mxu0 %v305_v54 }
  0xad   :  { %1753 = vmatprep.subr.mxu1 %v1423_v55  ;;  %1711 = vmatprep.subr.mxu0 %v304_v56 }
  0xae   :  { %1754 = vmatpush3.msra.mxu1 %v1423_v55  ;;  %1712 = vmatpush3.msra.mxu0 %v304_v56 }
  0xaf   :  { %1755 = vmatprep.subr.mxu1 %v1422_v57  ;;  %1713 = vmatprep.subr.mxu0 %v303_v58 }
  0xb0   :  { %1756 = vmatpush3.msra.mxu1 %v1422_v57  ;;  %1714 = vmatpush3.msra.mxu0 %v303_v58 }
  0xb1   :  { %1757 = vmatprep.subr.mxu1 %v1421_v59  ;;  %1715 = vmatprep.subr.mxu0 %v302_v60 }
  0xb2   :  { %1758 = vmatpush3.msra.mxu1 %v1421_v59  ;;  %1716 = vmatpush3.msra.mxu0 %v302_v60 }
  0xb3   :  { %1759 = vmatprep.subr.mxu1 %v1420_v61  ;;  %1773 = vmatprep.subr.mxu0 %v1451_v62 }
  0xb4   :  { %1760 = vmatpush3.msra.mxu1 %v1420_v61 }
  0xb5   :  { %1817 = vmatprep.subr.mxu1 %v1469_v23 }
 0x152   :  { %v1671_v63 = vpop.f32.mrf.mxu0  ;;  %v1681_v0 = vpop.f32.mrf.mxu1 }
 0x154   :  { %v185_v1 = vpop.f32.mrf.mxu0  ;;  %v282_v2 = vpop.f32.mrf.mxu1 }
 0x155   :  { %1717 = vmatprep.mubr.f32.mxu0 %v185_v1  ;;  %1761 = vmatprep.mubr.f32.mxu1 %v282_v2 }
 0x156   :  { %1718 = vmatmul.mubr.f32.vlgmr.msra.gmra.mxu0 %v1671_v63  ;;  %1762 = vmatmul.mubr.f32.vlgmr.msra.gmra.mxu1 %v1681_v0 }
 0x157   :  { %v1674_v4 = vpop.f32.mrf.mxu0  ;;  %1774 = vmatpush3.msra.mxu0 %v1451_v62  ;;  %1818 = vmatpush3.msra.mxu1 %v1469_v23  ;;  %v1455_v23 = vld [vmem:[%s2416_s4 + $0x188] sm:$0xff] }
 0x158   :  { %1775 = vmatprep.subr.mxu0 %v1450_v3  ;;  %1819 = vmatprep.subr.mxu1 %v1468_v24 }
 0x159   :  { %v195_v6 = vpop.f32.mrf.mxu0  ;;  %1776 = vmatpush3.msra.mxu0 %v1450_v3  ;;  %1820 = vmatpush3.msra.mxu1 %v1468_v24  ;;  %v1454_v24 = vld [vmem:[%s2416_s4 + $0x180] sm:$0xff] }
 0x15a   :  { %1720 = vmatprep.mubr.f32.mxu0 %v195_v6  ;;  %1777 = vmatprep.subr.mxu0 %v1449_v5 }
 0x15b   :  { %v1684_v8 = vpop.f32.mrf.mxu1  ;;  %1721 = vmatmul.mubr.f32.gmra.mxu0 %v1674_v4  ;;  %1821 = vmatprep.subr.mxu1 %v1467_v25 }
 0x15c   :  { %1723 = vmatprep.mubr.f32.mxu0 %v282_v2  ;;  %1778 = vmatpush3.msra.mxu0 %v1449_v5 }
 0x15d   :  { %v292_v9 = vpop.f32.mrf.mxu1  ;;  %1779 = vmatprep.subr.mxu0 %v1448_v7  ;;  %1822 = vmatpush3.msra.mxu1 %v1467_v25  ;;  %v934_v25 = vld [vmem:[#allocation2 + $0x78] sm:$0xff] }
 0x15e   :  { %1764 = vmatprep.mubr.f32.mxu1 %v292_v9  ;;  %1780 = vmatpush3.msra.mxu0 %v1448_v7 }
 0x15f   :  { %1724 = vmatmul.mubr.f32.gmra.mxu0 %v1681_v0  ;;  %1765 = vmatmul.mubr.f32.gmra.mxu1 %v1684_v8 }
 0x160   :  { %1726 = vmatprep.mubr.f32.mxu0 %v292_v9  ;;  %1767 = vmatprep.mubr.f32.mxu1 %v185_v1 }
 0x161   :  { %1781 = vmatprep.subr.mxu0 %v1447_v10  ;;  %1823 = vmatprep.subr.mxu1 %v1466_v26 }
 0x162   :  { %1782 = vmatpush3.msra.mxu0 %v1447_v10  ;;  %1824 = vmatpush3.msra.mxu1 %v1466_v26  ;;  %v1046_v26 = vld [vmem:[#allocation2 + $0xf8] sm:$0xff] }
 0x163   :  { %1727 = vmatmul.mubr.f32.gmra.mxu0 %v1684_v8  ;;  %1768 = vmatmul.mubr.f32.gmra.mxu1 %v1671_v63 }
 0x164   :  { %1770 = vmatprep.mubr.f32.mxu1 %v195_v6  ;;  %1783 = vmatprep.subr.mxu0 %v1446_v11 }
 0x165   :  { %1784 = vmatpush3.msra.mxu0 %v1446_v11  ;;  %1825 = vmatprep.subr.mxu1 %v1465_v27 }
 0x166   :  { %1785 = vmatprep.subr.mxu0 %v1445_v12  ;;  %1826 = vmatpush3.msra.mxu1 %v1465_v27  ;;  %v933_v27 = vld [vmem:[#allocation2 + $0x70] sm:$0xff] }
 0x167   :  { %1771 = vmatmul.mubr.f32.gmra.mxu1 %v1674_v4  ;;  %1786 = vmatpush3.msra.mxu0 %v1445_v12 }
 0x168   :  { %1787 = vmatprep.subr.mxu0 %v1444_v13  ;;  %1827 = vmatprep.subr.mxu1 %v1464_v28 }
 0x169   :  { %1788 = vmatpush3.msra.mxu0 %v1444_v13  ;;  %1828 = vmatpush3.msra.mxu1 %v1464_v28  ;;  %v932_v28 = vld [vmem:[#allocation2 + $0x68] sm:$0xff] }
 0x16a   :  { %1789 = vmatprep.subr.mxu0 %v1443_v14  ;;  %1829 = vmatprep.subr.mxu1 %v1463_v29 }
 0x16b   :  { %1790 = vmatpush3.msra.mxu0 %v1443_v14  ;;  %1830 = vmatpush3.msra.mxu1 %v1463_v29  ;;  %v931_v29 = vld [vmem:[#allocation2 + $0x60] sm:$0xff] }
 0x16c   :  { %1791 = vmatprep.subr.mxu0 %v1442_v15  ;;  %1831 = vmatprep.subr.mxu1 %v1462_v30 }
 0x16d   :  { %1792 = vmatpush3.msra.mxu0 %v1442_v15  ;;  %1832 = vmatpush3.msra.mxu1 %v1462_v30  ;;  %v930_v30 = vld [vmem:[#allocation2 + $0x58] sm:$0xff] }
 0x16e   :  { %1793 = vmatprep.subr.mxu0 %v1441_v16  ;;  %1833 = vmatprep.subr.mxu1 %v1461_v31 }
 0x16f   :  { %1794 = vmatpush3.msra.mxu0 %v1441_v16  ;;  %1834 = vmatpush3.msra.mxu1 %v1461_v31  ;;  %v929_v31 = vld [vmem:[#allocation2 + $0x50] sm:$0xff] }
 0x170   :  { %1795 = vmatprep.subr.mxu0 %v1440_v18  ;;  %1835 = vmatprep.subr.mxu1 %v1460_v32 }
 0x171   :  { %1796 = vmatpush3.msra.mxu0 %v1440_v18  ;;  %1836 = vmatpush3.msra.mxu1 %v1460_v32  ;;  %v1453_v32 = vld [vmem:[%s2417_s5 + $0x1] ss:$0 sm:$0xff] }
 0x172   :  { %1797 = vmatprep.subr.mxu0 %v1439_v19  ;;  %1837 = vmatprep.subr.mxu1 %v1459_v33 }
 0x173   :  { %1798 = vmatpush3.msra.mxu0 %v1439_v19  ;;  %1838 = vmatpush3.msra.mxu1 %v1459_v33 }
 0x174   :  { %1799 = vmatprep.subr.mxu0 %v1438_v20  ;;  %1839 = vmatprep.subr.mxu1 %v1458_v34 }
 0x175   :  { %1800 = vmatpush3.msra.mxu0 %v1438_v20  ;;  %1840 = vmatpush3.msra.mxu1 %v1458_v34 }
 0x176   :  { %1801 = vmatprep.subr.mxu0 %v1437_v21 }
 0x177   :  { %1802 = vmatpush3.msra.mxu0 %v1437_v21  ;;  %v1457_v21 = vld [vmem:[%s2416_s4 + $0x198] sm:$0xff] }
 0x178   :  { %1803 = vmatprep.subr.mxu0 %v1436_v22  ;;  %1841 = vmatprep.subr.mxu1 %v1457_v21 }
 0x179   :  { %1804 = vmatpush3.msra.mxu0 %v1436_v22  ;;  %1842 = vmatpush3.msra.mxu1 %v1457_v21  ;;  %v1456_v22 = vld [vmem:[%s2416_s4 + $0x190] sm:$0xff] }
 0x17a   :  { %1843 = vmatprep.subr.mxu1 %v1456_v22  ;;  %1861 = vmatprep.subr.mxu0 %v934_v25  ;;  %v921_v21 = vld [vmem:[#allocation2 + $0x10] sm:$0xff] }
 0x17b   :  { %1844 = vmatpush3.msra.mxu1 %v1456_v22  ;;  %v1033_v22 = vld [vmem:[#allocation2 + $0x90] sm:$0xff] }
 0x17c   :  { %1845 = vmatprep.subr.mxu1 %v1455_v23 }
 0x17d   :  { %1846 = vmatpush3.msra.mxu1 %v1455_v23  ;;  %v920_v23 = vld [vmem:[#allocation2 + $0x8] sm:$0xff] }
 0x17e   :  { %1847 = vmatprep.subr.mxu1 %v1454_v24 }
 0x17f   :  { %1848 = vmatpush3.msra.mxu1 %v1454_v24  ;;  %v1032_v24 = vld [vmem:[#allocation2 + $0x88] sm:$0xff] }
 0x180   :  { %1899 = vmatprep.subr.mxu1 %v1046_v26 }
 0x216   :  { %v1719_v36 = vpop.f32.mrf.mxu0  ;;  %v1763_v37 = vpop.f32.mrf.mxu1 }
 0x217   :  { %v430_v38 = vadd.f32 %v1719_v36, %v1419_v35 }
 0x218   :  { %v384_v39 = vpop.f32.mrf.mxu0  ;;  %v520_v42 = vpop.f32.mrf.mxu1 }
 0x219   :  { %v560_v40 = vadd.f32 %v1763_v37, %v430_v38  ;;  %v429_v41 = vadd.f32 %v1419_v35, %v384_v39 }
 0x21b   :  { %v559_v43 = vadd.f32 %v520_v42, %v429_v41  ;;  %v1722_v44 = vpop.f32.mrf.mxu0  ;;  %v576_v45 = vmul.f32 0.01, %v560_v40  ;;  %vm568_vm9 = vcmp.ge.f32.partialorder %v560_v40, 0.0 }
 0x21c   :  { %v432_v48 = vadd.f32 %v1722_v44, %v1419_v35 }
 0x21d   :  { %v575_v46 = vmul.f32 0.01, %v559_v43  ;;  %v394_v47 = vpop.f32.mrf.mxu0  ;;  %vm567_vm10 = vcmp.ge.f32.partialorder %v559_v43, 0.0  ;;  %v584_v52 = vsel %vm568_vm9, %v560_v40, %v576_v45  ;;  %vm891_vm9 = vcmask 0  }
 0x21e   :  { %v431_v53 = vadd.f32 %v1419_v35, %v394_v47  ;;  %892 = vst.msk [vmem:[#allocation5] sm:$0x1] %vm891_vm9, %v2071_v17  ;;  %v1279_v17 = vld [vmem:[#allocation2 + $0x1c0] sm:$0xff] }
 0x21f   :  { %v1725_v49 = vpop.f32.mrf.mxu0  ;;  %v1766_v50 = vpop.f32.mrf.mxu1  ;;  %v583_v51 = vsel %vm567_vm10, %v559_v43, %v575_v46  ;;  %v1045_v43 = vld [vmem:[#allocation2 + $0xf0] sm:$0xff]  ;;  %v1044_v46 = vld [vmem:[#allocation2 + $0xe8] sm:$0xff] }
 0x220   :  { %v562_v54 = vadd.f32 %v1766_v50, %v432_v48  ;;  %1805 = vmatprep.mubr.f32.mxu0 %v583_v51  ;;  %v434_v57 = vadd.f32 %v1725_v49, %v1419_v35  ;;  %v1043_v51 = vld [vmem:[#allocation2 + $0xe0] sm:$0xff] }
 0x221   :  { %v404_v55 = vpop.f32.mrf.mxu0  ;;  %v530_v56 = vpop.f32.mrf.mxu1  ;;  %1806 = vmatmul.mubr.f32.vlgmr.msra.gmra.mxu0 %v584_v52 }
 0x222   :  { %v561_v58 = vadd.f32 %v530_v56, %v431_v53  ;;  %v578_v59 = vmul.f32 0.01, %v562_v54  ;;  %v433_v60 = vadd.f32 %v1419_v35, %v404_v55  ;;  %vm570_vm12 = vcmp.ge.f32.partialorder %v562_v54, 0.0  ;;  %1862 = vmatpush3.msra.mxu0 %v934_v25  ;;  %v919_v25 = vld [vmem:[#allocation2] sm:$0xff] }
 0x223   :  { %v1728_v61 = vpop.f32.mrf.mxu0  ;;  %v1769_v62 = vpop.f32.mrf.mxu1  ;;  %1863 = vmatprep.subr.mxu0 %v933_v27 }
 0x224   :  { %v577_v63 = vmul.f32 0.01, %v561_v58  ;;  %v564_v0 = vadd.f32 %v1769_v62, %v434_v57  ;;  %vm569_vm11 = vcmp.ge.f32.partialorder %v561_v58, 0.0  ;;  %v436_v3 = vadd.f32 %v1728_v61, %v1419_v35  ;;  %1864 = vmatpush3.msra.mxu0 %v933_v27  ;;  %v1041_v62 = vld [vmem:[#allocation2 + $0xd0] sm:$0xff]  ;;  %v914_v27 = vld [vmem:[%s2415_s3] sm:$0xff] }
 0x225   :  { %v414_v1 = vpop.f32.mrf.mxu0  ;;  %v540_v2 = vpop.f32.mrf.mxu1  ;;  %v586_v9 = vsel %vm570_vm12, %v562_v54, %v578_v59  ;;  %1865 = vmatprep.subr.mxu0 %v932_v28 }
 0x226   :  { %v563_v4 = vadd.f32 %v540_v2, %v433_v60  ;;  %v585_v5 = vsel %vm569_vm11, %v561_v58, %v577_v63  ;;  %v580_v6 = vmul.f32 0.01, %v564_v0  ;;  %v435_v7 = vadd.f32 %v1419_v35, %v414_v1  ;;  %1866 = vmatpush3.msra.mxu0 %v932_v28  ;;  %v1042_v58 = vld [vmem:[#allocation2 + $0xd8] sm:$0xff]  ;;  %v915_v28 = vld [vmem:[%s2415_s3 + $0x8] sm:$0xff] }
 0x227   :  { %v1772_v8 = vpop.f32.mrf.mxu1  ;;  %1808 = vmatprep.mubr.f32.mxu0 %v585_v5  ;;  %vm572_vm14 = vcmp.ge.f32.partialorder %v564_v0, 0.0  ;;  %1867 = vmatprep.subr.mxu0 %v931_v29 }
 0x228   :  { %v579_v10 = vmul.f32 0.01, %v563_v4  ;;  %v566_v11 = vadd.f32 %v1772_v8, %v436_v3  ;;  %1809 = vmatmul.mubr.f32.gmra.mxu0 %v586_v9  ;;  %vm571_vm13 = vcmp.ge.f32.partialorder %v563_v4, 0.0  ;;  %v588_v16 = vsel %vm572_vm14, %v564_v0, %v580_v6  ;;  %v928_v6 = vld [vmem:[#allocation2 + $0x48] sm:$0xff]  ;;  %v927_v8 = vld [vmem:[#allocation2 + $0x40] sm:$0xff] }
 0x229   :  { %v550_v12 = vpop.f32.mrf.mxu1  ;;  %1868 = vmatpush3.msra.mxu0 %v931_v29  ;;  %v1039_v9 = vld [vmem:[#allocation2 + $0xc0] sm:$0xff]  ;;  %v916_v29 = vld [vmem:[%s2415_s3 + $0x10] sm:$0xff] }
 0x22a   :  { %v565_v13 = vadd.f32 %v550_v12, %v435_v7  ;;  %v587_v14 = vsel %vm571_vm13, %v563_v4, %v579_v10  ;;  %v582_v15 = vmul.f32 0.01, %v566_v11  ;;  %vm574_vm0 = vcmp.ge.f32.partialorder %v566_v11, 0.0  ;;  %1869 = vmatprep.subr.mxu0 %v930_v30  ;;  %v1040_v7 = vld [vmem:[#allocation2 + $0xc8] sm:$0xff]  ;;  %v926_v10 = vld [vmem:[#allocation2 + $0x38] sm:$0xff]  ;;  %v925_v12 = vld [vmem:[#allocation2 + $0x30] sm:$0xff] }
 0x22b   :  { %1811 = vmatprep.mubr.f32.mxu0 %v587_v14  ;;  %1870 = vmatpush3.msra.mxu0 %v930_v30  ;;  %v924_v14 = vld [vmem:[#allocation2 + $0x28] sm:$0xff]  ;;  %v917_v30 = vld [vmem:[%s2415_s3 + $0x18] sm:$0xff] }
 0x22c   :  { %v581_v18 = vmul.f32 0.01, %v565_v13  ;;  %1812 = vmatmul.mubr.f32.gmra.mxu0 %v588_v16  ;;  %vm573_vm15 = vcmp.ge.f32.partialorder %v565_v13, 0.0  ;;  %v590_v20 = vsel %vm574_vm0, %v566_v11, %v582_v15  ;;  %1871 = vmatprep.subr.mxu0 %v929_v31  ;;  %v1038_v11 = vld [vmem:[#allocation2 + $0xb8] sm:$0xff]  ;;  %v1036_v15 = vld [vmem:[#allocation2 + $0xa8] sm:$0xff]  ;;  %v923_v16 = vld [vmem:[#allocation2 + $0x20] sm:$0xff] }
 0x22d   :  { %1872 = vmatpush3.msra.mxu0 %v929_v31 }
 0x22e   :  { %v589_v19 = vsel %vm573_vm15, %v565_v13, %v581_v18  ;;  %1873 = vmatprep.subr.mxu0 %v928_v6  ;;  %v1037_v13 = vld [vmem:[#allocation2 + $0xb0] sm:$0xff]  ;;  %v1035_v18 = vld [vmem:[#allocation2 + $0xa0] sm:$0xff] }
 0x22f   :  { %1814 = vmatprep.mubr.f32.mxu0 %v589_v19  ;;  %1874 = vmatpush3.msra.mxu0 %v928_v6  ;;  %v922_v19 = vld [vmem:[#allocation2 + $0x18] sm:$0xff]  ;;  %v1161_v6 = vld [vmem:[#allocation2 + $0x160] sm:$0xff] }
 0x230   :  { %1815 = vmatmul.mubr.f32.gmra.mxu0 %v590_v20  ;;  %1875 = vmatprep.subr.mxu0 %v927_v8  ;;  %v1034_v20 = vld [vmem:[#allocation2 + $0x98] sm:$0xff] }
 0x231   :  { %1876 = vmatpush3.msra.mxu0 %v927_v8  ;;  %v1159_v8 = vld [vmem:[#allocation2 + $0x150] sm:$0xff] }
 0x232   :  { %1877 = vmatprep.subr.mxu0 %v926_v10 }
 0x233   :  { %1878 = vmatpush3.msra.mxu0 %v926_v10  ;;  %v1157_v10 = vld [vmem:[#allocation2 + $0x140] sm:$0xff] }
 0x234   :  { %1879 = vmatprep.subr.mxu0 %v925_v12 }
 0x235   :  { %1880 = vmatpush3.msra.mxu0 %v925_v12  ;;  %v1155_v12 = vld [vmem:[#allocation2 + $0x130] sm:$0xff] }
 0x236   :  { %1881 = vmatprep.subr.mxu0 %v924_v14 }
 0x237   :  { %1882 = vmatpush3.msra.mxu0 %v924_v14  ;;  %v1153_v14 = vld [vmem:[#allocation2 + $0x120] sm:$0xff] }
 0x238   :  { %1883 = vmatprep.subr.mxu0 %v923_v16 }
 0x239   :  { %1884 = vmatpush3.msra.mxu0 %v923_v16  ;;  %v1151_v16 = vld [vmem:[#allocation2 + $0x110] sm:$0xff] }
 0x23a   :  { %1885 = vmatprep.subr.mxu0 %v922_v19 }
 0x23b   :  { %1886 = vmatpush3.msra.mxu0 %v922_v19  ;;  %v1149_v19 = vld [vmem:[#allocation2 + $0x100] sm:$0xff] }
 0x23c   :  { %1887 = vmatprep.subr.mxu0 %v921_v21 }
 0x23d   :  { %1888 = vmatpush3.msra.mxu0 %v921_v21  ;;  %v1285_v21 = vld [vmem:[#allocation2 + $0x1f0] sm:$0xff] }
 0x23e   :  { %1889 = vmatprep.subr.mxu0 %v920_v23 }
 0x23f   :  { %1890 = vmatpush3.msra.mxu0 %v920_v23  ;;  %v1283_v23 = vld [vmem:[#allocation2 + $0x1e0] sm:$0xff] }
 0x240   :  { %1891 = vmatprep.subr.mxu0 %v919_v25 }
 0x241   :  { %1892 = vmatpush3.msra.mxu0 %v919_v25  ;;  %v1281_v25 = vld [vmem:[#allocation2 + $0x1d0] sm:$0xff] }
 0x2e1   :  { %v1807_v33 = vpop.f32.mrf.mxu0 }
 0x2e2   :  { %v688_v34 = vadd.f32 %v1807_v33, %v1453_v32 }
 0x2e3   :  { %v682_v35 = vpop.f32.mrf.mxu0 }
 0x2e4   :  { %v683_v36 = vadd.f32 %v1453_v32, %v682_v35  ;;  %v730_v37 = vmul.f32 0.01, %v688_v34  ;;  %vm722_vm1 = vcmp.ge.f32.partialorder %v688_v34, 0.0  ;;  %v1471_v35 = vld [vmem:[%s2417_s5 + $0x2] ss:$0 sm:$0xff] }
 0x2e6   :  { %v729_v38 = vmul.f32 0.01, %v683_v36  ;;  %vm721_vm2 = vcmp.ge.f32.partialorder %v683_v36, 0.0  ;;  %v738_v41 = vsel %vm722_vm1, %v688_v34, %v730_v37 }
 0x2e8   :  { %v1810_v39 = vpop.f32.mrf.mxu0  ;;  %v737_v40 = vsel %vm721_vm2, %v683_v36, %v729_v38 }
 0x2e9   :  { %v698_v42 = vadd.f32 %v1810_v39, %v1453_v32  ;;  %1849 = vmatprep.mubr.f32.mxu1 %v737_v40 }
 0x2ea   :  { %v692_v44 = vpop.f32.mrf.mxu0  ;;  %1850 = vmatmul.mubr.f32.vlgmr.msra.gmra.mxu1 %v738_v41 }
 0x2eb   :  { %v693_v45 = vadd.f32 %v1453_v32, %v692_v44  ;;  %1900 = vmatpush3.msra.mxu1 %v1046_v26  ;;  %v732_v47 = vmul.f32 0.01, %v698_v42  ;;  %vm724_vm4 = vcmp.ge.f32.partialorder %v698_v42, 0.0  ;;  %v1031_v26 = vld [vmem:[#allocation2 + $0x80] sm:$0xff] }
 0x2ec   :  { %v1813_v48 = vpop.f32.mrf.mxu0  ;;  %1901 = vmatprep.subr.mxu1 %v1045_v43 }
 0x2ed   :  { %v731_v49 = vmul.f32 0.01, %v693_v45  ;;  %v708_v50 = vadd.f32 %v1813_v48, %v1453_v32  ;;  %vm723_vm3 = vcmp.ge.f32.partialorder %v693_v45, 0.0  ;;  %1902 = vmatpush3.msra.mxu1 %v1045_v43  ;;  %v740_v57 = vsel %vm724_vm4, %v698_v42, %v732_v47 }
 0x2ee   :  { %v702_v52 = vpop.f32.mrf.mxu0  ;;  %1903 = vmatprep.subr.mxu1 %v1044_v46 }
 0x2ef   :  { %v703_v53 = vadd.f32 %v1453_v32, %v702_v52  ;;  %v739_v54 = vsel %vm723_vm3, %v693_v45, %v731_v49  ;;  %1904 = vmatpush3.msra.mxu1 %v1044_v46  ;;  %v734_v55 = vmul.f32 0.01, %v708_v50  ;;  %vm726_vm6 = vcmp.ge.f32.partialorder %v708_v50, 0.0 }
 0x2f0   :  { %v1816_v56 = vpop.f32.mrf.mxu0  ;;  %1852 = vmatprep.mubr.f32.mxu1 %v739_v54  ;;  %1905 = vmatprep.subr.mxu1 %v1043_v51 }
 0x2f1   :  { %v733_v59 = vmul.f32 0.01, %v703_v53  ;;  %v718_v60 = vadd.f32 %v1816_v56, %v1453_v32  ;;  %1853 = vmatmul.mubr.f32.gmra.mxu1 %v740_v57  ;;  %vm725_vm5 = vcmp.ge.f32.partialorder %v703_v53, 0.0  ;;  %v742_v2 = vsel %vm726_vm6, %v708_v50, %v734_v55 }
 0x2f2   :  { %v712_v61 = vpop.f32.mrf.mxu0  ;;  %1906 = vmatpush3.msra.mxu1 %v1043_v51 }
 0x2f3   :  { %v713_v63 = vadd.f32 %v1453_v32, %v712_v61  ;;  %v741_v0 = vsel %vm725_vm5, %v703_v53, %v733_v59  ;;  %1907 = vmatprep.subr.mxu1 %v1042_v58  ;;  %v736_v1 = vmul.f32 0.01, %v718_v60  ;;  %vm728_vm8 = vcmp.ge.f32.partialorder %v718_v60, 0.0 }
 0x2f4   :  { %1855 = vmatprep.mubr.f32.mxu1 %v741_v0  ;;  %1908 = vmatpush3.msra.mxu1 %v1042_v58 }
 0x2f5   :  { %v735_v3 = vmul.f32 0.01, %v713_v63  ;;  %1856 = vmatmul.mubr.f32.gmra.mxu1 %v742_v2  ;;  %vm727_vm7 = vcmp.ge.f32.partialorder %v713_v63, 0.0  ;;  %1909 = vmatprep.subr.mxu1 %v1041_v62  ;;  %v744_v5 = vsel %vm728_vm8, %v718_v60, %v736_v1 }
 0x2f6   :  { %1910 = vmatpush3.msra.mxu1 %v1041_v62 }
 0x2f7   :  { %v743_v4 = vsel %vm727_vm7, %v713_v63, %v735_v3  ;;  %1911 = vmatprep.subr.mxu1 %v1040_v7  ;;  %v1164_v3 = vld [vmem:[#allocation2 + $0x178] sm:$0xff] }
 0x2f8   :  { %1858 = vmatprep.mubr.f32.mxu1 %v743_v4  ;;  %1912 = vmatpush3.msra.mxu1 %v1040_v7  ;;  %v1163_v4 = vld [vmem:[#allocation2 + $0x170] sm:$0xff]  ;;  %v1160_v7 = vld [vmem:[#allocation2 + $0x158] sm:$0xff] }
 0x2f9   :  { %1859 = vmatmul.mubr.f32.gmra.mxu1 %v744_v5  ;;  %1913 = vmatprep.subr.mxu1 %v1039_v9  ;;  %v1162_v5 = vld [vmem:[#allocation2 + $0x168] sm:$0xff] }
 0x2fa   :  { %1914 = vmatpush3.msra.mxu1 %v1039_v9  ;;  %1931 = vmatprep.mubr.f32.mxu1 %v914_v27  ;;  %v1158_v9 = vld [vmem:[#allocation2 + $0x148] sm:$0xff]  ;;  %v1278_v27 = vld [vmem:[#allocation2 + $0x1b8] sm:$0xff] }
 0x2fb   :  { %1915 = vmatprep.subr.mxu1 %v1038_v11  ;;  %1937 = vmatprep.subr.mxu0 %v1164_v3 }
 0x2fc   :  { %1916 = vmatpush3.msra.mxu1 %v1038_v11  ;;  %v1156_v11 = vld [vmem:[#allocation2 + $0x138] sm:$0xff] }
 0x2fd   :  { %1917 = vmatprep.subr.mxu1 %v1037_v13 }
 0x2fe   :  { %1918 = vmatpush3.msra.mxu1 %v1037_v13  ;;  %v1154_v13 = vld [vmem:[#allocation2 + $0x128] sm:$0xff] }
 0x2ff   :  { %1919 = vmatprep.subr.mxu1 %v1036_v15 }
 0x300   :  { %1920 = vmatpush3.msra.mxu1 %v1036_v15  ;;  %v1152_v15 = vld [vmem:[#allocation2 + $0x118] sm:$0xff] }
 0x301   :  { %1921 = vmatprep.subr.mxu1 %v1035_v18 }
 0x302   :  { %1922 = vmatpush3.msra.mxu1 %v1035_v18  ;;  %v1150_v18 = vld [vmem:[#allocation2 + $0x108] sm:$0xff] }
 0x303   :  { %1923 = vmatprep.subr.mxu1 %v1034_v20 }
 0x304   :  { %1924 = vmatpush3.msra.mxu1 %v1034_v20  ;;  %v1286_v20 = vld [vmem:[#allocation2 + $0x1f8] sm:$0xff] }
 0x305   :  { %1925 = vmatprep.subr.mxu1 %v1033_v22 }
 0x306   :  { %1926 = vmatpush3.msra.mxu1 %v1033_v22  ;;  %v1284_v22 = vld [vmem:[#allocation2 + $0x1e8] sm:$0xff] }
 0x307   :  { %1927 = vmatprep.subr.mxu1 %v1032_v24 }
 0x308   :  { %1928 = vmatpush3.msra.mxu1 %v1032_v24  ;;  %v1282_v24 = vld [vmem:[#allocation2 + $0x1d8] sm:$0xff] }
 0x309   :  { %1929 = vmatprep.subr.mxu1 %v1031_v26 }
 0x30a   :  { %1930 = vmatpush3.msra.mxu1 %v1031_v26  ;;  %v1280_v26 = vld [vmem:[#allocation2 + $0x1c8] sm:$0xff] }
 0x30b   :  { %1932 = vmatmul.mubr.f32.vlgmr.msra.gmra.mxu1 %v915_v28  ;;  %1975 = vmatprep.subr.mxu1 %v1286_v20  ;;  %v1277_v28 = vld [vmem:[#allocation2 + $0x1b0] sm:$0xff] }
 0x30c   :  { %1934 = vmatprep.mubr.f32.mxu1 %v916_v29  ;;  %1976 = vmatpush3.msra.mxu1 %v1286_v20  ;;  %v1276_v29 = vld [vmem:[#allocation2 + $0x1a8] sm:$0xff] }
 0x30d   :  { %1977 = vmatprep.subr.mxu1 %v1285_v21 }
 0x30e   :  { %1978 = vmatpush3.msra.mxu1 %v1285_v21 }
 0x30f   :  { %1935 = vmatmul.mubr.f32.gmra.mxu1 %v917_v30  ;;  %1979 = vmatprep.subr.mxu1 %v1284_v22  ;;  %v1275_v30 = vld [vmem:[#allocation2 + $0x1a0] sm:$0xff] }
 0x310   :  { %1980 = vmatpush3.msra.mxu1 %v1284_v22 }
 0x311   :  { %1981 = vmatprep.subr.mxu1 %v1283_v23 }
 0x312   :  { %1982 = vmatpush3.msra.mxu1 %v1283_v23 }
 0x313   :  { %1983 = vmatprep.subr.mxu1 %v1282_v24 }
 0x314   :  { %1984 = vmatpush3.msra.mxu1 %v1282_v24 }
 0x315   :  { %1985 = vmatprep.subr.mxu1 %v1281_v25 }
 0x316   :  { %1986 = vmatpush3.msra.mxu1 %v1281_v25 }
 0x317   :  { %1987 = vmatprep.subr.mxu1 %v1280_v26 }
 0x318   :  { %1988 = vmatpush3.msra.mxu1 %v1280_v26 }
 0x319   :  { %1989 = vmatprep.subr.mxu1 %v1279_v17 }
 0x31a   :  { %1990 = vmatpush3.msra.mxu1 %v1279_v17 }
 0x31b   :  { %1991 = vmatprep.subr.mxu1 %v1278_v27 }
 0x31c   :  { %1992 = vmatpush3.msra.mxu1 %v1278_v27 }
 0x31d   :  { %1993 = vmatprep.subr.mxu1 %v1277_v28 }
 0x31e   :  { %1994 = vmatpush3.msra.mxu1 %v1277_v28 }
 0x31f   :  { %1995 = vmatprep.subr.mxu1 %v1276_v29 }
 0x320   :  { %1996 = vmatpush3.msra.mxu1 %v1276_v29 }
 0x321   :  { %1997 = vmatprep.subr.mxu1 %v1275_v30 }
 0x322   :  { %1998 = vmatpush3.msra.mxu1 %v1275_v30 }
 0x3aa   :  { %v1851_v31 = vpop.f32.mrf.mxu1 }
 0x3ab   :  { %v842_v38 = vadd.f32 %v1851_v31, %v1471_v35 }
 0x3ac   :  { %v836_v32 = vpop.f32.mrf.mxu1 }
 0x3ad   :  { %v837_v40 = vadd.f32 %v1471_v35, %v836_v32 }
 0x3b1   :  { %v1854_v33 = vpop.f32.mrf.mxu1 }
 0x3b2   :  { %v852_v47 = vadd.f32 %v1854_v33, %v1471_v35 }
 0x3b3   :  { %v846_v34 = vpop.f32.mrf.mxu1 }
 0x3b4   :  { %v847_v50 = vadd.f32 %v1471_v35, %v846_v34 }
 0x3b5   :  { %v1857_v36 = vpop.f32.mrf.mxu1 }
 0x3b6   :  { %v862_v37 = vadd.f32 %v1857_v36, %v1471_v35 }
 0x3b7   :  { %v856_v39 = vpop.f32.mrf.mxu1 }
 0x3b8   :  { %v857_v41 = vadd.f32 %v1471_v35, %v856_v39  ;;  %v876_v42 = vadd.f32 %v862_v37, %v842_v38  ;;  %v884_v44 = vsub.f32 %v842_v38, %v862_v37  ;;  %v1472_v39 = vld [vmem:[%s2419_s7] ss:$0 sm:$0xff] }
 0x3b9   :  { %v1860_v43 = vpop.f32.mrf.mxu1 }
 0x3ba   :  { %v875_v45 = vadd.f32 %v857_v41, %v837_v40  ;;  %v883_v46 = vsub.f32 %v837_v40, %v857_v41  ;;  %v872_v48 = vadd.f32 %v1860_v43, %v1471_v35  ;;  %v880_v54 = vmul.f32 0.5, %v876_v42 }
 0x3bb   :  { %v866_v49 = vpop.f32.mrf.mxu1  ;;  %v895_v56 = vmul.f32 %v884_v44, %v884_v44 }
 0x3bc   :  { %v879_v51 = vmul.f32 0.5, %v875_v45  ;;  %v894_v52 = vmul.f32 %v883_v46, %v883_v46  ;;  %v867_v53 = vadd.f32 %v1471_v35, %v866_v49  ;;  %v878_v55 = vadd.f32 %v872_v48, %v852_v47 }
 0x3bd   :  { %v886_v57 = vsub.f32 %v852_v47, %v872_v48 }
 0x3be   :  { %v877_v58 = vadd.f32 %v867_v53, %v847_v50  ;;  %v885_v59 = vsub.f32 %v847_v50, %v867_v53  ;;  %1893 = vmatprep.mubr.f32.mxu0 %v879_v51  ;;  %v898_v60 = vadd.f32 %v895_v56, %v894_v52  ;;  %v882_v63 = vmul.f32 0.5, %v878_v55 }
 0x3bf   :  { %1894 = vmatmul.mubr.f32.vlgmr.msra.gmra.mxu0 %v880_v54  ;;  %v897_v0 = vmul.f32 %v886_v57, %v886_v57 }
 0x3c0   :  { %v881_v61 = vmul.f32 0.5, %v877_v58  ;;  %v896_v62 = vmul.f32 %v885_v59, %v885_v59  ;;  %1938 = vmatpush3.msra.mxu0 %v1164_v3  ;;  %v1273_v3 = vld [vmem:[#allocation2 + $0x190] sm:$0xff] }
 0x3c1   :  { %1939 = vmatprep.subr.mxu0 %v1163_v4 }
 0x3c2   :  { %1896 = vmatprep.mubr.f32.mxu0 %v881_v61  ;;  %v899_v1 = vadd.f32 %v898_v60, %v896_v62  ;;  %1940 = vmatpush3.msra.mxu0 %v1163_v4  ;;  %v893_v61 = vld [vmem:[#allocation5] sm:$0x1]  ;;  %v1272_v4 = vld [vmem:[#allocation2 + $0x188] sm:$0xff] }
 0x3c3   :  { %1897 = vmatmul.mubr.f32.gmra.mxu0 %v882_v63  ;;  %1941 = vmatprep.subr.mxu0 %v1162_v5 }
 0x3c4   :  { %v900_v2 = vadd.f32 %v899_v1, %v897_v0  ;;  %1942 = vmatpush3.msra.mxu0 %v1162_v5  ;;  %v1271_v5 = vld [vmem:[#allocation2 + $0x180] sm:$0xff] }
 0x3c5   :  { %1943 = vmatprep.subr.mxu0 %v1161_v6 }
 0x3c6   :  { %901 = vadd.xlane.f32.xlu0 %v900_v2  ;;  %1944 = vmatpush3.msra.mxu0 %v1161_v6  ;;  %v1274_v2 = vld [vmem:[#allocation2 + $0x198] sm:$0xff]  ;;  %v1474_v6 = vld [vmem:[%s2419_s7 + $0x1] ss:$0 sm:$0xff] }
 0x3c7   :  { %1945 = vmatprep.subr.mxu0 %v1160_v7  ;;  %1999 = vmatprep.subr.mxu1 %v1274_v2 }
 0x3c8   :  { %1946 = vmatpush3.msra.mxu0 %v1160_v7  ;;  %2000 = vmatpush3.msra.mxu1 %v1274_v2 }
 0x3c9   :  { %1947 = vmatprep.subr.mxu0 %v1159_v8  ;;  %2001 = vmatprep.subr.mxu1 %v1273_v3 }
 0x3ca   :  { %1948 = vmatpush3.msra.mxu0 %v1159_v8  ;;  %2002 = vmatpush3.msra.mxu1 %v1273_v3 }
 0x3cb   :  { %1949 = vmatprep.subr.mxu0 %v1158_v9  ;;  %v1933_v38 = vpop.f32.mrf.mxu1  ;;  %2003 = vmatprep.subr.mxu1 %v1272_v4 }
 0x3cc   :  { %1950 = vmatpush3.msra.mxu0 %v1158_v9  ;;  %2004 = vmatpush3.msra.mxu1 %v1272_v4 }
 0x3cd   :  { %1951 = vmatprep.subr.mxu0 %v1157_v10  ;;  %v1113_v41 = vpop.f32.mrf.mxu1  ;;  %2005 = vmatprep.subr.mxu1 %v1271_v5 }
 0x3ce   :  { %1952 = vmatpush3.msra.mxu0 %v1157_v10  ;;  %2006 = vmatpush3.msra.mxu1 %v1271_v5 }
 0x3cf   :  { %1953 = vmatprep.subr.mxu0 %v1156_v11  ;;  %v1936_v47 = vpop.f32.mrf.mxu1 }
 0x3d0   :  { %1954 = vmatpush3.msra.mxu0 %v1156_v11 }
 0x3d1   :  { %1955 = vmatprep.subr.mxu0 %v1155_v12  ;;  %v1123_v55 = vpop.f32.mrf.mxu1 }
 0x3d2   :  { %1956 = vmatpush3.msra.mxu0 %v1155_v12 }
 0x3d3   :  { %1957 = vmatprep.subr.mxu0 %v1154_v13 }
 0x3d4   :  { %1958 = vmatpush3.msra.mxu0 %v1154_v13 }
 0x3d5   :  { %1959 = vmatprep.subr.mxu0 %v1153_v14 }
 0x3d6   :  { %1960 = vmatpush3.msra.mxu0 %v1153_v14 }
 0x3d7   :  { %1961 = vmatprep.subr.mxu0 %v1152_v15 }
 0x3d8   :  { %1962 = vmatpush3.msra.mxu0 %v1152_v15 }
 0x3d9   :  { %1963 = vmatprep.subr.mxu0 %v1151_v16 }
 0x3da   :  { %1964 = vmatpush3.msra.mxu0 %v1151_v16 }
 0x3db   :  { %1965 = vmatprep.subr.mxu0 %v1150_v18 }
 0x3dc   :  { %1966 = vmatpush3.msra.mxu0 %v1150_v18 }
 0x3dd   :  { %1967 = vmatprep.subr.mxu0 %v1149_v19 }
 0x3de   :  { %1968 = vmatpush3.msra.mxu0 %v1149_v19 }
 0x44f   :  { %v902_v31 = vpop.xlane.xlu0 %901 }
 0x450   :  { %v903_v32 = vrot.slane %v902_v31, 4 }
 0x452   :  { %v904_v33 = vadd.f32 %v903_v32, %v902_v31 }
 0x454   :  { %v905_v34 = vrot.slane %v904_v33, 2 }
 0x456   :  { %v906_v35 = vadd.f32 %v905_v34, %v904_v33 }
 0x458   :  { %v907_v36 = vrot.slane %v906_v35, 1 }
 0x45a   :  { %v908_v37 = vadd.f32 %v907_v36, %v906_v35 }
 0x45c   :  { %2013 = vpush %v908_v37 }
 0x47f   :  { %v1895_v40 = vpop.f32.mrf.mxu0 }
 0x480   :  { %v1027_v42 = vadd.f32 %v1895_v40, %v1472_v39 }
 0x481   :  { %v1001_v43 = vpop.f32.mrf.mxu0 }
 0x482   :  { %v1133_v44 = vadd.f32 %v1933_v38, %v1027_v42  ;;  %v1026_v45 = vadd.f32 %v1472_v39, %v1001_v43 }
 0x483   :  { %v1898_v46 = vpop.f32.mrf.mxu0 }
 0x484   :  { %v1132_v48 = vadd.f32 %v1113_v41, %v1026_v45  ;;  %v1029_v49 = vadd.f32 %v1898_v46, %v1472_v39  ;;  %v1141_v50 = vmul.f32 0.01, %v1133_v44  ;;  %vm1137_vm10 = vcmp.ge.f32.partialorder %v1133_v44, 0.0 }
 0x485   :  { %v1011_v51 = vpop.f32.mrf.mxu0 }
 0x486   :  { %v1140_v52 = vmul.f32 0.01, %v1132_v48  ;;  %v1135_v53 = vadd.f32 %v1936_v47, %v1029_v49  ;;  %v1028_v54 = vadd.f32 %v1472_v39, %v1011_v51  ;;  %vm1136_vm11 = vcmp.ge.f32.partialorder %v1132_v48, 0.0 }
 0x487   :  { %v1145_v58 = vsel %vm1137_vm10, %v1133_v44, %v1141_v50 }
 0x488   :  { %v1134_v56 = vadd.f32 %v1123_v55, %v1028_v54  ;;  %v1144_v57 = vsel %vm1136_vm11, %v1132_v48, %v1140_v52  ;;  %v1143_v59 = vmul.f32 0.01, %v1135_v53  ;;  %vm1139_vm13 = vcmp.ge.f32.partialorder %v1135_v53, 0.0 }
 0x489   :  { %1969 = vmatprep.mubr.f32.mxu0 %v1144_v57 }
 0x48a   :  { %v1142_v60 = vmul.f32 0.01, %v1134_v56  ;;  %1970 = vmatmul.mubr.f32.vlgmr.msra.gmra.mxu0 %v1145_v58  ;;  %vm1138_vm12 = vcmp.ge.f32.partialorder %v1134_v56, 0.0  ;;  %v1147_v63 = vsel %vm1139_vm13, %v1135_v53, %v1143_v59 }
 0x48c   :  { %v1146_v62 = vsel %vm1138_vm12, %v1134_v56, %v1142_v60 }
 0x48d   :  { %s2014_s26 = spop %2013  ;;  %1972 = vmatprep.mubr.f32.mxu0 %v1146_v62 }
 0x48e   :  { %v910_v0 = vstv %s2014_s26  ;;  %1973 = vmatmul.mubr.f32.gmra.mxu0 %v1147_v63 }
 0x48f   :  { %v911_v1 = vadd.f32 %v910_v0, %v893_v61 }
 0x491   :  { %913 = vst.msk [vmem:[#allocation5] sm:$0x1] %vm891_vm9, %v911_v1 }
 0x54a   :  { %v1971_v7 = vpop.f32.mrf.mxu0 }
 0x54b   :  { %v1245_v8 = vadd.f32 %v1971_v7, %v1474_v6 }
 0x54c   :  { %v1239_v9 = vpop.f32.mrf.mxu0 }
 0x54d   :  { %v1240_v10 = vadd.f32 %v1474_v6, %v1239_v9  ;;  %v1263_v11 = vmul.f32 0.01, %v1245_v8  ;;  %vm1259_vm14 = vcmp.ge.f32.partialorder %v1245_v8, 0.0 }
 0x54e   :  { %v1974_v12 = vpop.f32.mrf.mxu0 }
 0x54f   :  { %v1262_v13 = vmul.f32 0.01, %v1240_v10  ;;  %v1255_v14 = vadd.f32 %v1974_v12, %v1474_v6  ;;  %vm1258_vm15 = vcmp.ge.f32.partialorder %v1240_v10, 0.0  ;;  %v1267_v19 = vsel %vm1259_vm14, %v1245_v8, %v1263_v11 }
 0x550   :  { %v1249_v15 = vpop.f32.mrf.mxu0 }
 0x551   :  { %v1250_v16 = vadd.f32 %v1474_v6, %v1249_v15  ;;  %v1266_v18 = vsel %vm1258_vm15, %v1240_v10, %v1262_v13  ;;  %v1265_v20 = vmul.f32 0.01, %v1255_v14  ;;  %vm1261_vm1 = vcmp.ge.f32.partialorder %v1255_v14, 0.0 }
 0x552   :  { %2007 = vmatprep.mubr.f32.mxu1 %v1266_v18 }
 0x553   :  { %v1264_v21 = vmul.f32 0.01, %v1250_v16  ;;  %2008 = vmatmul.mubr.f32.vlgmr.msra.gmra.mxu1 %v1267_v19  ;;  %vm1260_vm0 = vcmp.ge.f32.partialorder %v1250_v16, 0.0  ;;  %v1269_v23 = vsel %vm1261_vm1, %v1255_v14, %v1265_v20 }
 0x555   :  { %v1268_v22 = vsel %vm1260_vm0, %v1250_v16, %v1264_v21 }
 0x556   :  { %2010 = vmatprep.mubr.f32.mxu1 %v1268_v22 }
 0x557   :  { %2011 = vmatmul.mubr.f32.gmra.mxu1 %v1269_v23 }
 0x558   :  { %2054 = shalt.err (!%p2051_p9)
}
 0x559   :  { %1395 = dma.vmem_to_hbm [thread:$0]  %s1393_s30, 16, %s2421_s9, [#allocation4]   ;;  %v1476_v24 = vld [vmem:[%s2419_s7 + $0x2] ss:$0 sm:$0xff] }
 0x613   :  { %v2009_v25 = vpop.f32.mrf.mxu1 }
 0x614   :  { %v1367_v26 = vadd.f32 %v2009_v25, %v1476_v24 }
 0x615   :  { %v1361_v17 = vpop.f32.mrf.mxu1 }
 0x616   :  { %1381 = vst [vmem:[%s2420_s8 + $0x8] sm:$0xff] %v1367_v26  ;;  %v1362_v27 = vadd.f32 %v1476_v24, %v1361_v17 }
 0x617   :  { %v2012_v28 = vpop.f32.mrf.mxu1 }
 0x618   :  { %1380 = vst [vmem:[%s2420_s8] sm:$0xff] %v1362_v27  ;;  %v1377_v29 = vadd.f32 %v2012_v28, %v1476_v24 }
 0x619   :  { %v1371_v30 = vpop.f32.mrf.mxu1 }
 0x61a   :  { %1383 = vst [vmem:[%s2420_s8 + $0x18] sm:$0xff] %v1377_v29  ;;  %v1372_v31 = vadd.f32 %v1476_v24, %v1371_v30 }
 0x61c   :  { %1382 = vst [vmem:[%s2420_s8 + $0x10] sm:$0xff] %v1372_v31 }
 0x61d   :  { %2065 = dma.done.wait [#allocation4], 16  }
 0x61e   :  { %2066 = vsyncadd [#allocation4], 4294967280 }
 0x61f   :  { %1401 = vsyncpa [#allocation3], 1 }
 0x620   :  { %1402 = vsyncpa [#allocation4], 1 }

</bundles_post_ra>
